<compile_context>
chip_gen: v6e
topology: v6e:2x2x1
jax: 0.10.0
libtpu: 0.0.40
codegen_flags: <defaults>
</compile_context>

<pallas_src>
import functools

import numpy as np
import jax
import jax.numpy as jnp
from jax.experimental import pallas as pl
from jax.experimental.pallas import tpu as pltpu


# ----------------------------------------------------------------------------
# Fused Pallas kernel: one grid step == one batch row.
# ----------------------------------------------------------------------------
def _actor_critic_kernel(xs_ref, w1a_ref, w1b_ref, b1_ref, s2_ref, w2b_ref,
                         b2_ref, l1w_ref, l1b_ref, hw_ref, hb_ref,
                         probs_ref, logp_ref, value_ref, *, num_actions):
    f32 = jnp.float32
    bf16 = jnp.bfloat16

    xwin = xs_ref[0]                                  # [21, 21*64] bf16 (s2d)

    # conv1 + ReLU: stride-4 8x8 conv == stride-1 2x2 conv on s2d input.
    # Two row taps x block-banded column weights -> [20, 20*16], cols (oj, c).
    h1 = jnp.dot(xwin[0:20], w1a_ref[...], preferred_element_type=f32)
    h1 = h1 + jnp.dot(xwin[1:21], w1b_ref[...], preferred_element_type=f32)
    h1 = jnp.maximum(h1 + b1_ref[...], 0.0).astype(bf16)

    # conv2 + ReLU: 3 kernel-row taps. Stride-2 row gather via 0/1 selection
    # matmul (exact), stride-2 column gather folded into banded weights.
    h2 = jnp.zeros((l1w_ref.shape[0], w2b_ref.shape[2]), f32)    # [9, 9*32]
    for di in range(3):
        rows = jnp.dot(s2_ref[di], h1, preferred_element_type=f32)  # [9, 320]
        h2 = h2 + jnp.dot(rows.astype(bf16), w2b_ref[di],
                          preferred_element_type=f32)               # [9, 288]
    h2 = jnp.maximum(h2 + b2_ref[...], 0.0).astype(bf16)

    # linear1: contract over (oi2, oj2, c) as 9 row-wise matmuls, which avoids
    # an in-kernel [9, 288] -> [1, 2592] lane reshape.
    lin = l1b_ref[...]                                # [1, 256] f32
    for r in range(l1w_ref.shape[0]):
        lin = lin + jnp.dot(h2[r:r + 1], l1w_ref[r],
                            preferred_element_type=f32)

    # Fused policy|value head: one [256, 8] matmul (A actions, value, pad),
    # then softmax / log_softmax over the action columns only.
    z = jnp.dot(lin.astype(bf16), hw_ref[...],
                preferred_element_type=f32) + hb_ref[...]           # [1, 8]
    logits = z[:, :num_actions]
    value_ref[0] = z[:, num_actions:num_actions + 1]
    m = jnp.max(logits, axis=-1, keepdims=True)
    zs = logits - m
    e = jnp.exp(zs)
    s = jnp.sum(e, axis=-1, keepdims=True)
    probs_ref[0] = e * pl.reciprocal(s, approx=True)
    logp_ref[0] = zs - jnp.log(s)


# ----------------------------------------------------------------------------
# Parameters (PyTorch layouts) and one-time conversion to kernel layouts.
# ----------------------------------------------------------------------------
def init_torch_params(key, num_of_inputs, num_of_actions):
    ks = jax.random.split(key, 10)

    def u(k, shape, fan_in):
        bound = 1.0 / jnp.sqrt(jnp.float32(fan_in))
        return jax.random.uniform(k, shape, jnp.float32, -bound, bound)

    return {
        "conv1_w": u(ks[0], (16, num_of_inputs, 8, 8), num_of_inputs * 64),
        "conv1_b": u(ks[1], (16,), num_of_inputs * 64),
        "conv2_w": u(ks[2], (32, 16, 3, 3), 16 * 9),
        "conv2_b": u(ks[3], (32,), 16 * 9),
        "lin1_w": u(ks[4], (256, 32 * 9 * 9), 32 * 81),
        "lin1_b": u(ks[5], (256,), 32 * 81),
        "policy_w": u(ks[6], (num_of_actions, 256), 256),
        "policy_b": u(ks[7], (num_of_actions,), 256),
        "value_w": u(ks[8], (1, 256), 256),
        "value_b": u(ks[9], (1,), 256),
    }


def prepare_kernel_params(tp):
    """One-time (outside jit) conversion to banded/fused bf16 kernel layouts."""
    w1 = np.asarray(tp["conv1_w"])        # [16, C, 8, 8]
    b1 = np.asarray(tp["conv1_b"])        # [16]
    w2 = np.asarray(tp["conv2_w"])        # [32, 16, 3, 3]
    b2 = np.asarray(tp["conv2_b"])        # [32]
    l1w = np.asarray(tp["lin1_w"])        # [256, 2592]
    l1b = np.asarray(tp["lin1_b"])        # [256]
    pw = np.asarray(tp["policy_w"])       # [A, 256]
    pb = np.asarray(tp["policy_b"])       # [A]
    vw = np.asarray(tp["value_w"])        # [1, 256]
    vb = np.asarray(tp["value_b"])        # [1]

    oc1, c_in = w1.shape[0], w1.shape[1]          # 16, C
    oc2 = w2.shape[0]                             # 32
    ow1 = 20                                      # conv1 output side (84x84 in)
    ow2 = 9                                       # conv2 output side
    k1 = 4 * 4 * c_in                             # s2d channel group (64)

    # conv1 -> space-to-depth taps, indexed [bi, bj, (ri, rj, c), co].
    w1s = (w1.reshape(oc1, c_in, 2, 4, 2, 4)      # [co, c, bi, ri, bj, rj]
             .transpose(2, 4, 3, 5, 1, 0)         # [bi, bj, ri, rj, c, co]
             .reshape(2, 2, k1, oc1))
    # Block-banded column weights: rows (J, k1), cols (oj, co).
    w1band = np.zeros((2, ow1 + 1, k1, ow1, oc1), np.float32)
    for bi in range(2):
        for oj in range(ow1):
            for bj in range(2):
                w1band[bi, oj + bj, :, oj, :] = w1s[bi, bj]
    w1a = w1band[0].reshape((ow1 + 1) * k1, ow1 * oc1)     # [1344, 320]
    w1b_ = w1band[1].reshape((ow1 + 1) * k1, ow1 * oc1)

    # conv2 block-banded column weights per kernel-row tap di.
    w2band = np.zeros((3, ow1, oc1, ow2, oc2), np.float32)
    for di in range(3):
        for oj2 in range(ow2):
            for dj in range(3):
                w2band[di, 2 * oj2 + dj, :, oj2, :] = w2[:, :, di, dj].T
    w2band = w2band.reshape(3, ow1 * oc1, ow2 * oc2)       # [3, 320, 288]

    # Stride-2 row-selection (0/1) matrices for conv2's 3 kernel rows.
    s2 = np.zeros((3, ow2, ow1), np.float32)
    for di in range(3):
        for r in range(ow2):
            s2[di, r, 2 * r + di] = 1.0

    # linear1: torch flatten order (co2, oi2, oj2) -> per-row [(oj2, co2), n].
    n_hidden = l1w.shape[0]
    l1w_split = (l1w.reshape(n_hidden, oc2, ow2, ow2)
                    .transpose(2, 3, 1, 0)                  # [oi2, oj2, co2, n]
                    .reshape(ow2, ow2 * oc2, n_hidden))     # [9, 288, 256]

    # Policy & value fused into one [256, 8] matmul (A, value, zero pad).
    a = pw.shape[0]
    hw = np.zeros((n_hidden, 8), np.float32)
    hw[:, :a] = pw.T
    hw[:, a] = vw[0]
    hb = np.zeros((1, 8), np.float32)
    hb[0, :a] = pb
    hb[0, a] = vb[0]

    bf16 = jnp.bfloat16
    return {
        "w1a": jnp.asarray(w1a, bf16),
        "w1b": jnp.asarray(w1b_, bf16),
        "b1": jnp.asarray(np.tile(b1, ow1)[None, :], jnp.float32),   # [1, 320]
        "s2": jnp.asarray(s2, bf16),
        "w2b": jnp.asarray(w2band, bf16),
        "b2": jnp.asarray(np.tile(b2, ow2)[None, :], jnp.float32),   # [1, 288]
        "l1w": jnp.asarray(l1w_split, bf16),
        "l1b": jnp.asarray(l1b[None, :], jnp.float32),               # [1, 256]
        "hw": jnp.asarray(hw, bf16),
        "hb": jnp.asarray(hb, jnp.float32),
    }


# ----------------------------------------------------------------------------
# Forward: one XLA space-to-depth op + ONE fused pallas_call.
# ----------------------------------------------------------------------------
@functools.partial(jax.jit, static_argnames=("num_actions",))
def actor_critic_forward(kparams, x, num_actions):
    B, C, H, W = x.shape
    assert H == 84 and W == 84, "nn.Linear(32*9*9, 256) implies 84x84 input"

    # Space-to-depth by 4: stride-4 8x8 conv becomes a stride-1 2x2 conv.
    # TODO(synk): only remaining non-Pallas op (single transpose+cast fusion).
    xs = (x.reshape(B, C, 21, 4, 21, 4)
           .transpose(0, 2, 4, 3, 5, 1)            # [B, I, J, ri, rj, c]
           .reshape(B, 21, 21 * 16 * C)
           .astype(jnp.bfloat16))
    xs_cols = xs.shape[-1]

    kernel = functools.partial(_actor_critic_kernel, num_actions=num_actions)

    def rep(shape):  # same (weight) block for every grid step -> DMA'd once
        zeros = (0,) * len(shape)
        return pl.BlockSpec(shape, lambda b, z=zeros: z)

    probs, logp, value = pl.pallas_call(
        kernel,
        grid=(B,),
        out_shape=(
            jax.ShapeDtypeStruct((B, 1, num_actions), jnp.float32),
            jax.ShapeDtypeStruct((B, 1, num_actions), jnp.float32),
            jax.ShapeDtypeStruct((B, 1, 1), jnp.float32),
        ),
        in_specs=[
            pl.BlockSpec((1, 21, xs_cols), lambda b: (b, 0, 0)),
            rep(kparams["w1a"].shape),
            rep(kparams["w1b"].shape),
            rep(kparams["b1"].shape),
            rep(kparams["s2"].shape),
            rep(kparams["w2b"].shape),
            rep(kparams["b2"].shape),
            rep(kparams["l1w"].shape),
            rep(kparams["l1b"].shape),
            rep(kparams["hw"].shape),
            rep(kparams["hb"].shape),
        ],
        out_specs=(
            pl.BlockSpec((1, 1, num_actions), lambda b: (b, 0, 0)),
            pl.BlockSpec((1, 1, num_actions), lambda b: (b, 0, 0)),
            pl.BlockSpec((1, 1, 1), lambda b: (b, 0, 0)),
        ),
        compiler_params=pltpu.CompilerParams(
            dimension_semantics=("parallel",)),
    )(xs, kparams["w1a"], kparams["w1b"], kparams["b1"], kparams["s2"],
      kparams["w2b"], kparams["b2"], kparams["l1w"], kparams["l1b"],
      kparams["hw"], kparams["hb"])

    return probs[:, 0, :], logp[:, 0, :], value[:, 0, :]


# ----------------------------------------------------------------------------
# Pure-JAX f32 reference (mirrors the PyTorch module exactly).
# ----------------------------------------------------------------------------
@jax.jit
def reference_forward(tp, x):
    hp = jax.lax.Precision.HIGHEST
    dn = ("NCHW", "OIHW", "NCHW")
    h1 = jax.nn.relu(
        jax.lax.conv_general_dilated(x, tp["conv1_w"], (4, 4), "VALID",
                                     dimension_numbers=dn, precision=hp)
        + tp["conv1_b"][None, :, None, None])
    h2 = jax.nn.relu(
        jax.lax.conv_general_dilated(h1, tp["conv2_w"], (2, 2), "VALID",
                                     dimension_numbers=dn, precision=hp)
        + tp["conv2_b"][None, :, None, None])
    flat = h2.reshape(h2.shape[0], -1)
    lin1 = jnp.dot(flat, tp["lin1_w"].T, precision=hp) + tp["lin1_b"]
    logits = jnp.dot(lin1, tp["policy_w"].T, precision=hp) + tp["policy_b"]
    value = jnp.dot(lin1, tp["value_w"].T, precision=hp) + tp["value_b"]
    return (jax.nn.softmax(logits, axis=-1),
            jax.nn.log_softmax(logits, axis=-1),
            value)


# ----------------------------------------------------------------------------
if __name__ == "__main__":
    num_of_inputs = 4      # e.g. 4 stacked Atari frames
    num_of_actions = 6
    batch = 2

    key = jax.random.PRNGKey(0)
    k_x, k_p = jax.random.split(key)
    # Spatial size 84x84 is dictated by nn.Linear(32*9*9, 256).
    x = jax.random.normal(k_x, (batch, num_of_inputs, 84, 84), jnp.float32)

    torch_params = init_torch_params(k_p, num_of_inputs, num_of_actions)
    kernel_params = prepare_kernel_params(torch_params)   # once, outside jit

    probs, log_probs, value = actor_critic_forward(
        kernel_params, x, num_actions=num_of_actions)
    jax.block_until_ready((probs, log_probs, value))

    assert probs.shape == (batch, num_of_actions)
    assert log_probs.shape == (batch, num_of_actions)
    assert value.shape == (batch, 1)
    # Sanity: rows of probs sum to 1, log_probs consistent with probs
    # (tolerances account for the approx EUP reciprocal in the softmax).
    assert jnp.allclose(jnp.sum(probs, axis=-1), 1.0, atol=1e-2)
    assert jnp.allclose(jnp.exp(log_probs), probs, atol=1e-2)

    # Cross-check against a pure-JAX f32 mirror of the PyTorch module.
    # Tolerances are loosened for the bf16 MXU operands (f32 accumulation).
    r_probs, r_log_probs, r_value = reference_forward(torch_params, x)
    assert jnp.allclose(probs, r_probs, atol=2e-2, rtol=2e-2)
    assert jnp.allclose(log_probs, r_log_probs, atol=2e-2, rtol=2e-2)
    assert jnp.allclose(value, r_value, atol=2e-2, rtol=2e-2)

    print("KERNEL_OK")
</pallas_src>

<mosaic_0001>
module attributes {stable_mosaic.version = 11 : i64} {
  func.func @_actor_critic_kernel(%arg0: i32, %arg1: memref<1x21x1344xbf16, #tpu.memory_space<vmem>>, %arg2: memref<1344x320xbf16, #tpu.memory_space<vmem>>, %arg3: memref<1344x320xbf16, #tpu.memory_space<vmem>>, %arg4: memref<1x320xf32, #tpu.memory_space<vmem>>, %arg5: memref<3x9x20xbf16, #tpu.memory_space<vmem>>, %arg6: memref<3x320x288xbf16, #tpu.memory_space<vmem>>, %arg7: memref<1x288xf32, #tpu.memory_space<vmem>>, %arg8: memref<9x288x256xbf16, #tpu.memory_space<vmem>>, %arg9: memref<1x256xf32, #tpu.memory_space<vmem>>, %arg10: memref<256x8xbf16, #tpu.memory_space<vmem>>, %arg11: memref<1x8xf32, #tpu.memory_space<vmem>>, %arg12: memref<1x1x6xf32, #tpu.memory_space<vmem>>, %arg13: memref<1x1x6xf32, #tpu.memory_space<vmem>>, %arg14: memref<1x1x1xf32, #tpu.memory_space<vmem>>) attributes {dimension_semantics = [#tpu.dimension_semantics<parallel>], iteration_bounds = array<i64: 2>, scalar_prefetch = 0 : i64, scratch_operands = 0 : i64, tpu.core_type = #tpu.core_type<tc>, window_params = [{transform_indices = @transform_0, window_bounds = array<i64: 1, 21, 1344>}, {pipeline_mode = #tpu.pipeline_mode<synchronous>, transform_indices = @transform_1, window_bounds = array<i64: 1344, 320>}, {pipeline_mode = #tpu.pipeline_mode<synchronous>, transform_indices = @transform_2, window_bounds = array<i64: 1344, 320>}, {pipeline_mode = #tpu.pipeline_mode<synchronous>, transform_indices = @transform_3, window_bounds = array<i64: 1, 320>}, {pipeline_mode = #tpu.pipeline_mode<synchronous>, transform_indices = @transform_4, window_bounds = array<i64: 3, 9, 20>}, {pipeline_mode = #tpu.pipeline_mode<synchronous>, transform_indices = @transform_5, window_bounds = array<i64: 3, 320, 288>}, {pipeline_mode = #tpu.pipeline_mode<synchronous>, transform_indices = @transform_6, window_bounds = array<i64: 1, 288>}, {pipeline_mode = #tpu.pipeline_mode<synchronous>, transform_indices = @transform_7, window_bounds = array<i64: 9, 288, 256>}, {pipeline_mode = #tpu.pipeline_mode<synchronous>, transform_indices = @transform_8, window_bounds = array<i64: 1, 256>}, {pipeline_mode = #tpu.pipeline_mode<synchronous>, transform_indices = @transform_9, window_bounds = array<i64: 256, 8>}, {pipeline_mode = #tpu.pipeline_mode<synchronous>, transform_indices = @transform_10, window_bounds = array<i64: 1, 8>}, {transform_indices = @transform_11, window_bounds = array<i64: 1, 1, 6>}, {transform_indices = @transform_12, window_bounds = array<i64: 1, 1, 6>}, {transform_indices = @transform_13, window_bounds = array<i64: 1, 1, 1>}]} {
    %c0 = arith.constant 0 : index
    %c0_0 = arith.constant 0 : index
    %c0_1 = arith.constant 0 : index
    %0 = vector.load %arg1[%c0, %c0_0, %c0_1] : memref<1x21x1344xbf16, #tpu.memory_space<vmem>>, vector<1x21x1344xbf16>
    %1 = vector.shape_cast %0 : vector<1x21x1344xbf16> to vector<21x1344xbf16>
    %2 = vector.extract_strided_slice %1 {offsets = [0, 0], sizes = [20, 1344], strides = [1, 1]} : vector<21x1344xbf16> to vector<20x1344xbf16>
    %c0_2 = arith.constant 0 : index
    %c0_3 = arith.constant 0 : index
    %3 = vector.load %arg2[%c0_2, %c0_3] : memref<1344x320xbf16, #tpu.memory_space<vmem>>, vector<1344x320xbf16>
    %cst = arith.constant dense<0.000000e+00> : vector<20x320xf32>
    %4 = tpu.matmul %2, %3, %cst {dimension_numbers = #tpu.dot_dimension_numbers<[1], [0], [0], [1], [0, 0, 1, 1], [], []>} : vector<20x1344xbf16>, vector<1344x320xbf16>, vector<20x320xf32> -> vector<20x320xf32>
    %5 = vector.extract_strided_slice %1 {offsets = [1, 0], sizes = [20, 1344], strides = [1, 1]} : vector<21x1344xbf16> to vector<20x1344xbf16>
    %c0_4 = arith.constant 0 : index
    %c0_5 = arith.constant 0 : index
    %6 = vector.load %arg3[%c0_4, %c0_5] : memref<1344x320xbf16, #tpu.memory_space<vmem>>, vector<1344x320xbf16>
    %cst_6 = arith.constant dense<0.000000e+00> : vector<20x320xf32>
    %7 = tpu.matmul %5, %6, %cst_6 {dimension_numbers = #tpu.dot_dimension_numbers<[1], [0], [0], [1], [0, 0, 1, 1], [], []>} : vector<20x1344xbf16>, vector<1344x320xbf16>, vector<20x320xf32> -> vector<20x320xf32>
    %8 = arith.addf %4, %7 : vector<20x320xf32>
    %c0_7 = arith.constant 0 : index
    %c0_8 = arith.constant 0 : index
    %9 = vector.load %arg4[%c0_7, %c0_8] : memref<1x320xf32, #tpu.memory_space<vmem>>, vector<1x320xf32>
    %10 = vector.broadcast %9 : vector<1x320xf32> to vector<20x320xf32>
    %11 = arith.addf %8, %10 : vector<20x320xf32>
    %cst_9 = arith.constant 0.000000e+00 : f32
    %12 = vector.broadcast %cst_9 : f32 to vector<20x320xf32>
    %13 = arith.maximumf %11, %12 : vector<20x320xf32>
    %14 = arith.truncf %13 : vector<20x320xf32> to vector<20x320xbf16>
    %cst_10 = arith.constant 0.000000e+00 : f32
    %15 = vector.broadcast %cst_10 : f32 to vector<9x288xf32>
    %c0_11 = arith.constant 0 : index
    %c0_12 = arith.constant 0 : index
    %c0_13 = arith.constant 0 : index
    %16 = vector.load %arg5[%c0_11, %c0_12, %c0_13] : memref<3x9x20xbf16, #tpu.memory_space<vmem>>, vector<1x9x20xbf16>
    %17 = vector.shape_cast %16 : vector<1x9x20xbf16> to vector<9x20xbf16>
    %cst_14 = arith.constant dense<0.000000e+00> : vector<9x320xf32>
    %18 = tpu.matmul %17, %14, %cst_14 {dimension_numbers = #tpu.dot_dimension_numbers<[1], [0], [0], [1], [0, 0, 1, 1], [], []>} : vector<9x20xbf16>, vector<20x320xbf16>, vector<9x320xf32> -> vector<9x320xf32>
    %19 = arith.truncf %18 : vector<9x320xf32> to vector<9x320xbf16>
    %c0_15 = arith.constant 0 : index
    %c0_16 = arith.constant 0 : index
    %c0_17 = arith.constant 0 : index
    %20 = vector.load %arg6[%c0_15, %c0_16, %c0_17] : memref<3x320x288xbf16, #tpu.memory_space<vmem>>, vector<1x320x288xbf16>
    %21 = vector.shape_cast %20 : vector<1x320x288xbf16> to vector<320x288xbf16>
    %cst_18 = arith.constant dense<0.000000e+00> : vector<9x288xf32>
    %22 = tpu.matmul %19, %21, %cst_18 {dimension_numbers = #tpu.dot_dimension_numbers<[1], [0], [0], [1], [0, 0, 1, 1], [], []>} : vector<9x320xbf16>, vector<320x288xbf16>, vector<9x288xf32> -> vector<9x288xf32>
    %23 = arith.addf %15, %22 : vector<9x288xf32>
    %c1 = arith.constant 1 : index
    %c0_19 = arith.constant 0 : index
    %c0_20 = arith.constant 0 : index
    %24 = vector.load %arg5[%c1, %c0_19, %c0_20] : memref<3x9x20xbf16, #tpu.memory_space<vmem>>, vector<1x9x20xbf16>
    %25 = vector.shape_cast %24 : vector<1x9x20xbf16> to vector<9x20xbf16>
    %cst_21 = arith.constant dense<0.000000e+00> : vector<9x320xf32>
    %26 = tpu.matmul %25, %14, %cst_21 {dimension_numbers = #tpu.dot_dimension_numbers<[1], [0], [0], [1], [0, 0, 1, 1], [], []>} : vector<9x20xbf16>, vector<20x320xbf16>, vector<9x320xf32> -> vector<9x320xf32>
    %27 = arith.truncf %26 : vector<9x320xf32> to vector<9x320xbf16>
    %c1_22 = arith.constant 1 : index
    %c0_23 = arith.constant 0 : index
    %c0_24 = arith.constant 0 : index
    %28 = vector.load %arg6[%c1_22, %c0_23, %c0_24] : memref<3x320x288xbf16, #tpu.memory_space<vmem>>, vector<1x320x288xbf16>
    %29 = vector.shape_cast %28 : vector<1x320x288xbf16> to vector<320x288xbf16>
    %cst_25 = arith.constant dense<0.000000e+00> : vector<9x288xf32>
    %30 = tpu.matmul %27, %29, %cst_25 {dimension_numbers = #tpu.dot_dimension_numbers<[1], [0], [0], [1], [0, 0, 1, 1], [], []>} : vector<9x320xbf16>, vector<320x288xbf16>, vector<9x288xf32> -> vector<9x288xf32>
    %31 = arith.addf %23, %30 : vector<9x288xf32>
    %c2 = arith.constant 2 : index
    %c0_26 = arith.constant 0 : index
    %c0_27 = arith.constant 0 : index
    %32 = vector.load %arg5[%c2, %c0_26, %c0_27] : memref<3x9x20xbf16, #tpu.memory_space<vmem>>, vector<1x9x20xbf16>
    %33 = vector.shape_cast %32 : vector<1x9x20xbf16> to vector<9x20xbf16>
    %cst_28 = arith.constant dense<0.000000e+00> : vector<9x320xf32>
    %34 = tpu.matmul %33, %14, %cst_28 {dimension_numbers = #tpu.dot_dimension_numbers<[1], [0], [0], [1], [0, 0, 1, 1], [], []>} : vector<9x20xbf16>, vector<20x320xbf16>, vector<9x320xf32> -> vector<9x320xf32>
    %35 = arith.truncf %34 : vector<9x320xf32> to vector<9x320xbf16>
    %c2_29 = arith.constant 2 : index
    %c0_30 = arith.constant 0 : index
    %c0_31 = arith.constant 0 : index
    %36 = vector.load %arg6[%c2_29, %c0_30, %c0_31] : memref<3x320x288xbf16, #tpu.memory_space<vmem>>, vector<1x320x288xbf16>
    %37 = vector.shape_cast %36 : vector<1x320x288xbf16> to vector<320x288xbf16>
    %cst_32 = arith.constant dense<0.000000e+00> : vector<9x288xf32>
    %38 = tpu.matmul %35, %37, %cst_32 {dimension_numbers = #tpu.dot_dimension_numbers<[1], [0], [0], [1], [0, 0, 1, 1], [], []>} : vector<9x320xbf16>, vector<320x288xbf16>, vector<9x288xf32> -> vector<9x288xf32>
    %39 = arith.addf %31, %38 : vector<9x288xf32>
    %c0_33 = arith.constant 0 : index
    %c0_34 = arith.constant 0 : index
    %40 = vector.load %arg7[%c0_33, %c0_34] : memref<1x288xf32, #tpu.memory_space<vmem>>, vector<1x288xf32>
    %41 = vector.broadcast %40 : vector<1x288xf32> to vector<9x288xf32>
    %42 = arith.addf %39, %41 : vector<9x288xf32>
    %cst_35 = arith.constant 0.000000e+00 : f32
    %43 = vector.broadcast %cst_35 : f32 to vector<9x288xf32>
    %44 = arith.maximumf %42, %43 : vector<9x288xf32>
    %45 = arith.truncf %44 : vector<9x288xf32> to vector<9x288xbf16>
    %c0_36 = arith.constant 0 : index
    %c0_37 = arith.constant 0 : index
    %46 = vector.load %arg9[%c0_36, %c0_37] : memref<1x256xf32, #tpu.memory_space<vmem>>, vector<1x256xf32>
    %47 = vector.extract_strided_slice %45 {offsets = [0, 0], sizes = [1, 288], strides = [1, 1]} : vector<9x288xbf16> to vector<1x288xbf16>
    %c0_38 = arith.constant 0 : index
    %c0_39 = arith.constant 0 : index
    %c0_40 = arith.constant 0 : index
    %48 = vector.load %arg8[%c0_38, %c0_39, %c0_40] : memref<9x288x256xbf16, #tpu.memory_space<vmem>>, vector<1x288x256xbf16>
    %49 = vector.shape_cast %48 : vector<1x288x256xbf16> to vector<288x256xbf16>
    %cst_41 = arith.constant dense<0.000000e+00> : vector<1x256xf32>
    %50 = tpu.matmul %47, %49, %cst_41 {dimension_numbers = #tpu.dot_dimension_numbers<[1], [0], [0], [1], [0, 0, 1, 1], [], []>} : vector<1x288xbf16>, vector<288x256xbf16>, vector<1x256xf32> -> vector<1x256xf32>
    %51 = arith.addf %46, %50 : vector<1x256xf32>
    %52 = vector.extract_strided_slice %45 {offsets = [1, 0], sizes = [1, 288], strides = [1, 1]} : vector<9x288xbf16> to vector<1x288xbf16>
    %c1_42 = arith.constant 1 : index
    %c0_43 = arith.constant 0 : index
    %c0_44 = arith.constant 0 : index
    %53 = vector.load %arg8[%c1_42, %c0_43, %c0_44] : memref<9x288x256xbf16, #tpu.memory_space<vmem>>, vector<1x288x256xbf16>
    %54 = vector.shape_cast %53 : vector<1x288x256xbf16> to vector<288x256xbf16>
    %cst_45 = arith.constant dense<0.000000e+00> : vector<1x256xf32>
    %55 = tpu.matmul %52, %54, %cst_45 {dimension_numbers = #tpu.dot_dimension_numbers<[1], [0], [0], [1], [0, 0, 1, 1], [], []>} : vector<1x288xbf16>, vector<288x256xbf16>, vector<1x256xf32> -> vector<1x256xf32>
    %56 = arith.addf %51, %55 : vector<1x256xf32>
    %57 = vector.extract_strided_slice %45 {offsets = [2, 0], sizes = [1, 288], strides = [1, 1]} : vector<9x288xbf16> to vector<1x288xbf16>
    %c2_46 = arith.constant 2 : index
    %c0_47 = arith.constant 0 : index
    %c0_48 = arith.constant 0 : index
    %58 = vector.load %arg8[%c2_46, %c0_47, %c0_48] : memref<9x288x256xbf16, #tpu.memory_space<vmem>>, vector<1x288x256xbf16>
    %59 = vector.shape_cast %58 : vector<1x288x256xbf16> to vector<288x256xbf16>
    %cst_49 = arith.constant dense<0.000000e+00> : vector<1x256xf32>
    %60 = tpu.matmul %57, %59, %cst_49 {dimension_numbers = #tpu.dot_dimension_numbers<[1], [0], [0], [1], [0, 0, 1, 1], [], []>} : vector<1x288xbf16>, vector<288x256xbf16>, vector<1x256xf32> -> vector<1x256xf32>
    %61 = arith.addf %56, %60 : vector<1x256xf32>
    %62 = vector.extract_strided_slice %45 {offsets = [3, 0], sizes = [1, 288], strides = [1, 1]} : vector<9x288xbf16> to vector<1x288xbf16>
    %c3 = arith.constant 3 : index
    %c0_50 = arith.constant 0 : index
    %c0_51 = arith.constant 0 : index
    %63 = vector.load %arg8[%c3, %c0_50, %c0_51] : memref<9x288x256xbf16, #tpu.memory_space<vmem>>, vector<1x288x256xbf16>
    %64 = vector.shape_cast %63 : vector<1x288x256xbf16> to vector<288x256xbf16>
    %cst_52 = arith.constant dense<0.000000e+00> : vector<1x256xf32>
    %65 = tpu.matmul %62, %64, %cst_52 {dimension_numbers = #tpu.dot_dimension_numbers<[1], [0], [0], [1], [0, 0, 1, 1], [], []>} : vector<1x288xbf16>, vector<288x256xbf16>, vector<1x256xf32> -> vector<1x256xf32>
    %66 = arith.addf %61, %65 : vector<1x256xf32>
    %67 = vector.extract_strided_slice %45 {offsets = [4, 0], sizes = [1, 288], strides = [1, 1]} : vector<9x288xbf16> to vector<1x288xbf16>
    %c4 = arith.constant 4 : index
    %c0_53 = arith.constant 0 : index
    %c0_54 = arith.constant 0 : index
    %68 = vector.load %arg8[%c4, %c0_53, %c0_54] : memref<9x288x256xbf16, #tpu.memory_space<vmem>>, vector<1x288x256xbf16>
    %69 = vector.shape_cast %68 : vector<1x288x256xbf16> to vector<288x256xbf16>
    %cst_55 = arith.constant dense<0.000000e+00> : vector<1x256xf32>
    %70 = tpu.matmul %67, %69, %cst_55 {dimension_numbers = #tpu.dot_dimension_numbers<[1], [0], [0], [1], [0, 0, 1, 1], [], []>} : vector<1x288xbf16>, vector<288x256xbf16>, vector<1x256xf32> -> vector<1x256xf32>
    %71 = arith.addf %66, %70 : vector<1x256xf32>
    %72 = vector.extract_strided_slice %45 {offsets = [5, 0], sizes = [1, 288], strides = [1, 1]} : vector<9x288xbf16> to vector<1x288xbf16>
    %c5 = arith.constant 5 : index
    %c0_56 = arith.constant 0 : index
    %c0_57 = arith.constant 0 : index
    %73 = vector.load %arg8[%c5, %c0_56, %c0_57] : memref<9x288x256xbf16, #tpu.memory_space<vmem>>, vector<1x288x256xbf16>
    %74 = vector.shape_cast %73 : vector<1x288x256xbf16> to vector<288x256xbf16>
    %cst_58 = arith.constant dense<0.000000e+00> : vector<1x256xf32>
    %75 = tpu.matmul %72, %74, %cst_58 {dimension_numbers = #tpu.dot_dimension_numbers<[1], [0], [0], [1], [0, 0, 1, 1], [], []>} : vector<1x288xbf16>, vector<288x256xbf16>, vector<1x256xf32> -> vector<1x256xf32>
    %76 = arith.addf %71, %75 : vector<1x256xf32>
    %77 = vector.extract_strided_slice %45 {offsets = [6, 0], sizes = [1, 288], strides = [1, 1]} : vector<9x288xbf16> to vector<1x288xbf16>
    %c6 = arith.constant 6 : index
    %c0_59 = arith.constant 0 : index
    %c0_60 = arith.constant 0 : index
    %78 = vector.load %arg8[%c6, %c0_59, %c0_60] : memref<9x288x256xbf16, #tpu.memory_space<vmem>>, vector<1x288x256xbf16>
    %79 = vector.shape_cast %78 : vector<1x288x256xbf16> to vector<288x256xbf16>
    %cst_61 = arith.constant dense<0.000000e+00> : vector<1x256xf32>
    %80 = tpu.matmul %77, %79, %cst_61 {dimension_numbers = #tpu.dot_dimension_numbers<[1], [0], [0], [1], [0, 0, 1, 1], [], []>} : vector<1x288xbf16>, vector<288x256xbf16>, vector<1x256xf32> -> vector<1x256xf32>
    %81 = arith.addf %76, %80 : vector<1x256xf32>
    %82 = vector.extract_strided_slice %45 {offsets = [7, 0], sizes = [1, 288], strides = [1, 1]} : vector<9x288xbf16> to vector<1x288xbf16>
    %c7 = arith.constant 7 : index
    %c0_62 = arith.constant 0 : index
    %c0_63 = arith.constant 0 : index
    %83 = vector.load %arg8[%c7, %c0_62, %c0_63] : memref<9x288x256xbf16, #tpu.memory_space<vmem>>, vector<1x288x256xbf16>
    %84 = vector.shape_cast %83 : vector<1x288x256xbf16> to vector<288x256xbf16>
    %cst_64 = arith.constant dense<0.000000e+00> : vector<1x256xf32>
    %85 = tpu.matmul %82, %84, %cst_64 {dimension_numbers = #tpu.dot_dimension_numbers<[1], [0], [0], [1], [0, 0, 1, 1], [], []>} : vector<1x288xbf16>, vector<288x256xbf16>, vector<1x256xf32> -> vector<1x256xf32>
    %86 = arith.addf %81, %85 : vector<1x256xf32>
    %87 = vector.extract_strided_slice %45 {offsets = [8, 0], sizes = [1, 288], strides = [1, 1]} : vector<9x288xbf16> to vector<1x288xbf16>
    %c8 = arith.constant 8 : index
    %c0_65 = arith.constant 0 : index
    %c0_66 = arith.constant 0 : index
    %88 = vector.load %arg8[%c8, %c0_65, %c0_66] : memref<9x288x256xbf16, #tpu.memory_space<vmem>>, vector<1x288x256xbf16>
    %89 = vector.shape_cast %88 : vector<1x288x256xbf16> to vector<288x256xbf16>
    %cst_67 = arith.constant dense<0.000000e+00> : vector<1x256xf32>
    %90 = tpu.matmul %87, %89, %cst_67 {dimension_numbers = #tpu.dot_dimension_numbers<[1], [0], [0], [1], [0, 0, 1, 1], [], []>} : vector<1x288xbf16>, vector<288x256xbf16>, vector<1x256xf32> -> vector<1x256xf32>
    %91 = arith.addf %86, %90 : vector<1x256xf32>
    %92 = arith.truncf %91 : vector<1x256xf32> to vector<1x256xbf16>
    %c0_68 = arith.constant 0 : index
    %c0_69 = arith.constant 0 : index
    %93 = vector.load %arg10[%c0_68, %c0_69] : memref<256x8xbf16, #tpu.memory_space<vmem>>, vector<256x8xbf16>
    %cst_70 = arith.constant dense<0.000000e+00> : vector<1x8xf32>
    %94 = tpu.matmul %92, %93, %cst_70 {dimension_numbers = #tpu.dot_dimension_numbers<[1], [0], [0], [1], [0, 0, 1, 1], [], []>} : vector<1x256xbf16>, vector<256x8xbf16>, vector<1x8xf32> -> vector<1x8xf32>
    %c0_71 = arith.constant 0 : index
    %c0_72 = arith.constant 0 : index
    %95 = vector.load %arg11[%c0_71, %c0_72] : memref<1x8xf32, #tpu.memory_space<vmem>>, vector<1x8xf32>
    %96 = arith.addf %94, %95 : vector<1x8xf32>
    %97 = vector.extract_strided_slice %96 {offsets = [0, 0], sizes = [1, 6], strides = [1, 1]} : vector<1x8xf32> to vector<1x6xf32>
    %98 = vector.extract_strided_slice %96 {offsets = [0, 6], sizes = [1, 1], strides = [1, 1]} : vector<1x8xf32> to vector<1x1xf32>
    %c0_73 = arith.constant 0 : index
    %c0_74 = arith.constant 0 : index
    %c0_75 = arith.constant 0 : index
    %99 = vector.load %arg14[%c0_73, %c0_74, %c0_75] : memref<1x1x1xf32, #tpu.memory_space<vmem>>, vector<1x1x1xf32>
    %100 = vector.shape_cast %99 : vector<1x1x1xf32> to vector<1x1xf32>
    %101 = vector.shape_cast %98 : vector<1x1xf32> to vector<1x1x1xf32>
    tpu.vector_store %arg14[%c0_73, %c0_74, %c0_75], %101 {strides = array<i32>} : memref<1x1x1xf32, #tpu.memory_space<vmem>>, vector<1x1x1xf32>,
    %cst_76 = arith.constant dense<0xFF800000> : vector<1xf32>
    %102 = vector.multi_reduction <maximumf>, %97, %cst_76 [1] : vector<1x6xf32> to vector<1xf32>
    %103 = vector.shape_cast %102 : vector<1xf32> to vector<1x1xf32>
    %104 = vector.broadcast %103 : vector<1x1xf32> to vector<1x6xf32>
    %105 = arith.subf %97, %104 : vector<1x6xf32>
    %106 = math.exp %105 : vector<1x6xf32>
    %cst_77 = arith.constant dense<0.000000e+00> : vector<1xf32>
    %107 = vector.multi_reduction <add>, %106, %cst_77 [1] : vector<1x6xf32> to vector<1xf32>
    %108 = vector.shape_cast %107 : vector<1xf32> to vector<1x1xf32>
    %109 = tpu.reciprocal %108 {approx = true} : vector<1x1xf32> -> vector<1x1xf32>
    %110 = vector.broadcast %109 : vector<1x1xf32> to vector<1x6xf32>
    %111 = arith.mulf %106, %110 : vector<1x6xf32>
    %c0_78 = arith.constant 0 : index
    %c0_79 = arith.constant 0 : index
    %c0_80 = arith.constant 0 : index
    %112 = vector.load %arg12[%c0_78, %c0_79, %c0_80] : memref<1x1x6xf32, #tpu.memory_space<vmem>>, vector<1x1x6xf32>
    %113 = vector.shape_cast %112 : vector<1x1x6xf32> to vector<1x6xf32>
    %114 = vector.shape_cast %111 : vector<1x6xf32> to vector<1x1x6xf32>
    tpu.vector_store %arg12[%c0_78, %c0_79, %c0_80], %114 {strides = array<i32>} : memref<1x1x6xf32, #tpu.memory_space<vmem>>, vector<1x1x6xf32>,
    %115 = math.log %108 : vector<1x1xf32>
    %116 = vector.broadcast %115 : vector<1x1xf32> to vector<1x6xf32>
    %117 = arith.subf %105, %116 : vector<1x6xf32>
    %c0_81 = arith.constant 0 : index
    %c0_82 = arith.constant 0 : index
    %c0_83 = arith.constant 0 : index
    %118 = vector.load %arg13[%c0_81, %c0_82, %c0_83] : memref<1x1x6xf32, #tpu.memory_space<vmem>>, vector<1x1x6xf32>
    %119 = vector.shape_cast %118 : vector<1x1x6xf32> to vector<1x6xf32>
    %120 = vector.shape_cast %117 : vector<1x6xf32> to vector<1x1x6xf32>
    tpu.vector_store %arg13[%c0_81, %c0_82, %c0_83], %120 {strides = array<i32>} : memref<1x1x6xf32, #tpu.memory_space<vmem>>, vector<1x1x6xf32>,
    return
  }
  func.func @transform_0(%arg0: i32) -> (i32, i32, i32) {
    %c0_i32 = arith.constant 0 : i32
    %c0_i32_0 = arith.constant 0 : i32
    %c0_i32_1 = arith.constant 0 : i32
    return %arg0, %c0_i32, %c0_i32_0 : i32, i32, i32
  }
  func.func @transform_1(%arg0: i32) -> (i32, i32) {
    %c0_i32 = arith.constant 0 : i32
    %c0_i32_0 = arith.constant 0 : i32
    %c0_i32_1 = arith.constant 0 : i32
    return %c0_i32, %c0_i32_0 : i32, i32
  }
  func.func @transform_2(%arg0: i32) -> (i32, i32) {
    %c0_i32 = arith.constant 0 : i32
    %c0_i32_0 = arith.constant 0 : i32
    %c0_i32_1 = arith.constant 0 : i32
    return %c0_i32, %c0_i32_0 : i32, i32
  }
  func.func @transform_3(%arg0: i32) -> (i32, i32) {
    %c0_i32 = arith.constant 0 : i32
    %c0_i32_0 = arith.constant 0 : i32
    %c0_i32_1 = arith.constant 0 : i32
    return %c0_i32, %c0_i32_0 : i32, i32
  }
  func.func @transform_4(%arg0: i32) -> (i32, i32, i32) {
    %c0_i32 = arith.constant 0 : i32
    %c0_i32_0 = arith.constant 0 : i32
    %c0_i32_1 = arith.constant 0 : i32
    %c0_i32_2 = arith.constant 0 : i32
    return %c0_i32, %c0_i32_0, %c0_i32_1 : i32, i32, i32
  }
  func.func @transform_5(%arg0: i32) -> (i32, i32, i32) {
    %c0_i32 = arith.constant 0 : i32
    %c0_i32_0 = arith.constant 0 : i32
    %c0_i32_1 = arith.constant 0 : i32
    %c0_i32_2 = arith.constant 0 : i32
    return %c0_i32, %c0_i32_0, %c0_i32_1 : i32, i32, i32
  }
  func.func @transform_6(%arg0: i32) -> (i32, i32) {
    %c0_i32 = arith.constant 0 : i32
    %c0_i32_0 = arith.constant 0 : i32
    %c0_i32_1 = arith.constant 0 : i32
    return %c0_i32, %c0_i32_0 : i32, i32
  }
  func.func @transform_7(%arg0: i32) -> (i32, i32, i32) {
    %c0_i32 = arith.constant 0 : i32
    %c0_i32_0 = arith.constant 0 : i32
    %c0_i32_1 = arith.constant 0 : i32
    %c0_i32_2 = arith.constant 0 : i32
    return %c0_i32, %c0_i32_0, %c0_i32_1 : i32, i32, i32
  }
  func.func @transform_8(%arg0: i32) -> (i32, i32) {
    %c0_i32 = arith.constant 0 : i32
    %c0_i32_0 = arith.constant 0 : i32
    %c0_i32_1 = arith.constant 0 : i32
    return %c0_i32, %c0_i32_0 : i32, i32
  }
  func.func @transform_9(%arg0: i32) -> (i32, i32) {
    %c0_i32 = arith.constant 0 : i32
    %c0_i32_0 = arith.constant 0 : i32
    %c0_i32_1 = arith.constant 0 : i32
    return %c0_i32, %c0_i32_0 : i32, i32
  }
  func.func @transform_10(%arg0: i32) -> (i32, i32) {
    %c0_i32 = arith.constant 0 : i32
    %c0_i32_0 = arith.constant 0 : i32
    %c0_i32_1 = arith.constant 0 : i32
    return %c0_i32, %c0_i32_0 : i32, i32
  }
  func.func @transform_11(%arg0: i32) -> (i32, i32, i32) {
    %c0_i32 = arith.constant 0 : i32
    %c0_i32_0 = arith.constant 0 : i32
    %c0_i32_1 = arith.constant 0 : i32
    return %arg0, %c0_i32, %c0_i32_0 : i32, i32, i32
  }
  func.func @transform_12(%arg0: i32) -> (i32, i32, i32) {
    %c0_i32 = arith.constant 0 : i32
    %c0_i32_0 = arith.constant 0 : i32
    %c0_i32_1 = arith.constant 0 : i32
    return %arg0, %c0_i32, %c0_i32_0 : i32, i32, i32
  }
  func.func @transform_13(%arg0: i32) -> (i32, i32, i32) {
    %c0_i32 = arith.constant 0 : i32
    %c0_i32_0 = arith.constant 0 : i32
    %c0_i32_1 = arith.constant 0 : i32
    return %arg0, %c0_i32, %c0_i32_0 : i32, i32, i32
  }
}

</mosaic_0001>

<bundles_post_ra>
// kernel: actor_critic_forward.1
= control target key start
LH: loop header
LB: loop body
LE: loop exit
PB: predicated region body
PF: predicated region fallthrough
CT: control target
= control target key end

     0   :  { %s18313_s0 = inlined_call_operand.vmem [shape: bf16[2,21,1344], index: 0, kind: input, shape index: {}]   ;;  %s18314_s1 = inlined_call_operand.vmem [shape: bf16[1344,320], index: 1, kind: input, shape index: {}]   ;;  %s18315_s2 = inlined_call_operand.vmem [shape: bf16[1344,320], index: 2, kind: input, shape index: {}]   ;;  %s18316_s3 = inlined_call_operand.vmem [shape: f32[1,320], index: 3, kind: input, shape index: {}]   ;;  %s18317_s4 = inlined_call_operand.vmem [shape: bf16[3,9,20], index: 4, kind: input, shape index: {}]   ;;  %s18318_s5 = inlined_call_operand.vmem [shape: bf16[3,320,288], index: 5, kind: input, shape index: {}]   ;;  %s18319_s6 = inlined_call_operand.vmem [shape: f32[1,288], index: 6, kind: input, shape index: {}]   ;;  %s18320_s7 = inlined_call_operand.vmem [shape: bf16[9,288,256], index: 7, kind: input, shape index: {}]   ;;  %s18321_s8 = inlined_call_operand.vmem [shape: f32[1,256], index: 8, kind: input, shape index: {}]   ;;  %s18322_s9 = inlined_call_operand.vmem [shape: bf16[256,8], index: 9, kind: input, shape index: {}]   ;;  %s18323_s10 = inlined_call_operand.vmem [shape: f32[1,8], index: 10, kind: input, shape index: {}]   ;;  %s18324_s11 = inlined_call_operand.hbm [shape: f32[2,1,6], index: 11, kind: output, shape index: {0}]   ;;  %s18325_s12 = inlined_call_operand.hbm [shape: f32[2,1,6], index: 12, kind: output, shape index: {1}]   ;;  %s18326_s13 = inlined_call_operand.vmem [shape: f32[2,1,1], index: 13, kind: output, shape index: {2}]  }
   0x1   :  { %18333 = sst [smem:[#allocation13_spill]] %s18313_s0 }
   0x2   :  { %19 = vsyncpa [#allocation3], 0 }
   0x3   :  { %21 = vsyncpa [#allocation3 + $0x1], 0 }
   0x4   :  { %22 = vsyncpa [#allocation5], 0 }
   0x5   :  { %24 = vsyncpa [#allocation5 + $0x1], 0  ;;  %s14414_s25 = smov 0   ;;  %s14416_s26 = smov 0  }
   0x6   :  { %s14418_s27 = smov 0   ;;  %s14420_s28 = smov 0  }
   0x7 LB: > { %18334 = sst [smem:[#allocation8_spill]] %s14323_s25  ;;  %s14435_s29 = sadd.s32 4294967295, %s14335_s28   ;;  %s14335_s28 = sphi %s14420_s28, %s18345_s28   ;;  %s14331_s27 = sphi %s14418_s27, %s18347_s27   ;;  %s14327_s26 = sphi %s14416_s26, %s18349_s26   ;;  %s14323_s25 = sphi %s14414_s25, %s18348_s25  }
   0x8   : > { %18335 = sst [smem:[#allocation9_spill]] %s14331_s27  ;;  %s10692_s30 = sadd.s32 4294967294, %s14335_s28  }
   0x9   : > { %s14439_s14 = sadd.s32 1, %s14335_s28   ;;  %s273_s15 = sadd.s32 1, %s14331_s27 }
   0xa   : > { %18336 = sst [smem:[#allocation10_spill]] %s14439_s14  ;;  %s270_s16 = ssub.s32 %s14335_s28, %s14439_s14 }
   0xb   : > { %p283_p0 = scmp.ne.s32.totalorder %s14331_s27, %s14327_s26  ;;  %p271_p1 = scmp.eq.s32.totalorder %s270_s16, 0 }
   0xc   : > { %p284_p2 = scmp.eq.s32.totalorder %s14435_s29, 1  ;;  %p289_p3 = scmp.ne.s32.totalorder %s14327_s26, %s14323_s25 }
   0xd   : > { %p290_p4 = scmp.eq.s32.totalorder %s10692_s30, 1  ;;  %p10695_p7 = scmp.ge.s32.totalorder %s14335_s28, 1 }
   0xe   : > { %s14450_s17 = scalar_select %p271_p1, %s14331_s27, %s273_s15  }
   0xf   : > { %p14452_p5 = por %p284_p2, %p283_p0  ;;  %p14456_p6 = por %p290_p4, %p289_p3 }
  0x10   : > { %18337 = sst [smem:[#allocation11_spill]] %s14450_s17  ;;  %p398_p8 = scmp.lt.s32.totalorder %s14335_s28, 3 }
  0x11   : > { %s18339_s19 = scalar_select %p14456_p6, 1, 0 }
  0x12   : > { %p399_p9 = pnand %p10695_p7, %p398_p8 }
  0x13   : > { %18340 = sst [smem:[#allocation12_spill]] %s18339_s19  ;;  %p448_p10 = scmp.lt.s32.totalorder (!%p399_p9), %s14435_s29, 1 }
  0x14   : > { %402 = sbr.rel (%p399_p9) target bundleno = 2590 (0xa1e), region = 64  ;;  %s18341_s0 = sld [smem:[#allocation13_spill]] (!%p399_p9) }
  0x15   : > { %s14341_s15 = smov (!%p399_p9), 122   ;;  %s14342_s14 = smov (!%p399_p9), [#allocation2]  }
  0x16   : > { %s14249_s30 = sshll.u32 (!%p399_p9), %s14342_s14, 4  ;;  %s14250_s30 = int_to_ptr.vmem [resolvable:$false] %s14249_s30 }
  0x19   : > { %v12772_v0 = vld [vmem:[%s18315_s2 + $0xac] ss:$12 sps:$4 sm:$0xff]   ;;  %v12776_v2 = vld [vmem:[%s18315_s2 + $0xa8] ss:$12 sps:$4 sm:$0xff]   ;;  %v12782_v6 = vld [vmem:[%s18315_s2 + $0x90] ss:$12 sps:$4 sm:$0xff]  }
  0x1a   : > { %v12774_v1 = vld [vmem:[%s18315_s2 + $0x22c] ss:$12 sps:$4 sm:$0xff]   ;;  %2757 = vmatprep.subr.bf16.mxu0 %v12772_v0  ;;  %v12777_v3 = vld [vmem:[%s18315_s2 + $0x228] ss:$12 sps:$4 sm:$0xff]   ;;  %v12783_v7 = vld [vmem:[%s18315_s2 + $0x210] ss:$12 sps:$4 sm:$0xff]  }
  0x1b   : > { %2808 = vmatprep.subr.bf16.mxu1 %v12774_v1  ;;  %v12778_v4 = vld [vmem:[%s18315_s2 + $0x94] ss:$12 sps:$4 sm:$0xff]   ;;  %2758 = vmatpush1.bf16.msra.mxu0 %v12776_v2  ;;  %v12784_v8 = vld [vmem:[%s18315_s2 + $0x7c] ss:$12 sps:$4 sm:$0xff]   ;;  %v12788_v10 = vld [vmem:[%s18315_s2 + $0x78] ss:$12 sps:$4 sm:$0xff]  }
  0x1c   : > { %2809 = vmatpush1.bf16.msra.mxu1 %v12777_v3  ;;  %v12780_v5 = vld [vmem:[%s18315_s2 + $0x214] ss:$12 sps:$4 sm:$0xff]   ;;  %2759 = vmatprep.subr.bf16.mxu0 %v12778_v4  ;;  %v12786_v9 = vld [vmem:[%s18315_s2 + $0x1fc] ss:$12 sps:$4 sm:$0xff]   ;;  %v12789_v11 = vld [vmem:[%s18315_s2 + $0x1f8] ss:$12 sps:$4 sm:$0xff]  }
  0x1d   : > { %2810 = vmatprep.subr.bf16.mxu1 %v12780_v5  ;;  %v12790_v12 = vld [vmem:[%s18315_s2 + $0x64] ss:$12 sps:$4 sm:$0xff]   ;;  %v12794_v14 = vld [vmem:[%s18315_s2 + $0x60] ss:$12 sps:$4 sm:$0xff]   ;;  %v12800_v18 = vld [vmem:[%s18315_s2 + $0x48] ss:$12 sps:$4 sm:$0xff]  }
  0x1e   : > { %v12792_v13 = vld [vmem:[%s18315_s2 + $0x1e4] ss:$12 sps:$4 sm:$0xff]   ;;  %v12795_v15 = vld [vmem:[%s18315_s2 + $0x1e0] ss:$12 sps:$4 sm:$0xff]   ;;  %v12801_v19 = vld [vmem:[%s18315_s2 + $0x1c8] ss:$12 sps:$4 sm:$0xff]  }
  0x1f   : > { %2760 = vmatpush1.bf16.msra.mxu0 %v12782_v6  ;;  %v12796_v16 = vld [vmem:[%s18315_s2 + $0x4c] ss:$12 sps:$4 sm:$0xff]   ;;  %v12802_v20 = vld [vmem:[%s18315_s2 + $0x34] ss:$12 sps:$4 sm:$0xff]   ;;  %v12806_v22 = vld [vmem:[%s18315_s2 + $0x30] ss:$12 sps:$4 sm:$0xff]  }
  0x20   : > { %2811 = vmatpush1.bf16.msra.mxu1 %v12783_v7  ;;  %2761 = vmatprep.subr.bf16.mxu0 %v12784_v8  ;;  %v12798_v17 = vld [vmem:[%s18315_s2 + $0x1cc] ss:$12 sps:$4 sm:$0xff]   ;;  %v12804_v21 = vld [vmem:[%s18315_s2 + $0x1b4] ss:$12 sps:$4 sm:$0xff]   ;;  %v12807_v23 = vld [vmem:[%s18315_s2 + $0x1b0] ss:$12 sps:$4 sm:$0xff]  }
  0x21   : > { %2812 = vmatprep.subr.bf16.mxu1 %v12786_v9  ;;  %v12808_v24 = vld [vmem:[%s18315_s2 + $0x1c] ss:$12 sps:$4 sm:$0xff]   ;;  %v12812_v26 = vld [vmem:[%s18315_s2 + $0x18] ss:$12 sps:$4 sm:$0xff]   ;;  %v12818_v30 = vld [vmem:[%s18315_s2] ss:$12 sps:$4 sm:$0xff]  }
  0x22   : > { %v12810_v25 = vld [vmem:[%s18315_s2 + $0x19c] ss:$12 sps:$4 sm:$0xff]   ;;  %v12813_v27 = vld [vmem:[%s18315_s2 + $0x198] ss:$12 sps:$4 sm:$0xff]   ;;  %v12819_v31 = vld [vmem:[%s18315_s2 + $0x180] ss:$12 sps:$4 sm:$0xff]  }
  0x23   : > { %2762 = vmatpush1.bf16.msra.mxu0 %v12788_v10  ;;  %v12814_v28 = vld [vmem:[%s18315_s2 + $0x4] ss:$12 sps:$4 sm:$0xff]   ;;  %v12820_v32 = vld [vmem:[%s18315_s2 + $0x16c] ss:$12 sps:$4 sm:$0xff]   ;;  %v12824_v34 = vld [vmem:[%s18315_s2 + $0x168] ss:$12 sps:$4 sm:$0xff]  }
  0x24   : > { %2813 = vmatpush1.bf16.msra.mxu1 %v12789_v11  ;;  %2763 = vmatprep.subr.bf16.mxu0 %v12790_v12  ;;  %v12816_v29 = vld [vmem:[%s18315_s2 + $0x184] ss:$12 sps:$4 sm:$0xff]   ;;  %v12822_v33 = vld [vmem:[%s18315_s2 + $0x2ec] ss:$12 sps:$4 sm:$0xff]   ;;  %v12825_v35 = vld [vmem:[%s18315_s2 + $0x2e8] ss:$12 sps:$4 sm:$0xff]  }
  0x25   : > { %2814 = vmatprep.subr.bf16.mxu1 %v12792_v13  ;;  %v12826_v36 = vld [vmem:[%s18315_s2 + $0x154] ss:$12 sps:$4 sm:$0xff]   ;;  %s14575_s24 = scalar_select %p448_p10, %s14435_s29, 1  ;;  %v12830_v38 = vld [vmem:[%s18315_s2 + $0x150] ss:$12 sps:$4 sm:$0xff]   ;;  %vm2750_vm1 = vcmask 523264  }
  0x26   : > { %v12828_v37 = vld [vmem:[%s18315_s2 + $0x2d4] ss:$12 sps:$4 sm:$0xff]   ;;  %v12831_v39 = vld [vmem:[%s18315_s2 + $0x2d0] ss:$12 sps:$4 sm:$0xff]   ;;  %v12836_v42 = vld [vmem:[%s18315_s2 + $0x138] ss:$12 sps:$4 sm:$0xff]  }
  0x27   : > { %2764 = vmatpush1.bf16.msra.mxu0 %v12794_v14  ;;  %v12832_v40 = vld [vmem:[%s18315_s2 + $0x13c] ss:$12 sps:$4 sm:$0xff]   ;;  %s12722_s23 = smul.u32 132, %s14575_s24  ;;  %v12837_v43 = vld [vmem:[%s18315_s2 + $0x2b8] ss:$12 sps:$4 sm:$0xff]   ;;  %vm14339_vm2 = vmmov 0   ;;  %s455_s27 = scalar_lea.vmem %s18326_s13, %s14575_s24 }
  0x28   : > { %2815 = vmatpush1.bf16.msra.mxu1 %v12795_v15  ;;  %2765 = vmatprep.subr.bf16.mxu0 %v12796_v16  ;;  %v12834_v41 = vld [vmem:[%s18315_s2 + $0x2bc] ss:$12 sps:$4 sm:$0xff]   ;;  %v12838_v44 = vld [vmem:[%s18315_s2 + $0x124] ss:$12 sps:$4 sm:$0xff]   ;;  %v12842_v46 = vld [vmem:[%s18315_s2 + $0x120] ss:$12 sps:$4 sm:$0xff]  }
  0x29   : > { %2816 = vmatprep.subr.bf16.mxu1 %v12798_v17  ;;  %s14605_s25 = scalar_lea.vmem %s18341_s0, %s12722_s23  ;;  %v12840_v45 = vld [vmem:[%s18315_s2 + $0x2a4] ss:$12 sps:$4 sm:$0xff]   ;;  %v12843_v47 = vld [vmem:[%s18315_s2 + $0x2a0] ss:$12 sps:$4 sm:$0xff]   ;;  %vm1220_vm0 = vsmask.f32 7424 }
  0x2a   : > { %v12844_v48 = vld [vmem:[%s18315_s2 + $0x10c] ss:$12 sps:$4 sm:$0xff]   ;;  %v12868_v50 = vld [vmem:[%s14605_s25 + $0x4] ss:$44 sps:$4 sm:$0xff]   ;;  %v12848_v58 = vld [vmem:[%s18315_s2 + $0x108] ss:$12 sps:$4 sm:$0xff]  }
  0x2b   : > { %2766 = vmatpush1.bf16.msra.mxu0 %v12800_v18  ;;  %v469_v49 = vld [vmem:[%s14605_s25 + $0x58] sm:$0x77]  ;;  %v470_v52 = vld [vmem:[%s14605_s25 + $0x60] sm:$0x77]  ;;  %v1234_v54 = vshrl.u32 %v12868_v50, 16  ;;  %v1236_v55 = vshll.u32 %v12868_v50, 16 }
  0x2c   : > { %2817 = vmatpush1.bf16.msra.mxu1 %v12801_v19  ;;  %2767 = vmatprep.subr.bf16.mxu0 %v12802_v20  ;;  %v14621_v51 = vcombine.high %v469_v49, %v469_v49  ;;  %v12846_v53 = vld [vmem:[%s18315_s2 + $0x28c] ss:$12 sps:$4 sm:$0xff]   ;;  %v14628_v57 = vcombine.high %v470_v52, %v470_v52  ;;  %v12849_v59 = vld [vmem:[%s18315_s2 + $0x288] ss:$12 sps:$4 sm:$0xff]   ;;  %v12854_v9 = vld [vmem:[%s18315_s2 + $0xf0] ss:$12 sps:$4 sm:$0xff]   ;;  %v14658_v13 = vcombine.low %v469_v49, %v469_v49 }
  0x2d   : > { %2818 = vmatprep.subr.bf16.mxu1 %v12804_v21  ;;  %v12871_v56 = vld [vmem:[%s14605_s25 + $0xc] ss:$44 sps:$4 sm:$0xff]   ;;  %v12850_v61 = vld [vmem:[%s18315_s2 + $0xf4] ss:$12 sps:$4 sm:$0xff]   ;;  %v1238_v63 = vrot.slane %v1236_v55, 1  ;;  %v14663_v16 = vcombine.low %v470_v52, %v470_v52  ;;  %vm5365_vm3 = vcmask 1041408  }
  0x2e   : > { %v1241_v60 = vshll.u32 %v14621_v51, 16  ;;  %v12852_v62 = vld [vmem:[%s18315_s2 + $0x274] ss:$12 sps:$4 sm:$0xff]   ;;  %v1258_v0 = vshrl.u32 %v12871_v56, 16  ;;  %v1260_v1 = vshll.u32 %v12871_v56, 16  ;;  %v1265_v2 = vshll.u32 %v14628_v57, 16 }
  0x2f   : > { %2768 = vmatpush1.bf16.msra.mxu0 %v12806_v22  ;;  %v12874_v4 = vld [vmem:[%s14605_s25] ss:$44 sps:$4 sm:$0xff]   ;;  %v12876_v5 = vld [vmem:[%s14605_s25 + $0x8] ss:$44 sps:$4 sm:$0xff]   ;;  %v1239_v6 = vor.u32 %v1238_v63, %v1234_v54  ;;  %v12855_v10 = vld [vmem:[%s18315_s2 + $0x270] ss:$12 sps:$4 sm:$0xff]  }
  0x30   : > { %2819 = vmatpush1.bf16.msra.mxu1 %v12807_v23  ;;  %2769 = vmatprep.subr.bf16.mxu0 %v12808_v24  ;;  %v14644_v3 = vrot.slane %v1241_v60, 1  ;;  %v1262_v7 = vrot.slane %v1260_v1, 1  ;;  %v1267_v8 = vrot.slane %v1265_v2, 1  ;;  %v12856_v14 = vld [vmem:[%s18315_s2 + $0xdc] ss:$12 sps:$4 sm:$0xff]   ;;  %v1224_v15 = vshll.u32 %v12874_v4, 16 }
  0x31   : > { %2820 = vmatprep.subr.bf16.mxu1 %v12810_v25  ;;  %v1248_v17 = vshll.u32 %v12876_v5, 16  ;;  %v12858_v18 = vld [vmem:[%s18315_s2 + $0x25c] ss:$12 sps:$4 sm:$0xff]   ;;  %v12860_v20 = vld [vmem:[%s18315_s2 + $0xd8] ss:$12 sps:$4 sm:$0xff]   ;;  %v1222_v23 = vshrl.u32 %v12874_v4, 16 }
  0x32   : > { %v14656_v11 = vsel %vm1220_vm0, %v1239_v6, %v14644_v3  ;;  %v1263_v12 = vor.u32 %v1262_v7, %v1258_v0  ;;  %v12861_v21 = vld [vmem:[%s18315_s2 + $0x258] ss:$12 sps:$4 sm:$0xff]   ;;  %v1229_v24 = vshll.u32 %v14658_v13, 16  ;;  %v1226_v25 = vrot.slane %v1224_v15, 1  ;;  %v12887_v49 = vld [vmem:[%s18315_s2 + $0x510] ss:$12 sps:$4 sm:$0xff]  }
  0x33   : > { %2770 = vmatpush1.bf16.msra.mxu0 %v12812_v26  ;;  %2789 = vmatprep.mubr.bf16.mxu0 %v14656_v11  ;;  %v12862_v22 = vld [vmem:[%s18315_s2 + $0xc4] ss:$12 sps:$4 sm:$0xff]   ;;  %v1246_v26 = vshrl.u32 %v12876_v5, 16  ;;  %v1353_v50 = vshrl.u32 %v14658_v13, 16  ;;  %v1359_v52 = vshrl.u32 %v14663_v16, 16  ;;  %vm5361_vm4 = vcmask 162816  }
  0x34   : > { %2821 = vmatpush1.bf16.msra.mxu1 %v12813_v27  ;;  %2771 = vmatprep.subr.bf16.mxu0 %v12814_v28  ;;  %v14669_v19 = vsel %vm1220_vm0, %v1263_v12, %v1267_v8  ;;  %v1250_v27 = vrot.slane %v1248_v17, 1  ;;  %v1253_v28 = vshll.u32 %v14663_v16, 16  ;;  %v12895_v54 = vld [vmem:[%s18315_s2 + $0x4fc] ss:$12 sps:$4 sm:$0xff]   ;;  %v12890_v55 = vld [vmem:[%s18315_s2 + $0x378] ss:$12 sps:$4 sm:$0xff]  }
  0x35   : > { %2822 = vmatprep.subr.bf16.mxu1 %v12816_v29  ;;  %2840 = vmatprep.mubr.bf16.mxu1 %v14669_v19  ;;  %v12864_v29 = vld [vmem:[%s18315_s2 + $0x244] ss:$12 sps:$4 sm:$0xff]   ;;  %v12899_v63 = vld [vmem:[%s18315_s2 + $0x4e0] ss:$12 sps:$4 sm:$0xff]   ;;  %v12902_v2 = vld [vmem:[%s18315_s2 + $0x348] ss:$12 sps:$4 sm:$0xff]  }
  0x36   : > { %v12893_v56 = vld [vmem:[%s18315_s2 + $0x4f8] ss:$12 sps:$4 sm:$0xff]   ;;  %v12910_v4 = vld [vmem:[%s18315_s2 + $0x334] ss:$12 sps:$4 sm:$0xff]   ;;  %v12908_v6 = vld [vmem:[%s18315_s2 + $0x330] ss:$12 sps:$4 sm:$0xff]  }
  0x37   : > { %2772 = vmatpush1.bf16.msra.mxu0 %v12818_v30  ;;  %v12866_v30 = vld [vmem:[%s18315_s2 + $0xc0] ss:$12 sps:$4 sm:$0xff]   ;;  %v12898_v60 = vld [vmem:[%s18315_s2 + $0x364] ss:$12 sps:$4 sm:$0xff]   ;;  %vm7628_vm5 = vcmask 261120   ;;  %vm10537_vm6 = vcmask 40960  }
  0x38   : > { %2823 = vmatpush1.bf16.msra.mxu1 %v12819_v31  ;;  %2773 = vmatprep.subr.bf16.mxu0 %v12820_v32  ;;  %v12867_v31 = vld [vmem:[%s18315_s2 + $0x240] ss:$12 sps:$4 sm:$0xff]   ;;  %v1227_v32 = vor.u32 %v1226_v25, %v1222_v23  ;;  %v12911_v7 = vld [vmem:[%s18315_s2 + $0x4b0] ss:$12 sps:$4 sm:$0xff]   ;;  %v12917_v12 = vld [vmem:[%s18315_s2 + $0x498] ss:$12 sps:$4 sm:$0xff]  }
  0x39   : > { %2824 = vmatprep.subr.bf16.mxu1 %v12822_v33  ;;  %v1231_v33 = vrot.slane %v1229_v24, 1  ;;  %v12904_v0 = vld [vmem:[%s18315_s2 + $0x34c] ss:$12 sps:$4 sm:$0xff]   ;;  %v12913_v5 = vld [vmem:[%s18315_s2 + $0x4b4] ss:$12 sps:$4 sm:$0xff]   ;;  %vm10535_vm7 = vcmask 0  }
  0x3a   : > { %v12907_v1 = vld [vmem:[%s18315_s2 + $0x4cc] ss:$12 sps:$4 sm:$0xff]   ;;  %v12925_v15 = vld [vmem:[%s18315_s2 + $0x484] ss:$12 sps:$4 sm:$0xff]   ;;  %s18229_s23 = sand.u32 1, %s14327_s26   ;;  %s12230_s24 = sshll.u32 %s14435_s29, 4 }
  0x3b   : > { %2774 = vmatpush2.bf16.msra.mxu0 %v12824_v34  ;;  %v1251_v34 = vor.u32 %v1250_v27, %v1246_v26  ;;  %v12920_v17 = vld [vmem:[%s18315_s2 + $0x300] ss:$12 sps:$4 sm:$0xff]   ;;  %v14829_v25 = vld [vmem:[%s14605_s25 + $0x70] sm:$0x77]  ;;  %s436_s17 = scalar_lea.vmem [#allocation2], %s18229_s23  ;;  %s18332_s21 = scalar_lea.vmem [#allocation4], %s18229_s23 }
  0x3c   : > { %2825 = vmatpush2.bf16.msra.mxu1 %v12825_v35  ;;  %2775 = vmatprep.subr.bf16.mxu0 %v12826_v36  ;;  %v1255_v35 = vrot.slane %v1253_v28, 1  ;;  %v12880_v36 = vld [vmem:[%s18315_s2 + $0x3ac] ss:$12 sps:$4 sm:$0xff]   ;;  %v12926_v26 = vld [vmem:[%s18315_s2 + $0x468] ss:$12 sps:$4 sm:$0xff]   ;;  %s10574_s20 = sshll.u32 %s436_s17, 4  ;;  %s18239_s19 = scalar_lea.hbm %s18324_s11, %s12230_s24  ;;  %s18241_s20 = int_to_ptr.vmem [resolvable:$true] %s10574_s20 }
  0x3d   : > { %2826 = vmatprep.subr.bf16.mxu1 %v12828_v37  ;;  %v12883_v37 = vld [vmem:[%s18315_s2 + $0x52c] ss:$12 sps:$4 sm:$0xff]   ;;  %s10587_s22 = sshll.u32 %s18332_s21, 4  ;;  %s18247_s16 = scalar_lea.hbm %s18325_s12, %s12230_s24  ;;  %s18249_s22 = int_to_ptr.vmem [resolvable:$true] %s10587_s22 }
  0x3e   : > { %v12928_v23 = vld [vmem:[%s18315_s2 + $0x46c] ss:$12 sps:$4 sm:$0xff]   ;;  %s14251_s21 = scalar_lea.vmem %s14250_s30, 32  ;;  %p14252_p0 = scmp.lt.s32.totalorder %s18241_s20, %s14250_s30 }
  0x3f   : > { %2776 = vmatpush2.bf16.msra.mxu0 %v12830_v38  ;;  %v1356_v38 = vshrl.u32 %v14621_v51, 16  ;;  %v12931_v24 = vld [vmem:[%s18315_s2 + $0x5ec] ss:$12 sps:$4 sm:$0xff]  }
  0x40   : > { %2827 = vmatpush2.bf16.msra.mxu1 %v12831_v39  ;;  %2777 = vmatprep.subr.bf16.mxu0 %v12832_v40  ;;  %v1362_v39 = vshrl.u32 %v14628_v57, 16  ;;  %v12878_v40 = vld [vmem:[%s18315_s2 + $0x3a8] ss:$12 sps:$4 sm:$0xff]  }
  0x41   : > { %2828 = vmatprep.subr.bf16.mxu1 %v12834_v41  ;;  %v12881_v41 = vld [vmem:[%s18315_s2 + $0x528] ss:$12 sps:$4 sm:$0xff]  }
  0x43   : > { %2778 = vmatpush2.bf16.msra.mxu0 %v12836_v42  ;;  %v14708_v42 = vsel %vm1220_vm0, %v1227_v32, %v1231_v33  ;;  %v14841_v32 = vcombine.high %v14829_v25, %v14829_v25 }
  0x44   : > { %2829 = vmatpush2.bf16.msra.mxu1 %v12837_v43  ;;  %2779 = vmatprep.subr.bf16.mxu0 %v12838_v44  ;;  %v14711_v43 = vsel %vm1220_vm0, %v1251_v34, %v1255_v35  ;;  %v12886_v44 = vld [vmem:[%s18315_s2 + $0x394] ss:$12 sps:$4 sm:$0xff]  }
  0x45   : > { %2830 = vmatprep.subr.bf16.mxu1 %v12840_v45  ;;  %v12889_v45 = vld [vmem:[%s18315_s2 + $0x514] ss:$12 sps:$4 sm:$0xff]  }
  0x46   : > { %v12937_v34 = vld [vmem:[%s18315_s2 + $0x5d4] ss:$12 sps:$4 sm:$0xff]  }
  0x47   : > { %2780 = vmatpush2.bf16.msra.mxu0 %v12842_v46  ;;  %v12884_v46 = vld [vmem:[%s18315_s2 + $0x390] ss:$12 sps:$4 sm:$0xff]  }
  0x48   : > { %2831 = vmatpush2.bf16.msra.mxu1 %v12843_v47  ;;  %2781 = vmatprep.subr.bf16.mxu0 %v12844_v48  ;;  %v14723_v47 = vor.u32 %v1356_v38, %v14644_v3  ;;  %v14725_v48 = vor.u32 %v1362_v39, %v1267_v8  ;;  %v12905_v3 = vld [vmem:[%s18315_s2 + $0x4c8] ss:$12 sps:$4 sm:$0xff]   ;;  %v1313_v39 = vshll.u32 %v14841_v32, 16 }
  0x49   : > { %2832 = vmatprep.subr.bf16.mxu1 %v12846_v53  ;;  %v12892_v53 = vld [vmem:[%s18315_s2 + $0x37c] ss:$12 sps:$4 sm:$0xff]  }
  0x4a   : > { %v12916_v8 = vld [vmem:[%s18315_s2 + $0x31c] ss:$12 sps:$4 sm:$0xff]  }
  0x4b   : > { %2782 = vmatpush2.bf16.msra.mxu0 %v12848_v58  ;;  %v14748_v58 = vor.u32 %v1353_v50, %v1231_v33  ;;  %v12934_v33 = vld [vmem:[%s18315_s2 + $0x454] ss:$12 sps:$4 sm:$0xff]   ;;  %v12940_v50 = vld [vmem:[%s18315_s2 + $0x43c] ss:$12 sps:$4 sm:$0xff]  }
  0x4c   : > { %2833 = vmatpush2.bf16.msra.mxu1 %v12849_v59  ;;  %2783 = vmatprep.subr.bf16.mxu0 %v12850_v61  ;;  %v14750_v59 = vor.u32 %v1359_v52, %v1255_v35  ;;  %v12901_v61 = vld [vmem:[%s18315_s2 + $0x4e4] ss:$12 sps:$4 sm:$0xff]   ;;  %v12943_v52 = vld [vmem:[%s18315_s2 + $0x5bc] ss:$12 sps:$4 sm:$0xff]  }
  0x4d   : > { %2834 = vmatprep.subr.bf16.mxu1 %v12852_v62  ;;  %v12896_v62 = vld [vmem:[%s18315_s2 + $0x360] ss:$12 sps:$4 sm:$0xff]  }
  0x4f   : > { %2784 = vmatpush2.bf16.msra.mxu0 %v12854_v9  ;;  %v12919_v9 = vld [vmem:[%s18315_s2 + $0x49c] ss:$12 sps:$4 sm:$0xff]  }
  0x50   : > { %2835 = vmatpush2.bf16.msra.mxu1 %v12855_v10  ;;  %2785 = vmatprep.subr.bf16.mxu0 %v12856_v14  ;;  %v12914_v10 = vld [vmem:[%s18315_s2 + $0x318] ss:$12 sps:$4 sm:$0xff]  }
  0x51   : > { %2836 = vmatprep.subr.bf16.mxu1 %v12858_v18  ;;  %v12922_v14 = vld [vmem:[%s18315_s2 + $0x304] ss:$12 sps:$4 sm:$0xff]   ;;  %v12923_v18 = vld [vmem:[%s18315_s2 + $0x480] ss:$12 sps:$4 sm:$0xff]  }
  0x53   : > { %2786 = vmatpush2.bf16.msra.mxu0 %v12860_v20  ;;  %v14815_v20 = vld [vmem:[%s14605_s25 + $0x68] sm:$0x77] }
  0x54   : > { %2837 = vmatpush2.bf16.msra.mxu1 %v12861_v21  ;;  %2787 = vmatprep.subr.bf16.mxu0 %v12862_v22  ;;  %v12976_v21 = vld [vmem:[%s14605_s25 + $0x14] ss:$44 sps:$4 sm:$0xff]   ;;  %v14820_v22 = vcombine.high %v14815_v20, %v14815_v20 }
  0x55   : > { %2838 = vmatprep.subr.bf16.mxu1 %v12864_v29  ;;  %v1282_v27 = vshrl.u32 %v12976_v21, 16  ;;  %v1284_v28 = vshll.u32 %v12976_v21, 16  ;;  %v12965_v21 = vld [vmem:[%s18315_s2 + $0x558] ss:$12 sps:$4 sm:$0xff]  }
  0x56   : > { %v1289_v29 = vshll.u32 %v14820_v22, 16 }
  0x57   : > { %2788 = vmatpush2.bf16.msra.mxu0 %v12866_v30  ;;  %v12981_v30 = vld [vmem:[%s14605_s25 + $0x1c] ss:$44 sps:$4 sm:$0xff]   ;;  %v1286_v35 = vrot.slane %v1284_v28, 1 }
  0x58   : > { %2839 = vmatpush2.bf16.msra.mxu1 %v12867_v31  ;;  %2859 = vmatprep.subr.bf16.mxu0 %v12880_v36  ;;  %v12929_v31 = vld [vmem:[%s18315_s2 + $0x5e8] ss:$12 sps:$4 sm:$0xff]   ;;  %v14849_v36 = vrot.slane %v1289_v29, 1  ;;  %v1308_v38 = vshll.u32 %v12981_v30, 16 }
  0x59   : > { %2910 = vmatprep.subr.bf16.mxu1 %v12883_v37  ;;  %v1306_v37 = vshrl.u32 %v12981_v30, 16  ;;  %v12973_v30 = vld [vmem:[%s18315_s2 + $0x544] ss:$12 sps:$4 sm:$0xff]  }
  0x5a   : > { %2790 = vmatmul.mubr.bf16.vlgmr.msra.gmra.mxu0 %v14708_v42 }
  0x5b   : > { %2841 = vmatmul.mubr.bf16.vlgmr.msra.gmra.mxu1 %v14711_v43  ;;  %2860 = vmatpush1.bf16.msra.mxu0 %v12878_v40  ;;  %v1287_v40 = vor.u32 %v1286_v35, %v1282_v27 }
  0x5c   : > { %2911 = vmatpush1.bf16.msra.mxu1 %v12881_v41  ;;  %2861 = vmatprep.subr.bf16.mxu0 %v12886_v44  ;;  %v12932_v41 = vld [vmem:[%s18315_s2 + $0x450] ss:$12 sps:$4 sm:$0xff]   ;;  %v1310_v44 = vrot.slane %v1308_v38, 1 }
  0x5d   : > { %2912 = vmatprep.subr.bf16.mxu1 %v12889_v45  ;;  %2799 = vmatprep.mubr.bf16.mxu0 %v14723_v47  ;;  %v14855_v45 = vrot.slane %v1313_v39, 1 }
  0x5e   : > { %2850 = vmatprep.mubr.bf16.mxu1 %v14725_v48 }
  0x5f   : > { %2862 = vmatpush1.bf16.msra.mxu0 %v12884_v46  ;;  %v12935_v46 = vld [vmem:[%s18315_s2 + $0x5d0] ss:$12 sps:$4 sm:$0xff]  }
  0x60   : > { %2913 = vmatpush1.bf16.msra.mxu1 %v12887_v49  ;;  %2863 = vmatprep.subr.bf16.mxu0 %v12892_v53  ;;  %v14862_v49 = vsel %vm1220_vm0, %v1287_v40, %v14849_v36  ;;  %v1311_v53 = vor.u32 %v1310_v44, %v1306_v37  ;;  %v12989_v40 = vld [vmem:[%s18315_s2 + $0x7cc] ss:$12 sps:$4 sm:$0xff]   ;;  %v1368_v44 = vshrl.u32 %v14820_v22, 16 }
  0x61   : > { %2914 = vmatprep.subr.bf16.mxu1 %v12895_v54  ;;  %v12938_v54 = vld [vmem:[%s18315_s2 + $0x438] ss:$12 sps:$4 sm:$0xff]  }
  0x62   : > { %2800 = vmatmul.mubr.bf16.gmra.mxu0 %v14748_v58 }
  0x63   : > { %2851 = vmatmul.mubr.bf16.gmra.mxu1 %v14750_v59  ;;  %2864 = vmatpush1.bf16.msra.mxu0 %v12890_v55  ;;  %v14876_v55 = vsel %vm1220_vm0, %v1311_v53, %v14855_v45 }
  0x64   : > { %2915 = vmatpush1.bf16.msra.mxu1 %v12893_v56  ;;  %2865 = vmatprep.subr.bf16.mxu0 %v12898_v60  ;;  %v12941_v56 = vld [vmem:[%s18315_s2 + $0x5b8] ss:$12 sps:$4 sm:$0xff]  }
  0x65   : > { %2916 = vmatprep.subr.bf16.mxu1 %v12901_v61  ;;  %2891 = vmatprep.mubr.bf16.mxu0 %v14862_v49  ;;  %v12946_v60 = vld [vmem:[%s18315_s2 + $0x424] ss:$12 sps:$4 sm:$0xff]  }
  0x66   : > { %v12949_v61 = vld [vmem:[%s18315_s2 + $0x5a4] ss:$12 sps:$4 sm:$0xff]   ;;  %2942 = vmatprep.mubr.bf16.mxu1 %v14876_v55 }
  0x67   : > { %2866 = vmatpush1.bf16.msra.mxu0 %v12896_v62  ;;  %v12944_v62 = vld [vmem:[%s18315_s2 + $0x420] ss:$12 sps:$4 sm:$0xff]  }
  0x68   : > { %2917 = vmatpush1.bf16.msra.mxu1 %v12899_v63  ;;  %2867 = vmatprep.subr.bf16.mxu0 %v12904_v0  ;;  %v12947_v63 = vld [vmem:[%s18315_s2 + $0x5a0] ss:$12 sps:$4 sm:$0xff]  }
  0x69   : > { %2918 = vmatprep.subr.bf16.mxu1 %v12907_v1  ;;  %v12952_v0 = vld [vmem:[%s18315_s2 + $0x40c] ss:$12 sps:$4 sm:$0xff]  }
  0x6a   : > { %v12955_v1 = vld [vmem:[%s18315_s2 + $0x58c] ss:$12 sps:$4 sm:$0xff]  }
  0x6b   : > { %2868 = vmatpush1.bf16.msra.mxu0 %v12902_v2  ;;  %v12950_v2 = vld [vmem:[%s18315_s2 + $0x408] ss:$12 sps:$4 sm:$0xff]  }
  0x6c   : > { %2919 = vmatpush1.bf16.msra.mxu1 %v12905_v3  ;;  %2869 = vmatprep.subr.bf16.mxu0 %v12910_v4  ;;  %v12953_v3 = vld [vmem:[%s18315_s2 + $0x588] ss:$12 sps:$4 sm:$0xff]   ;;  %v12974_v4 = vld [vmem:[%s14605_s25 + $0x10] ss:$44 sps:$4 sm:$0xff]  }
  0x6d   : > { %2920 = vmatprep.subr.bf16.mxu1 %v12913_v5  ;;  %v12979_v5 = vld [vmem:[%s14605_s25 + $0x18] ss:$44 sps:$4 sm:$0xff]  }
  0x6e   : > { %v1294_v27 = vshrl.u32 %v12979_v5, 16 }
  0x6f   : > { %2870 = vmatpush1.bf16.msra.mxu0 %v12908_v6  ;;  %v12958_v6 = vld [vmem:[%s18315_s2 + $0x3f4] ss:$12 sps:$4 sm:$0xff]  }
  0x70   : > { %2921 = vmatpush1.bf16.msra.mxu1 %v12911_v7  ;;  %2871 = vmatprep.subr.bf16.mxu0 %v12916_v8  ;;  %v12961_v7 = vld [vmem:[%s18315_s2 + $0x574] ss:$12 sps:$4 sm:$0xff]   ;;  %v12956_v8 = vld [vmem:[%s18315_s2 + $0x3f0] ss:$12 sps:$4 sm:$0xff]  }
  0x71   : > { %2922 = vmatprep.subr.bf16.mxu1 %v12919_v9  ;;  %v12959_v9 = vld [vmem:[%s18315_s2 + $0x570] ss:$12 sps:$4 sm:$0xff]  }
  0x73   : > { %2872 = vmatpush1.bf16.msra.mxu0 %v12914_v10  ;;  %v14922_v10 = vcombine.low %v14815_v20, %v14815_v20  ;;  %v12962_v20 = vld [vmem:[%s18315_s2 + $0x3d8] ss:$12 sps:$4 sm:$0xff]  }
  0x74   : > { %2923 = vmatpush1.bf16.msra.mxu1 %v12917_v12  ;;  %2873 = vmatprep.subr.bf16.mxu0 %v12922_v14  ;;  %v1272_v12 = vshll.u32 %v12974_v4, 16  ;;  %v12964_v14 = vld [vmem:[%s18315_s2 + $0x3dc] ss:$12 sps:$4 sm:$0xff]  }
  0x75   : > { %2924 = vmatprep.subr.bf16.mxu1 %v12925_v15  ;;  %v14929_v15 = vcombine.low %v14829_v25, %v14829_v25 }
  0x76   : > { %v1274_v25 = vrot.slane %v1272_v12, 1 }
  0x77   : > { %2874 = vmatpush1.bf16.msra.mxu0 %v12920_v17  ;;  %v1296_v17 = vshll.u32 %v12979_v5, 16  ;;  %v1301_v29 = vshll.u32 %v14929_v15, 16  ;;  %v12996_v5 = vld [vmem:[%s18315_s2 + $0x678] ss:$12 sps:$4 sm:$0xff]  }
  0x78   : > { %2925 = vmatpush1.bf16.msra.mxu1 %v12923_v18  ;;  %2875 = vmatprep.subr.bf16.mxu0 %v12928_v23  ;;  %v12967_v18 = vld [vmem:[%s18315_s2 + $0x55c] ss:$12 sps:$4 sm:$0xff]   ;;  %v12970_v23 = vld [vmem:[%s18315_s2 + $0x3c4] ss:$12 sps:$4 sm:$0xff]  }
  0x79   : > { %2926 = vmatprep.subr.bf16.mxu1 %v12931_v24  ;;  %v1270_v24 = vshrl.u32 %v12974_v4, 16  ;;  %v1298_v28 = vrot.slane %v1296_v17, 1  ;;  %v1303_v39 = vrot.slane %v1301_v29, 1  ;;  %v13013_v4 = vld [vmem:[%s14605_s25 + $0x80] ss:$0 sps:$4 sm:$0x77]  }
  0x7a   : > { %v1349_v17 = vshll.u32 %v13013_v4, 16  ;;  %v13014_v29 = vld [vmem:[%s18315_s2 + $0xb0] ss:$12 sps:$4 sm:$0xff]  }
  0x7b   : > { %2876 = vmatpush2.bf16.msra.mxu0 %v12926_v26  ;;  %v1277_v26 = vshll.u32 %v14922_v10, 16  ;;  %v1275_v35 = vor.u32 %v1274_v25, %v1270_v24  ;;  %v1299_v38 = vor.u32 %v1298_v28, %v1294_v27  ;;  %v13008_v27 = vld [vmem:[%s18315_s2 + $0x648] ss:$12 sps:$4 sm:$0xff]   ;;  %v14337_v28 = vmov 0  }
  0x7c   : > { %2927 = vmatpush2.bf16.msra.mxu1 %v12929_v31  ;;  %2877 = vmatprep.subr.bf16.mxu0 %v12934_v33  ;;  %v12968_v31 = vld [vmem:[%s18315_s2 + $0x3c0] ss:$12 sps:$4 sm:$0xff]   ;;  %v1351_v25 = vrot.slane %v1349_v17, 1 }
  0x7d   : > { %2928 = vmatprep.subr.bf16.mxu1 %v12937_v34  ;;  %v12971_v33 = vld [vmem:[%s18315_s2 + $0x540] ss:$12 sps:$4 sm:$0xff]   ;;  %v1279_v37 = vrot.slane %v1277_v26, 1  ;;  %v14972_v53 = vsel %vm1220_vm0, %v1299_v38, %v1303_v39  ;;  %v13011_v26 = vld [vmem:[%s18315_s2 + $0x170] ss:$12 sps:$4 sm:$0xff]  }
  0x7e   : > { %v12986_v34 = vld [vmem:[%s18315_s2 + $0x6ac] ss:$12 sps:$4 sm:$0xff]   ;;  %v13022_v38 = vld [vmem:[%s18315_s2 + $0x61c] ss:$12 sps:$4 sm:$0xff]   ;;  %v13037_v17 = vld [vmem:[%s18315_s2 + $0x754] ss:$12 sps:$4 sm:$0xff]  }
  0x7f   : > { %2878 = vmatpush2.bf16.msra.mxu0 %v12932_v41  ;;  %v12984_v41 = vld [vmem:[%s18315_s2 + $0x6a8] ss:$12 sps:$4 sm:$0xff]  }
  0x80   : > { %2929 = vmatpush2.bf16.msra.mxu1 %v12935_v46  ;;  %2879 = vmatprep.subr.bf16.mxu0 %v12940_v50  ;;  %v1374_v46 = vshrl.u32 %v14841_v32, 16  ;;  %v12987_v50 = vld [vmem:[%s18315_s2 + $0x7c8] ss:$12 sps:$4 sm:$0xff]  }
  0x81   : > { %2930 = vmatprep.subr.bf16.mxu1 %v12943_v52  ;;  %v14969_v52 = vsel %vm1220_vm0, %v1275_v35, %v1279_v37  ;;  %v13019_v35 = vld [vmem:[%s18315_s2 + $0x98] ss:$12 sps:$4 sm:$0xff]  }
  0x83   : > { %2880 = vmatpush2.bf16.msra.mxu0 %v12938_v54  ;;  %v13012_v54 = vld [vmem:[%s14605_s25 + $0x28] ss:$44 sps:$4 sm:$0xff]  }
  0x84   : > { %2931 = vmatpush2.bf16.msra.mxu1 %v12941_v56  ;;  %2881 = vmatprep.subr.bf16.mxu0 %v12946_v60  ;;  %v12992_v56 = vld [vmem:[%s18315_s2 + $0x694] ss:$12 sps:$4 sm:$0xff]   ;;  %v1342_v12 = vshrl.u32 %v13012_v54, 16 }
  0x85   : > { %2932 = vmatprep.subr.bf16.mxu1 %v12949_v61  ;;  %v12995_v60 = vld [vmem:[%s18315_s2 + $0x7b4] ss:$12 sps:$4 sm:$0xff]   ;;  %v12990_v61 = vld [vmem:[%s18315_s2 + $0x690] ss:$12 sps:$4 sm:$0xff]  }
  0x87   : > { %2882 = vmatpush2.bf16.msra.mxu0 %v12944_v62  ;;  %v12993_v62 = vld [vmem:[%s18315_s2 + $0x7b0] ss:$12 sps:$4 sm:$0xff]  }
  0x88   : > { %2933 = vmatpush2.bf16.msra.mxu1 %v12947_v63  ;;  %2883 = vmatprep.subr.bf16.mxu0 %v12952_v0  ;;  %v14988_v63 = vor.u32 %v1368_v44, %v14849_v36  ;;  %v14991_v0 = vor.u32 %v1374_v46, %v14855_v45  ;;  %v1344_v36 = vshll.u32 %v13012_v54, 16  ;;  %v13001_v45 = vld [vmem:[%s18315_s2 + $0x79c] ss:$12 sps:$4 sm:$0xff]   ;;  %v13020_v46 = vld [vmem:[%s18315_s2 + $0x618] ss:$12 sps:$4 sm:$0xff]  }
  0x89   : > { %2934 = vmatprep.subr.bf16.mxu1 %v12955_v1  ;;  %v1365_v1 = vshrl.u32 %v14922_v10, 16 }
  0x8b   : > { %2884 = vmatpush2.bf16.msra.mxu0 %v12950_v2  ;;  %v12998_v2 = vld [vmem:[%s18315_s2 + $0x67c] ss:$12 sps:$4 sm:$0xff]  }
  0x8c   : > { %2935 = vmatpush2.bf16.msra.mxu1 %v12953_v3  ;;  %2885 = vmatprep.subr.bf16.mxu0 %v12958_v6  ;;  %v1371_v3 = vshrl.u32 %v14929_v15, 16  ;;  %v12999_v6 = vld [vmem:[%s18315_s2 + $0x798] ss:$12 sps:$4 sm:$0xff]  }
  0x8d   : > { %2936 = vmatprep.subr.bf16.mxu1 %v12961_v7  ;;  %v15012_v7 = vor.u32 %v1365_v1, %v1279_v37  ;;  %v1383_v37 = vshrl.u32 %v13013_v4, 16  ;;  %v13028_v1 = vld [vmem:[%s18315_s2 + $0x128] ss:$12 sps:$4 sm:$0xff]  }
  0x8f   : > { %2886 = vmatpush2.bf16.msra.mxu0 %v12956_v8  ;;  %v15014_v8 = vor.u32 %v1371_v3, %v1303_v39  ;;  %v13023_v39 = vld [vmem:[%s18315_s2 + $0x140] ss:$12 sps:$4 sm:$0xff]   ;;  %v15081_v54 = vor.u32 %v1383_v37, %v1351_v25  ;;  %v13054_v37 = vld [vmem:[%s18315_s2 + $0x230] ss:$12 sps:$4 sm:$0xff]  }
  0x90   : > { %2937 = vmatpush2.bf16.msra.mxu1 %v12959_v9  ;;  %2887 = vmatprep.subr.bf16.mxu0 %v12964_v14  ;;  %v13004_v9 = vld [vmem:[%s18315_s2 + $0x664] ss:$12 sps:$4 sm:$0xff]   ;;  %v1346_v14 = vrot.slane %v1344_v36, 1  ;;  %v13029_v36 = vld [vmem:[%s18315_s2 + $0x68] ss:$12 sps:$4 sm:$0xff]  }
  0x91   : > { %2938 = vmatprep.subr.bf16.mxu1 %v12967_v18  ;;  %v13007_v18 = vld [vmem:[%s18315_s2 + $0x784] ss:$12 sps:$4 sm:$0xff]  }
  0x92   : > { %v1347_v24 = vor.u32 %v1346_v14, %v1342_v12  ;;  %v13034_v14 = vld [vmem:[%s18315_s2 + $0x50] ss:$12 sps:$4 sm:$0xff]  }
  0x93   : > { %2888 = vmatpush2.bf16.msra.mxu0 %v12962_v20  ;;  %v13002_v20 = vld [vmem:[%s18315_s2 + $0x660] ss:$12 sps:$4 sm:$0xff]  }
  0x94   : > { %2939 = vmatpush2.bf16.msra.mxu1 %v12965_v21  ;;  %2889 = vmatprep.subr.bf16.mxu0 %v12970_v23  ;;  %v13005_v21 = vld [vmem:[%s18315_s2 + $0x780] ss:$12 sps:$4 sm:$0xff]  }
  0x95   : > { %2940 = vmatprep.subr.bf16.mxu1 %v12973_v30  ;;  %v13010_v23 = vld [vmem:[%s18315_s2 + $0x64c] ss:$12 sps:$4 sm:$0xff]   ;;  %v15044_v30 = vsel %vm1220_vm0, %v1347_v24, %v1351_v25 }
  0x96   : > { %v13040_v24 = vld [vmem:[%s18315_s2 + $0x738] ss:$12 sps:$4 sm:$0xff]   ;;  %v13044_v25 = vld [vmem:[%s18315_s2 + $0x20] ss:$12 sps:$4 sm:$0xff]  }
  0x97   : > { %2890 = vmatpush2.bf16.msra.mxu0 %v12968_v31  ;;  %v13017_v31 = vld [vmem:[%s18315_s2 + $0x634] ss:$12 sps:$4 sm:$0xff]  }
  0x98   : > { %2941 = vmatpush2.bf16.msra.mxu1 %v12971_v33  ;;  %2961 = vmatprep.subr.bf16.mxu0 %v12986_v34  ;;  %v13018_v33 = vld [vmem:[%s18315_s2 + $0x158] ss:$12 sps:$4 sm:$0xff]   ;;  %v13015_v34 = vld [vmem:[%s18315_s2 + $0x630] ss:$12 sps:$4 sm:$0xff]  }
  0x99   : > { %3020 = vmatprep.subr.bf16.mxu1 %v12989_v40  ;;  %v15067_v40 = vld [vmem:[%s14605_s25 + $0x78] sm:$0x77] }
  0x9a   : > { %2892 = vmatmul.mubr.bf16.vlgmr.msra.gmra.mxu0 %v14969_v52  ;;  %v15073_v44 = vcombine.high %v15067_v40, %v15067_v40 }
  0x9b   : > { %2943 = vmatmul.mubr.bf16.vlgmr.msra.gmra.mxu1 %v14972_v53  ;;  %2962 = vmatpush1.bf16.msra.mxu0 %v12984_v41  ;;  %v13072_v41 = vld [vmem:[%s14605_s25 + $0x24] ss:$44 sps:$4 sm:$0xff]  }
  0x9c   : > { %3021 = vmatpush1.bf16.msra.mxu1 %v12987_v50  ;;  %2963 = vmatprep.subr.bf16.mxu0 %v12992_v56  ;;  %v13024_v50 = vld [vmem:[%s18315_s2 + $0x80] ss:$12 sps:$4 sm:$0xff]   ;;  %v1330_v56 = vshrl.u32 %v13072_v41, 16 }
  0x9d   : > { %3022 = vmatprep.subr.bf16.mxu1 %v12995_v60  ;;  %2901 = vmatprep.mubr.bf16.mxu0 %v14988_v63  ;;  %v1332_v60 = vshll.u32 %v13072_v41, 16  ;;  %v13058_v41 = vld [vmem:[%s18315_s2 + $0x2d8] ss:$12 sps:$4 sm:$0xff]  }
  0x9e   : > { %2952 = vmatprep.mubr.bf16.mxu1 %v14991_v0 }
  0x9f   : > { %2964 = vmatpush1.bf16.msra.mxu0 %v12990_v61  ;;  %v1337_v61 = vshll.u32 %v15073_v44, 16  ;;  %v1334_v3 = vrot.slane %v1332_v60, 1  ;;  %v15185_v60 = vcombine.low %v15067_v40, %v15067_v40  ;;  %v13067_v40 = vld [vmem:[%s18315_s2 + $0x6c4] ss:$12 sps:$4 sm:$0xff]  }
  0xa0   : > { %3023 = vmatpush1.bf16.msra.mxu1 %v12993_v62  ;;  %2965 = vmatprep.subr.bf16.mxu0 %v12998_v2  ;;  %v13027_v62 = vld [vmem:[%s18315_s2 + $0x604] ss:$12 sps:$4 sm:$0xff]   ;;  %v13025_v2 = vld [vmem:[%s18315_s2 + $0x600] ss:$12 sps:$4 sm:$0xff]  }
  0xa1   : > { %3024 = vmatprep.subr.bf16.mxu1 %v13001_v45  ;;  %v15093_v4 = vrot.slane %v1337_v61, 1  ;;  %v13032_v45 = vld [vmem:[%s18315_s2 + $0x76c] ss:$12 sps:$4 sm:$0xff]  }
  0xa2   : > { %2902 = vmatmul.mubr.bf16.gmra.mxu0 %v15012_v7 }
  0xa3   : > { %2953 = vmatmul.mubr.bf16.gmra.mxu1 %v15014_v8  ;;  %2966 = vmatpush1.bf16.msra.mxu0 %v12996_v5  ;;  %v1335_v5 = vor.u32 %v1334_v3, %v1330_v56  ;;  %v13062_v56 = vld [vmem:[%s18315_s2 + $0x6dc] ss:$12 sps:$4 sm:$0xff]  }
  0xa4   : > { %3025 = vmatpush1.bf16.msra.mxu1 %v12999_v6  ;;  %2967 = vmatprep.subr.bf16.mxu0 %v13004_v9  ;;  %v13033_v6 = vld [vmem:[%s18315_s2 + $0x110] ss:$12 sps:$4 sm:$0xff]   ;;  %v13030_v9 = vld [vmem:[%s18315_s2 + $0x768] ss:$12 sps:$4 sm:$0xff]  }
  0xa5   : > { %3026 = vmatprep.subr.bf16.mxu1 %v13007_v18  ;;  %3044 = vmatprep.mubr.bf16.mxu1 %v14337_v28  ;;  %v15112_v12 = vsel %vm1220_vm0, %v1335_v5, %v15093_v4  ;;  %v13035_v18 = vld [vmem:[%s18315_s2 + $0x750] ss:$12 sps:$4 sm:$0xff]   ;;  %v13069_v5 = vld [vmem:[%s18315_s2 + $0x1e8] ss:$12 sps:$4 sm:$0xff]  }
  0xa6   : > { %2993 = vmatprep.mubr.bf16.mxu0 %v15112_v12 }
  0xa7   : > { %2968 = vmatpush1.bf16.msra.mxu0 %v13002_v20  ;;  %v13039_v20 = vld [vmem:[%s18315_s2 + $0x38] ss:$12 sps:$4 sm:$0xff]  }
  0xa8   : > { %3027 = vmatpush1.bf16.msra.mxu1 %v13005_v21  ;;  %2969 = vmatprep.subr.bf16.mxu0 %v13010_v23  ;;  %v13042_v21 = vld [vmem:[%s18315_s2 + $0x73c] ss:$12 sps:$4 sm:$0xff]   ;;  %v13043_v23 = vld [vmem:[%s18315_s2 + $0xe0] ss:$12 sps:$4 sm:$0xff]  }
  0xa9   : > { %12234 = vmatprep.subr.bf16.mxu1 %v13011_v26  ;;  %v13047_v26 = vld [vmem:[%s18315_s2 + $0x724] ss:$12 sps:$4 sm:$0xff]  }
  0xab   : > { %10971 = vmatmul.mubr.msk.bf16.vlgmr.msra.gmra.mxu1 %vm2750_vm1, %v15044_v30  ;;  %2970 = vmatpush1.bf16.msra.mxu0 %v13008_v27  ;;  %v13048_v27 = vld [vmem:[%s18315_s2 + $0xc8] ss:$12 sps:$4 sm:$0xff]  }
  0xac   : > { %12235 = vmatpush3.bf16.msra.mxu1 %v13014_v29  ;;  %2971 = vmatprep.subr.bf16.mxu0 %v13017_v31  ;;  %v13045_v29 = vld [vmem:[%s18315_s2 + $0x720] ss:$12 sps:$4 sm:$0xff]   ;;  %v13049_v31 = vld [vmem:[%s18315_s2 + $0x8] ss:$12 sps:$4 sm:$0xff]  }
  0xad   : > { %12236 = vmatprep.subr.bf16.mxu1 %v13018_v33  ;;  %3054 = vmatprep.mubr.bf16.mxu1 %v14337_v28  ;;  %v13052_v33 = vld [vmem:[%s18315_s2 + $0x70c] ss:$12 sps:$4 sm:$0xff]  }
  0xaf   : > { %2972 = vmatpush1.bf16.msra.mxu0 %v13015_v34  ;;  %v13053_v34 = vld [vmem:[%s18315_s2 + $0x2f0] ss:$12 sps:$4 sm:$0xff]  }
  0xb0   : > { %12237 = vmatpush3.bf16.msra.mxu1 %v13019_v35  ;;  %2973 = vmatprep.subr.bf16.mxu0 %v13022_v38  ;;  %v13050_v35 = vld [vmem:[%s18315_s2 + $0x708] ss:$12 sps:$4 sm:$0xff]  }
  0xb1   : > { %12238 = vmatprep.subr.bf16.mxu1 %v13023_v39  ;;  %v13057_v38 = vld [vmem:[%s18315_s2 + $0x6f4] ss:$12 sps:$4 sm:$0xff]  }
  0xb2   : > { %v13070_v39 = vld [vmem:[%s14605_s25 + $0x20] ss:$44 sps:$4 sm:$0xff]  }
  0xb3   : > { %10972 = vmatmul.mubr.msk.bf16.gmra.mxu1 %vm2750_vm1, %v15081_v54  ;;  %2974 = vmatpush1.bf16.msra.mxu0 %v13020_v46  ;;  %v13055_v46 = vld [vmem:[%s18315_s2 + $0x6f0] ss:$12 sps:$4 sm:$0xff]   ;;  %v1320_v61 = vshll.u32 %v13070_v39, 16 }
  0xb4   : > { %12239 = vmatpush3.bf16.msra.mxu1 %v13024_v50  ;;  %2975 = vmatprep.subr.bf16.mxu0 %v13027_v62  ;;  %v13059_v50 = vld [vmem:[%s18315_s2 + $0x218] ss:$12 sps:$4 sm:$0xff]   ;;  %v13063_v62 = vld [vmem:[%s18315_s2 + $0x2c0] ss:$12 sps:$4 sm:$0xff]  }
  0xb5   : > { %12240 = vmatprep.subr.bf16.mxu1 %v13028_v1  ;;  %3095 = vmatprep.mubr.bf16.mxu1 %v14656_v11  ;;  %v13038_v11 = vld [vmem:[%s18315_s2 + $0xf8] ss:$12 sps:$4 sm:$0xff]   ;;  %v13064_v1 = vld [vmem:[%s18315_s2 + $0x200] ss:$12 sps:$4 sm:$0xff]   ;;  %v1322_v3 = vrot.slane %v1320_v61, 1 }
  0xb6   : > { %v13096_v61 = vld [vmem:[%s18315_s2 + $0x5d8] ss:$12 sps:$4 sm:$0xff]  }
  0xb7   : > { %2976 = vmatpush1.bf16.msra.mxu0 %v13025_v2  ;;  %v1318_v2 = vshrl.u32 %v13070_v39, 16  ;;  %v13091_v39 = vld [vmem:[%s18315_s2 + $0x410] ss:$12 sps:$4 sm:$0xff]  }
  0xb8   : > { %12241 = vmatpush3.bf16.msra.mxu1 %v13029_v36  ;;  %2977 = vmatprep.subr.bf16.mxu0 %v13032_v45  ;;  %v1325_v36 = vshll.u32 %v15185_v60, 16  ;;  %v13068_v45 = vld [vmem:[%s18315_s2 + $0x2a8] ss:$12 sps:$4 sm:$0xff]  }
  0xb9   : > { %12242 = vmatprep.subr.bf16.mxu1 %v13033_v6  ;;  %v13075_v6 = vld [vmem:[%s18315_s2 + $0x290] ss:$12 sps:$4 sm:$0xff]  }
  0xbb   : > { %2978 = vmatpush2.bf16.msra.mxu0 %v13030_v9  ;;  %v13076_v9 = vld [vmem:[%s18315_s2 + $0x470] ss:$12 sps:$4 sm:$0xff]  }
  0xbc   : > { %12243 = vmatpush3.bf16.msra.mxu1 %v13034_v14  ;;  %2979 = vmatprep.subr.bf16.mxu0 %v13037_v17  ;;  %v1323_v14 = vor.u32 %v1322_v3, %v1318_v2  ;;  %v1327_v17 = vrot.slane %v1325_v36, 1  ;;  %v13103_v2 = vld [vmem:[%s18315_s2 + $0x3c8] ss:$12 sps:$4 sm:$0xff]  }
  0xbd   : > { %12244 = vmatprep.subr.bf16.mxu1 %v13038_v11  ;;  %v1380_v11 = vshrl.u32 %v15073_v44, 16  ;;  %v13105_v3 = vld [vmem:[%s18315_s2 + $0x308] ss:$12 sps:$4 sm:$0xff]  }
  0xbe   : > { %v13106_v36 = vld [vmem:[%s18315_s2 + $0x4e8] ss:$12 sps:$4 sm:$0xff]  }
  0xbf   : > { %2980 = vmatpush2.bf16.msra.mxu0 %v13035_v18  ;;  %v1377_v18 = vshrl.u32 %v15185_v60, 16 }
  0xc0   : > { %12245 = vmatpush3.bf16.msra.mxu1 %v13039_v20  ;;  %2981 = vmatprep.subr.bf16.mxu0 %v13042_v21  ;;  %v13077_v20 = vld [vmem:[%s18315_s2 + $0x1d0] ss:$12 sps:$4 sm:$0xff]   ;;  %v15227_v21 = vsel %vm1220_vm0, %v1323_v14, %v1327_v17  ;;  %v13114_v14 = vld [vmem:[%s18315_s2 + $0x698] ss:$12 sps:$4 sm:$0xff]  }
  0xc1   : > { %12246 = vmatprep.subr.bf16.mxu1 %v13043_v23  ;;  %v13079_v23 = vld [vmem:[%s18315_s2 + $0x278] ss:$12 sps:$4 sm:$0xff]  }
  0xc3   : > { %2982 = vmatpush2.bf16.msra.mxu0 %v13040_v24  ;;  %v13080_v24 = vld [vmem:[%s18315_s2 + $0x458] ss:$12 sps:$4 sm:$0xff]  }
  0xc4   : > { %12247 = vmatpush3.bf16.msra.mxu1 %v13044_v25  ;;  %2983 = vmatprep.subr.bf16.mxu0 %v13047_v26  ;;  %v15239_v25 = vor.u32 %v1380_v11, %v15093_v4  ;;  %v13082_v26 = vld [vmem:[%s18315_s2 + $0x398] ss:$12 sps:$4 sm:$0xff]   ;;  %v13085_v4 = vld [vmem:[%s18315_s2 + $0x1a0] ss:$12 sps:$4 sm:$0xff]  }
  0xc5   : > { %12248 = vmatprep.subr.bf16.mxu1 %v13048_v27  ;;  %v13083_v27 = vld [vmem:[%s18315_s2 + $0x260] ss:$12 sps:$4 sm:$0xff]  }
  0xc6   : > { %v13117_v11 = vld [vmem:[%s18315_s2 + $0x4a0] ss:$12 sps:$4 sm:$0xff]  }
  0xc7   : > { %2984 = vmatpush2.bf16.msra.mxu0 %v13045_v29  ;;  %v13084_v29 = vld [vmem:[%s18315_s2 + $0x440] ss:$12 sps:$4 sm:$0xff]  }
  0xc8   : > { %12249 = vmatpush3.bf16.msra.mxu1 %v13049_v31  ;;  %2985 = vmatprep.subr.bf16.mxu0 %v13052_v33  ;;  %v15255_v31 = vor.u32 %v1377_v18, %v1327_v17  ;;  %v13086_v33 = vld [vmem:[%s18315_s2 + $0x380] ss:$12 sps:$4 sm:$0xff]  }
  0xc9   : > { %12262 = vmatprep.subr.bf16.mxu1 %v13053_v34  ;;  %v13087_v34 = vld [vmem:[%s18315_s2 + $0x248] ss:$12 sps:$4 sm:$0xff]   ;;  %v13115_v17 = vld [vmem:[%s18315_s2 + $0x560] ss:$12 sps:$4 sm:$0xff]  }
  0xca   : > { %v13118_v18 = vld [vmem:[%s18315_s2 + $0x680] ss:$12 sps:$4 sm:$0xff]  }
  0xcb   : > { %3096 = vmatmul.mubr.bf16.vlgmr.msra.gmra.mxu1 %v14708_v42  ;;  %2986 = vmatpush2.bf16.msra.mxu0 %v13050_v35  ;;  %v13060_v42 = vld [vmem:[%s18315_s2 + $0x6d8] ss:$12 sps:$4 sm:$0xff]   ;;  %v13088_v35 = vld [vmem:[%s18315_s2 + $0x428] ss:$12 sps:$4 sm:$0xff]  }
  0xcc   : > { %12263 = vmatpush3.bf16.msra.mxu1 %v13054_v37  ;;  %2987 = vmatprep.subr.bf16.mxu0 %v13057_v38  ;;  %v13089_v37 = vld [vmem:[%s18315_s2 + $0x188] ss:$12 sps:$4 sm:$0xff]  }
  0xcd   : > { %12264 = vmatprep.subr.bf16.mxu1 %v13058_v41  ;;  %3103 = vmatprep.mubr.bf16.mxu1 %v14723_v47  ;;  %v13065_v47 = vld [vmem:[%s18315_s2 + $0x6c0] ss:$12 sps:$4 sm:$0xff]   ;;  %v13090_v38 = vld [vmem:[%s18315_s2 + $0x368] ss:$12 sps:$4 sm:$0xff]   ;;  %v13092_v41 = vld [vmem:[%s18315_s2 + $0x5f0] ss:$12 sps:$4 sm:$0xff]  }
  0xcf   : > { %2988 = vmatpush2.bf16.msra.mxu0 %v13055_v46  ;;  %v13093_v46 = vld [vmem:[%s18315_s2 + $0x350] ss:$12 sps:$4 sm:$0xff]  }
  0xd0   : > { %12265 = vmatpush3.bf16.msra.mxu1 %v13059_v50  ;;  %2989 = vmatprep.subr.bf16.mxu0 %v13062_v56  ;;  %v13094_v50 = vld [vmem:[%s18315_s2 + $0x530] ss:$12 sps:$4 sm:$0xff]   ;;  %v13095_v56 = vld [vmem:[%s18315_s2 + $0x3f8] ss:$12 sps:$4 sm:$0xff]  }
  0xd1   : > { %12266 = vmatprep.subr.bf16.mxu1 %v13063_v62  ;;  %v13098_v62 = vld [vmem:[%s18315_s2 + $0x518] ss:$12 sps:$4 sm:$0xff]  }
  0xd3   : > { %3104 = vmatmul.mubr.bf16.gmra.mxu1 %v14748_v58  ;;  %2990 = vmatpush2.bf16.msra.mxu0 %v13060_v42  ;;  %v13078_v58 = vld [vmem:[%s18315_s2 + $0x3b0] ss:$12 sps:$4 sm:$0xff]   ;;  %v13099_v42 = vld [vmem:[%s18315_s2 + $0x3e0] ss:$12 sps:$4 sm:$0xff]  }
  0xd4   : > { %12267 = vmatpush3.bf16.msra.mxu1 %v13064_v1  ;;  %2991 = vmatprep.subr.bf16.mxu0 %v13067_v40  ;;  %v13101_v1 = vld [vmem:[%s18315_s2 + $0x320] ss:$12 sps:$4 sm:$0xff]  }
  0xd5   : > { %12268 = vmatprep.subr.bf16.mxu1 %v13068_v45  ;;  %3143 = vmatprep.mubr.bf16.mxu1 %v14669_v19  ;;  %v13081_v19 = vld [vmem:[%s18315_s2 + $0x1b8] ss:$12 sps:$4 sm:$0xff]   ;;  %v13102_v40 = vld [vmem:[%s18315_s2 + $0x500] ss:$12 sps:$4 sm:$0xff]   ;;  %v13107_v45 = vld [vmem:[%s18315_s2 + $0x590] ss:$12 sps:$4 sm:$0xff]  }
  0xd7   : > { %2992 = vmatpush2.bf16.msra.mxu0 %v13065_v47  ;;  %v13109_v47 = vld [vmem:[%s18315_s2 + $0x4d0] ss:$12 sps:$4 sm:$0xff]  }
  0xd8   : > { %12269 = vmatpush3.bf16.msra.mxu1 %v13069_v5  ;;  %12290 = vmatprep.subr.bf16.mxu0 %v13076_v9  ;;  %v13110_v5 = vld [vmem:[%s18315_s2 + $0x6b0] ss:$12 sps:$4 sm:$0xff]   ;;  %v13113_v9 = vld [vmem:[%s18315_s2 + $0x4b8] ss:$12 sps:$4 sm:$0xff]  }
  0xd9   : > { %12270 = vmatprep.subr.bf16.mxu1 %v13075_v6  ;;  %v13111_v6 = vld [vmem:[%s18315_s2 + $0x578] ss:$12 sps:$4 sm:$0xff]  }
  0xda   : > { %2994 = vmatmul.mubr.bf16.vlgmr.msra.gmra.mxu0 %v15227_v21 }
  0xdb   : > { %12291 = vmatpush3.bf16.msra.mxu0 %v13078_v58  ;;  %3003 = vmatprep.mubr.bf16.mxu0 %v15239_v25  ;;  %v13121_v58 = vld [vmem:[%s18315_s2 + $0x488] ss:$12 sps:$4 sm:$0xff]  }
  0xdc   : > { %12271 = vmatpush3.bf16.msra.mxu1 %v13077_v20  ;;  %12292 = vmatprep.subr.bf16.mxu0 %v13080_v24  ;;  %v13119_v20 = vld [vmem:[%s18315_s2 + $0x548] ss:$12 sps:$4 sm:$0xff]   ;;  %v13123_v24 = vld [vmem:[%s18315_s2 + $0x710] ss:$12 sps:$4 sm:$0xff]  }
  0xdd   : > { %12272 = vmatprep.subr.bf16.mxu1 %v13079_v23  ;;  %v13122_v23 = vld [vmem:[%s18315_s2 + $0x668] ss:$12 sps:$4 sm:$0xff]  }
  0xdf   : > { %12293 = vmatpush3.bf16.msra.mxu0 %v13082_v26  ;;  %v13126_v26 = vld [vmem:[%s18315_s2 + $0x6f8] ss:$12 sps:$4 sm:$0xff]  }
  0xe0   : > { %12273 = vmatpush3.bf16.msra.mxu1 %v13081_v19  ;;  %12294 = vmatprep.subr.bf16.mxu0 %v13084_v29  ;;  %v13125_v19 = vld [vmem:[%s18315_s2 + $0x650] ss:$12 sps:$4 sm:$0xff]   ;;  %v13129_v29 = vld [vmem:[%s18315_s2 + $0x6e0] ss:$12 sps:$4 sm:$0xff]  }
  0xe1   : > { %12274 = vmatprep.subr.bf16.mxu1 %v13083_v27  ;;  %v13127_v27 = vld [vmem:[%s18315_s2 + $0x7b8] ss:$12 sps:$4 sm:$0xff]  }
  0xe2   : > { %3004 = vmatmul.mubr.bf16.gmra.mxu0 %v15255_v31 }
  0xe3   : > { %12295 = vmatpush3.bf16.msra.mxu0 %v13086_v33  ;;  %3191 = vmatprep.mubr.bf16.mxu0 %v14862_v49  ;;  %v13097_v49 = vld [vmem:[%s18315_s2 + $0x338] ss:$12 sps:$4 sm:$0xff]   ;;  %v13132_v33 = vld [vmem:[%s18315_s2 + $0x6c8] ss:$12 sps:$4 sm:$0xff]  }
  0xe4   : > { %12275 = vmatpush3.bf16.msra.mxu1 %v13085_v4  ;;  %12296 = vmatprep.subr.bf16.mxu0 %v13088_v35  ;;  %v13130_v4 = vld [vmem:[%s18315_s2 + $0x7a0] ss:$12 sps:$4 sm:$0xff]  }
  0xe5   : > { %12276 = vmatprep.subr.bf16.mxu1 %v13087_v34  ;;  %v13133_v34 = vld [vmem:[%s18315_s2 + $0x788] ss:$12 sps:$4 sm:$0xff]   ;;  %v13137_v35 = vld [vmem:[%s18314_s1 + $0xac] ss:$12 sps:$4 sm:$0xff]  }
  0xe7   : > { %12297 = vmatpush3.bf16.msra.mxu0 %v13090_v38  ;;  %v13138_v38 = vld [vmem:[%s18314_s1 + $0x228] ss:$12 sps:$4 sm:$0xff]  }
  0xe8   : > { %12277 = vmatpush3.bf16.msra.mxu1 %v13089_v37  ;;  %12298 = vmatprep.subr.bf16.mxu0 %v13091_v39  ;;  %v13140_v37 = vld [vmem:[%s18314_s1 + $0x22c] ss:$12 sps:$4 sm:$0xff]   ;;  %v13143_v39 = vld [vmem:[%s18314_s1 + $0x94] ss:$12 sps:$4 sm:$0xff]  }
  0xe9   : > { %12318 = vmatprep.subr.bf16.mxu1 %v13092_v41 }
  0xeb   : > { %3144 = vmatmul.mubr.bf16.vlgmr.msra.gmra.mxu1 %v14711_v43  ;;  %12299 = vmatpush3.bf16.msra.mxu0 %v13093_v46  ;;  %v13100_v43 = vld [vmem:[%s18315_s2 + $0x5c0] ss:$12 sps:$4 sm:$0xff]  }
  0xec   : > { %12319 = vmatpush3.bf16.msra.mxu1 %v13094_v50  ;;  %12300 = vmatprep.subr.bf16.mxu0 %v13095_v56  ;;  %v13141_v50 = vld [vmem:[%s18314_s1 + $0x90] ss:$12 sps:$4 sm:$0xff]  }
  0xed   : > { %12320 = vmatprep.subr.bf16.mxu1 %v13096_v61  ;;  %3151 = vmatprep.mubr.bf16.mxu1 %v14725_v48  ;;  %v13104_v48 = vld [vmem:[%s18315_s2 + $0x5a8] ss:$12 sps:$4 sm:$0xff]   ;;  %v13144_v61 = vld [vmem:[%s18314_s1 + $0x210] ss:$12 sps:$4 sm:$0xff]  }
  0xef   : > { %12301 = vmatpush3.bf16.msra.mxu0 %v13097_v49 }
  0xf0   : > { %12321 = vmatpush3.bf16.msra.mxu1 %v13098_v62  ;;  %12302 = vmatprep.subr.bf16.mxu0 %v13099_v42 }
  0xf1   : > { %12322 = vmatprep.subr.bf16.mxu1 %v13100_v43  ;;  %v14222_v43 = vld [vmem:[%s14605_s25 + $0xc] ss:$44 sps:$4 sm:$0xff]  }
  0xf3   : > { %3152 = vmatmul.mubr.bf16.gmra.mxu1 %v14750_v59  ;;  %12303 = vmatpush3.bf16.msra.mxu0 %v13101_v1  ;;  %v13108_v59 = vld [vmem:[%s18315_s2 + $0x770] ss:$12 sps:$4 sm:$0xff]  }
  0xf4   : > { %12323 = vmatpush3.bf16.msra.mxu1 %v13102_v40  ;;  %12304 = vmatprep.subr.bf16.mxu0 %v13103_v2  ;;  %v13147_v2 = vld [vmem:[%s18314_s1 + $0x78] ss:$12 sps:$4 sm:$0xff]  }
  0xf5   : > { %12324 = vmatprep.subr.bf16.mxu1 %v13104_v48  ;;  %3239 = vmatprep.mubr.bf16.mxu1 %v14876_v55  ;;  %v13112_v55 = vld [vmem:[%s18315_s2 + $0x758] ss:$12 sps:$4 sm:$0xff]  }
  0xf7   : > { %12305 = vmatpush3.bf16.msra.mxu0 %v13105_v3  ;;  %v13150_v3 = vld [vmem:[%s18314_s1 + $0x1f8] ss:$12 sps:$4 sm:$0xff]  }
  0xf8   : > { %12325 = vmatpush3.bf16.msra.mxu1 %v13106_v36  ;;  %12346 = vmatprep.subr.bf16.mxu0 %v13108_v59  ;;  %v13158_v59 = vld [vmem:[%s18314_s1 + $0x1e4] ss:$12 sps:$4 sm:$0xff]  }
  0xf9   : > { %12326 = vmatprep.subr.bf16.mxu1 %v13107_v45 }
  0xfa   : > { %3192 = vmatmul.mubr.bf16.vlgmr.msra.gmra.mxu0 %v14969_v52  ;;  %v13116_v52 = vld [vmem:[%s18315_s2 + $0x740] ss:$12 sps:$4 sm:$0xff]  }
  0xfb   : > { %12347 = vmatpush3.bf16.msra.mxu0 %v13110_v5  ;;  %3199 = vmatprep.mubr.bf16.mxu0 %v14988_v63  ;;  %v13120_v63 = vld [vmem:[%s18315_s2 + $0x728] ss:$12 sps:$4 sm:$0xff]  }
  0xfc   : > { %12327 = vmatpush3.bf16.msra.mxu1 %v13109_v47  ;;  %12348 = vmatprep.subr.bf16.mxu0 %v13112_v55  ;;  %v13153_v47 = vld [vmem:[%s18314_s1 + $0x60] ss:$12 sps:$4 sm:$0xff]  }
  0xfd   : > { %12328 = vmatprep.subr.bf16.mxu1 %v13111_v6  ;;  %v13156_v55 = vld [vmem:[%s18314_s1 + $0x1e0] ss:$12 sps:$4 sm:$0xff]  }
  0xff   : > { %12349 = vmatpush3.bf16.msra.mxu0 %v13114_v14  ;;  %v13164_v14 = vld [vmem:[%s18314_s1 + $0x1cc] ss:$12 sps:$4 sm:$0xff]  }
 0x100   : > { %12329 = vmatpush3.bf16.msra.mxu1 %v13113_v9  ;;  %12350 = vmatprep.subr.bf16.mxu0 %v13116_v52 }
 0x101   : > { %12330 = vmatprep.subr.bf16.mxu1 %v13115_v17 }
 0x102   : > { %3200 = vmatmul.mubr.bf16.gmra.mxu0 %v15012_v7  ;;  %v13124_v7 = vld [vmem:[%s18315_s2 + $0x7d0] ss:$12 sps:$4 sm:$0xff]  }
 0x103   : > { %12351 = vmatpush3.bf16.msra.mxu0 %v13118_v18  ;;  %3287 = vmatprep.mubr.bf16.mxu0 %v15112_v12  ;;  %v13128_v12 = vld [vmem:[%s18315_s2 + $0x638] ss:$12 sps:$4 sm:$0xff]  }
 0x104   : > { %12331 = vmatpush3.bf16.msra.mxu1 %v13117_v11  ;;  %12352 = vmatprep.subr.bf16.mxu0 %v13120_v63  ;;  %v14223_v18 = vld [vmem:[%s14605_s25 + $0x4] ss:$44 sps:$4 sm:$0xff]  }
 0x105   : > { %12332 = vmatprep.subr.bf16.mxu1 %v13119_v20  ;;  %v13159_v20 = vld [vmem:[%s18314_s1 + $0x48] ss:$12 sps:$4 sm:$0xff]  }
 0x107   : > { %12353 = vmatpush3.bf16.msra.mxu0 %v13122_v23  ;;  %v13162_v23 = vld [vmem:[%s18314_s1 + $0x1c8] ss:$12 sps:$4 sm:$0xff]  }
 0x108   : > { %12333 = vmatpush3.bf16.msra.mxu1 %v13121_v58  ;;  %12354 = vmatprep.subr.bf16.mxu0 %v13123_v24  ;;  %v13167_v24 = vld [vmem:[%s18314_s1 + $0x34] ss:$12 sps:$4 sm:$0xff]  }
 0x109   : > { %12638 = vmatprep.subr.bf16.mxu1 %v13124_v7 }
 0x10b   : > { %3240 = vmatmul.mubr.bf16.vlgmr.msra.gmra.mxu1 %v14972_v53  ;;  %12355 = vmatpush3.bf16.msra.mxu0 %v13125_v19  ;;  %v13131_v53 = vld [vmem:[%s18315_s2 + $0x620] ss:$12 sps:$4 sm:$0xff]  }
 0x10c   : > { %12639 = vmatpush3.bf16.msra.mxu1 %v13124_v7  ;;  %12356 = vmatprep.subr.bf16.mxu0 %v13126_v26  ;;  %v13170_v7 = vld [vmem:[%s18314_s1 + $0x1b4] ss:$12 sps:$4 sm:$0xff]  }
 0x10d   : > { %12640 = vmatprep.subr.bf16.mxu1 %v13127_v27  ;;  %3247 = vmatprep.mubr.bf16.mxu1 %v14991_v0  ;;  %v13134_v0 = vld [vmem:[%s18315_s2 + $0x608] ss:$12 sps:$4 sm:$0xff]  }
 0x10f   : > { %12357 = vmatpush3.bf16.msra.mxu0 %v13128_v12  ;;  %v13168_v12 = vld [vmem:[%s18314_s1 + $0x1b0] ss:$12 sps:$4 sm:$0xff]  }
 0x110   : > { %12641 = vmatpush3.bf16.msra.mxu1 %v13127_v27  ;;  %12358 = vmatprep.subr.bf16.mxu0 %v13129_v29  ;;  %v13165_v27 = vld [vmem:[%s18314_s1 + $0x30] ss:$12 sps:$4 sm:$0xff]  }
 0x111   : > { %12642 = vmatprep.subr.bf16.mxu1 %v13130_v4  ;;  %v13173_v29 = vld [vmem:[%s18314_s1 + $0x1c] ss:$12 sps:$4 sm:$0xff]  }
 0x113   : > { %3248 = vmatmul.mubr.bf16.gmra.mxu1 %v15014_v8  ;;  %12359 = vmatpush3.bf16.msra.mxu0 %v13131_v53  ;;  %v13135_v8 = vld [vmem:[%s18314_s1 + $0xa8] ss:$12 sps:$4 sm:$0xff]   ;;  %v13171_v53 = vld [vmem:[%s18314_s1 + $0x18] ss:$12 sps:$4 sm:$0xff]  }
 0x114   : > { %12643 = vmatpush3.bf16.msra.mxu1 %v13130_v4  ;;  %12360 = vmatprep.subr.bf16.mxu0 %v13132_v33  ;;  %v13176_v4 = vld [vmem:[%s18314_s1 + $0x19c] ss:$12 sps:$4 sm:$0xff]   ;;  %v13174_v33 = vld [vmem:[%s18314_s1 + $0x198] ss:$12 sps:$4 sm:$0xff]  }
 0x115   : > { %12644 = vmatprep.subr.bf16.mxu1 %v13133_v34  ;;  %12646 = vmatprep.mubr.msk.bf16.mxu1 %vm2750_vm1, %v15044_v30  ;;  %v13146_v30 = vld [vmem:[%s18314_s1 + $0x214] ss:$12 sps:$4 sm:$0xff]  }
 0x117   : > { %12361 = vmatpush3.bf16.msra.mxu0 %v13134_v0  ;;  %v13182_v0 = vld [vmem:[%s18314_s1 + $0x184] ss:$12 sps:$4 sm:$0xff]  }
 0x118   : > { %12645 = vmatpush3.bf16.msra.mxu1 %v13133_v34  ;;  %4719 = vmatprep.subr.bf16.mxu0 %v13137_v35  ;;  %v13179_v34 = vld [vmem:[%s18314_s1 + $0x4] ss:$12 sps:$4 sm:$0xff]   ;;  %v13177_v35 = vld [vmem:[%s18314_s1] ss:$12 sps:$4 sm:$0xff]  }
 0x119   : > { %4770 = vmatprep.subr.bf16.mxu1 %v13140_v37  ;;  %v13180_v37 = vld [vmem:[%s18314_s1 + $0x180] ss:$12 sps:$4 sm:$0xff]  }
 0x11a   : > { %v2791_v41 = vpop.f32.mrf.mxu0  ;;  %3288 = vmatmul.mubr.bf16.vlgmr.msra.gmra.mxu0 %v15227_v21  ;;  %v13152_v21 = vld [vmem:[%s18314_s1 + $0x1fc] ss:$12 sps:$4 sm:$0xff]  }
 0x11b   : > { %v2842_v46 = vpop.f32.mrf.mxu1  ;;  %12647 = vmatmul.mubr.msk.bf16.vlgmr.msra.gmra.mxu1 %vm2750_vm1, %v15081_v54  ;;  %4720 = vmatpush1.bf16.msra.mxu0 %v13135_v8  ;;  %v13149_v54 = vld [vmem:[%s18314_s1 + $0x7c] ss:$12 sps:$4 sm:$0xff]   ;;  %v13185_v8 = vld [vmem:[%s18314_s1 + $0x16c] ss:$12 sps:$4 sm:$0xff]  }
 0x11c   : > { %v15443_v56 = vadd.f32 %v2842_v46, %v2791_v41  ;;  %4771 = vmatpush1.bf16.msra.mxu1 %v13138_v38  ;;  %v2793_v49 = vpop.f32.mrf.mxu0  ;;  %4721 = vmatprep.subr.bf16.mxu0 %v13143_v39  ;;  %v13188_v38 = vld [vmem:[%s18314_s1 + $0x2ec] ss:$12 sps:$4 sm:$0xff]   ;;  %v13183_v39 = vld [vmem:[%s18314_s1 + $0x168] ss:$12 sps:$4 sm:$0xff]  }
 0x11d   : > { %v2844_v62 = vpop.f32.mrf.mxu1  ;;  %4772 = vmatprep.subr.bf16.mxu1 %v13146_v30  ;;  %3295 = vmatprep.mubr.bf16.mxu0 %v15239_v25  ;;  %v13155_v25 = vld [vmem:[%s18314_s1 + $0x64] ss:$12 sps:$4 sm:$0xff]   ;;  %v13186_v30 = vld [vmem:[%s18314_s1 + $0x2e8] ss:$12 sps:$4 sm:$0xff]  }
 0x11e   : > { %v15454_v42 = vadd.f32 %v2844_v62, %v2793_v49  ;;  %4802 = vmatprep.mubr.bf16.mxu1 %v14222_v43  ;;  %v2795_v1 = vpop.f32.mrf.mxu0  ;;  %v13191_v41 = vld [vmem:[%s18314_s1 + $0x154] ss:$12 sps:$4 sm:$0xff]   ;;  %v13197_v49 = vld [vmem:[%s18314_s1 + $0x13c] ss:$12 sps:$4 sm:$0xff]   ;;  %v13203_v43 = vld [vmem:[%s18314_s1 + $0x124] ss:$12 sps:$4 sm:$0xff]  }
 0x11f   : > { %v2846_v40 = vpop.f32.mrf.mxu1  ;;  %4722 = vmatpush1.bf16.msra.mxu0 %v13141_v50  ;;  %v13194_v46 = vld [vmem:[%s18314_s1 + $0x2d4] ss:$12 sps:$4 sm:$0xff]   ;;  %v13189_v50 = vld [vmem:[%s18314_s1 + $0x150] ss:$12 sps:$4 sm:$0xff]  }
 0x120   : > { %v15461_v48 = vadd.f32 %v2846_v40, %v2795_v1  ;;  %4773 = vmatpush1.bf16.msra.mxu1 %v13144_v61  ;;  %v15466_v36 = vpop.f32.mrf.mxu0  ;;  %4723 = vmatprep.subr.bf16.mxu0 %v13149_v54  ;;  %v13192_v61 = vld [vmem:[%s18314_s1 + $0x2d0] ss:$12 sps:$4 sm:$0xff]   ;;  %v13195_v54 = vld [vmem:[%s18314_s1 + $0x138] ss:$12 sps:$4 sm:$0xff]   ;;  %v13201_v40 = vld [vmem:[%s18314_s1 + $0x120] ss:$12 sps:$4 sm:$0xff]  }
 0x121   : > { %v15468_v45 = vpop.f32.mrf.mxu1  ;;  %4774 = vmatprep.subr.bf16.mxu1 %v13152_v21  ;;  %v13200_v62 = vld [vmem:[%s18314_s1 + $0x2bc] ss:$12 sps:$4 sm:$0xff]   ;;  %v13198_v21 = vld [vmem:[%s18314_s1 + $0x2b8] ss:$12 sps:$4 sm:$0xff]  }
 0x122   : > { %3296 = vmatmul.mubr.bf16.gmra.mxu0 %v15255_v31  ;;  %v2801_v5 = vpop.f32.mrf.mxu0  ;;  %v13161_v31 = vld [vmem:[%s18314_s1 + $0x4c] ss:$12 sps:$4 sm:$0xff]   ;;  %v13206_v1 = vld [vmem:[%s18314_s1 + $0x2a4] ss:$12 sps:$4 sm:$0xff]  }
 0x123   : > { %v2852_v6 = vpop.f32.mrf.mxu1  ;;  %4724 = vmatpush1.bf16.msra.mxu0 %v13147_v2  ;;  %4751 = vmatprep.mubr.bf16.mxu0 %v14223_v18  ;;  %v13204_v2 = vld [vmem:[%s18314_s1 + $0x2a0] ss:$12 sps:$4 sm:$0xff]   ;;  %v13222_v18 = vld [vmem:[%s18314_s1 + $0x258] ss:$12 sps:$4 sm:$0xff]  }
 0x124   : > { %4775 = vmatpush1.bf16.msra.mxu1 %v13150_v3  ;;  %v15483_v9 = vadd.f32 %v2852_v6, %v2801_v5  ;;  %4725 = vmatprep.subr.bf16.mxu0 %v13155_v25  ;;  %v2803_v17 = vpop.f32.mrf.mxu0  ;;  %v13209_v3 = vld [vmem:[%s18314_s1 + $0x10c] ss:$12 sps:$4 sm:$0xff]   ;;  %v13215_v5 = vld [vmem:[%s18314_s1 + $0xf4] ss:$12 sps:$4 sm:$0xff]  }
 0x125   : > { %4776 = vmatprep.subr.bf16.mxu1 %v13158_v59  ;;  %v2854_v52 = vpop.f32.mrf.mxu1  ;;  %v13212_v25 = vld [vmem:[%s18314_s1 + $0x28c] ss:$12 sps:$4 sm:$0xff]   ;;  %v13207_v59 = vld [vmem:[%s18314_s1 + $0x108] ss:$12 sps:$4 sm:$0xff]  }
 0x126   : > { %v15491_v11 = vadd.f32 %v2854_v52, %v2803_v17  ;;  %v2805_v63 = vpop.f32.mrf.mxu0  ;;  %v13218_v6 = vld [vmem:[%s18314_s1 + $0x274] ss:$12 sps:$4 sm:$0xff]   ;;  %v13224_v17 = vld [vmem:[%s18314_s1 + $0x25c] ss:$12 sps:$4 sm:$0xff]   ;;  %v13219_v52 = vld [vmem:[%s18314_s1 + $0xd8] ss:$12 sps:$4 sm:$0xff]  }
 0x127   : > { %v2856_v58 = vpop.f32.mrf.mxu1  ;;  %4726 = vmatpush1.bf16.msra.mxu0 %v13153_v47  ;;  %v13210_v47 = vld [vmem:[%s18314_s1 + $0x288] ss:$12 sps:$4 sm:$0xff]   ;;  %v13230_v63 = vld [vmem:[%s18314_s1 + $0x244] ss:$12 sps:$4 sm:$0xff]  }
 0x128   : > { %4777 = vmatpush1.bf16.msra.mxu1 %v13156_v55  ;;  %4727 = vmatprep.subr.bf16.mxu0 %v13161_v31  ;;  %v2806_v19 = vpop.f32.mrf.mxu0  ;;  %v13213_v55 = vld [vmem:[%s18314_s1 + $0xf0] ss:$12 sps:$4 sm:$0xff]   ;;  %v13225_v58 = vld [vmem:[%s18314_s1 + $0xc0] ss:$12 sps:$4 sm:$0xff]  }
 0x129   : > { %4778 = vmatprep.subr.bf16.mxu1 %v13164_v14  ;;  %v2857_v26 = vpop.f32.mrf.mxu1  ;;  %v13216_v31 = vld [vmem:[%s18314_s1 + $0x270] ss:$12 sps:$4 sm:$0xff]   ;;  %v13231_v19 = vld [vmem:[%s18314_s1 + $0x3a8] ss:$12 sps:$4 sm:$0xff]  }
 0x12a   : > { %v13221_v14 = vld [vmem:[%s18314_s1 + $0xdc] ss:$12 sps:$4 sm:$0xff]  }
 0x12b   : > { %4728 = vmatpush1.bf16.msra.mxu0 %v13159_v20  ;;  %v13227_v20 = vld [vmem:[%s18314_s1 + $0xc4] ss:$12 sps:$4 sm:$0xff]   ;;  %v13234_v26 = vld [vmem:[%s18314_s1 + $0x528] ss:$12 sps:$4 sm:$0xff]  }
 0x12c   : > { %4779 = vmatpush1.bf16.msra.mxu1 %v13162_v23  ;;  %4729 = vmatprep.subr.bf16.mxu0 %v13167_v24  ;;  %v13228_v23 = vld [vmem:[%s18314_s1 + $0x240] ss:$12 sps:$4 sm:$0xff]  }
 0x12d   : > { %4780 = vmatprep.subr.bf16.mxu1 %v13170_v7  ;;  %v13233_v24 = vld [vmem:[%s18314_s1 + $0x3ac] ss:$12 sps:$4 sm:$0xff]  }
 0x12e   : > { %v13236_v7 = vld [vmem:[%s18314_s1 + $0x52c] ss:$12 sps:$4 sm:$0xff]  }
 0x12f   : > { %4730 = vmatpush1.bf16.msra.mxu0 %v13165_v27  ;;  %v13239_v27 = vld [vmem:[%s18314_s1 + $0x394] ss:$12 sps:$4 sm:$0xff]  }
 0x130   : > { %4781 = vmatpush1.bf16.msra.mxu1 %v13168_v12  ;;  %4731 = vmatprep.subr.bf16.mxu0 %v13173_v29  ;;  %v13242_v12 = vld [vmem:[%s18314_s1 + $0x514] ss:$12 sps:$4 sm:$0xff]   ;;  %v13237_v29 = vld [vmem:[%s18314_s1 + $0x390] ss:$12 sps:$4 sm:$0xff]  }
 0x131   : > { %4782 = vmatprep.subr.bf16.mxu1 %v13176_v4 }
 0x133   : > { %4732 = vmatpush1.bf16.msra.mxu0 %v13171_v53  ;;  %v14224_v53 = vld [vmem:[%s14605_s25] ss:$44 sps:$4 sm:$0xff]  }
 0x134   : > { %4783 = vmatpush1.bf16.msra.mxu1 %v13174_v33  ;;  %4733 = vmatprep.subr.bf16.mxu0 %v13179_v34  ;;  %v14225_v33 = vld [vmem:[%s14605_s25 + $0x8] ss:$44 sps:$4 sm:$0xff]  }
 0x135   : > { %4784 = vmatprep.subr.bf16.mxu1 %v13182_v0  ;;  %v13240_v0 = vld [vmem:[%s18314_s1 + $0x510] ss:$12 sps:$4 sm:$0xff]  }
 0x137   : > { %4734 = vmatpush1.bf16.msra.mxu0 %v13177_v35 }
 0x138   : > { %4785 = vmatpush1.bf16.msra.mxu1 %v13180_v37  ;;  %4735 = vmatprep.subr.bf16.mxu0 %v13185_v8  ;;  %v13245_v37 = vld [vmem:[%s18314_s1 + $0x37c] ss:$12 sps:$4 sm:$0xff]  }
 0x139   : > { %4786 = vmatprep.subr.bf16.mxu1 %v13188_v38 }
 0x13b   : > { %4736 = vmatpush2.bf16.msra.mxu0 %v13183_v39  ;;  %v13248_v39 = vld [vmem:[%s18314_s1 + $0x4fc] ss:$12 sps:$4 sm:$0xff]  }
 0x13c   : > { %4787 = vmatpush2.bf16.msra.mxu1 %v13186_v30  ;;  %4737 = vmatprep.subr.bf16.mxu0 %v13191_v41 }
 0x13d   : > { %4788 = vmatprep.subr.bf16.mxu1 %v13194_v46 }
 0x13f   : > { %4738 = vmatpush2.bf16.msra.mxu0 %v13189_v50  ;;  %v13243_v50 = vld [vmem:[%s18314_s1 + $0x378] ss:$12 sps:$4 sm:$0xff]  }
 0x140   : > { %4789 = vmatpush2.bf16.msra.mxu1 %v13192_v61  ;;  %4739 = vmatprep.subr.bf16.mxu0 %v13197_v49 }
 0x141   : > { %4790 = vmatprep.subr.bf16.mxu1 %v13200_v62 }
 0x143   : > { %4740 = vmatpush2.bf16.msra.mxu0 %v13195_v54 }
 0x144   : > { %4791 = vmatpush2.bf16.msra.mxu1 %v13198_v21  ;;  %4741 = vmatprep.subr.bf16.mxu0 %v13203_v43  ;;  %v13251_v21 = vld [vmem:[%s18314_s1 + $0x364] ss:$12 sps:$4 sm:$0xff]  }
 0x145   : > { %4792 = vmatprep.subr.bf16.mxu1 %v13206_v1 }
 0x147   : > { %4742 = vmatpush2.bf16.msra.mxu0 %v13201_v40 }
 0x148   : > { %4793 = vmatpush2.bf16.msra.mxu1 %v13204_v2  ;;  %4743 = vmatprep.subr.bf16.mxu0 %v13209_v3  ;;  %v13249_v2 = vld [vmem:[%s18314_s1 + $0x360] ss:$12 sps:$4 sm:$0xff]  }
 0x149   : > { %4794 = vmatprep.subr.bf16.mxu1 %v13212_v25  ;;  %v13252_v25 = vld [vmem:[%s18314_s1 + $0x4e0] ss:$12 sps:$4 sm:$0xff]  }
 0x14b   : > { %4744 = vmatpush2.bf16.msra.mxu0 %v13207_v59  ;;  %v13257_v59 = vld [vmem:[%s18314_s1 + $0x34c] ss:$12 sps:$4 sm:$0xff]  }
 0x14c   : > { %4795 = vmatpush2.bf16.msra.mxu1 %v13210_v47  ;;  %4745 = vmatprep.subr.bf16.mxu0 %v13215_v5 }
 0x14d   : > { %4796 = vmatprep.subr.bf16.mxu1 %v13218_v6  ;;  %v13260_v6 = vld [vmem:[%s18314_s1 + $0x4cc] ss:$12 sps:$4 sm:$0xff]  }
 0x14f   : > { %4746 = vmatpush2.bf16.msra.mxu0 %v13213_v55 }
 0x150   : > { %4797 = vmatpush2.bf16.msra.mxu1 %v13216_v31  ;;  %4747 = vmatprep.subr.bf16.mxu0 %v13221_v14  ;;  %v13255_v31 = vld [vmem:[%s18314_s1 + $0x348] ss:$12 sps:$4 sm:$0xff]  }
 0x151   : > { %4798 = vmatprep.subr.bf16.mxu1 %v13224_v17  ;;  %v14226_v14 = vld [vmem:[%s14605_s25 + $0x14] ss:$44 sps:$4 sm:$0xff]   ;;  %v14227_v17 = vld [vmem:[%s14605_s25 + $0x1c] ss:$44 sps:$4 sm:$0xff]  }
 0x153   : > { %4748 = vmatpush2.bf16.msra.mxu0 %v13219_v52  ;;  %v13258_v52 = vld [vmem:[%s18314_s1 + $0x4c8] ss:$12 sps:$4 sm:$0xff]  }
 0x154   : > { %4799 = vmatpush2.bf16.msra.mxu1 %v13222_v18  ;;  %4749 = vmatprep.subr.bf16.mxu0 %v13227_v20 }
 0x155   : > { %4800 = vmatprep.subr.bf16.mxu1 %v13230_v63 }
 0x157   : > { %4750 = vmatpush2.bf16.msra.mxu0 %v13225_v58  ;;  %v13266_v58 = vld [vmem:[%s18314_s1 + $0x4b4] ss:$12 sps:$4 sm:$0xff]  }
 0x158   : > { %4801 = vmatpush2.bf16.msra.mxu1 %v13228_v23  ;;  %4821 = vmatprep.subr.bf16.mxu0 %v13233_v24 }
 0x159   : > { %4872 = vmatprep.subr.bf16.mxu1 %v13236_v7  ;;  %v13261_v7 = vld [vmem:[%s18314_s1 + $0x330] ss:$12 sps:$4 sm:$0xff]  }
 0x15a   : > { %v2893_v4 = vpop.f32.mrf.mxu0  ;;  %4752 = vmatmul.mubr.bf16.vlgmr.msra.gmra.mxu0 %v14224_v53  ;;  %v13270_v53 = vld [vmem:[%s18314_s1 + $0x498] ss:$12 sps:$4 sm:$0xff]  }
 0x15b   : > { %4803 = vmatmul.mubr.bf16.vlgmr.msra.gmra.mxu1 %v14225_v33  ;;  %v2944_v34 = vpop.f32.mrf.mxu1  ;;  %v2894_v35 = vadd.f32 %v2893_v4, %v15443_v56  ;;  %4822 = vmatpush1.bf16.msra.mxu0 %v13231_v19  ;;  %v13264_v19 = vld [vmem:[%s18314_s1 + $0x4b0] ss:$12 sps:$4 sm:$0xff]   ;;  %v13267_v4 = vld [vmem:[%s18314_s1 + $0x318] ss:$12 sps:$4 sm:$0xff]  }
 0x15c   : > { %4873 = vmatpush1.bf16.msra.mxu1 %v13234_v26  ;;  %v2895_v8 = vpop.f32.mrf.mxu0  ;;  %4823 = vmatprep.subr.bf16.mxu0 %v13239_v27  ;;  %v13269_v27 = vld [vmem:[%s18314_s1 + $0x31c] ss:$12 sps:$4 sm:$0xff]  }
 0x15d   : > { %v2946_v38 = vpop.f32.mrf.mxu1  ;;  %4874 = vmatprep.subr.bf16.mxu1 %v13242_v12  ;;  %v2896_v30 = vadd.f32 %v2895_v8, %v15454_v42  ;;  %v15666_v41 = vadd.f32 %v2944_v34, %v2894_v35  ;;  %4761 = vmatprep.mubr.bf16.mxu0 %v14621_v51  ;;  %v13246_v42 = vld [vmem:[%s18314_s1 + $0x4f8] ss:$12 sps:$4 sm:$0xff]   ;;  %v13272_v12 = vld [vmem:[%s18314_s1 + $0x49c] ss:$12 sps:$4 sm:$0xff]   ;;  %v13276_v8 = vld [vmem:[%s18314_s1 + $0x480] ss:$12 sps:$4 sm:$0xff]  }
 0x15e   : > { %4812 = vmatprep.mubr.bf16.mxu1 %v14628_v57  ;;  %v2897_v56 = vpop.f32.mrf.mxu0  ;;  %v13275_v34 = vld [vmem:[%s18314_s1 + $0x304] ss:$12 sps:$4 sm:$0xff]  }
 0x15f   : > { %v2948_v46 = vpop.f32.mrf.mxu1  ;;  %v2898_v61 = vadd.f32 %v2897_v56, %v15461_v48  ;;  %v15674_v49 = vadd.f32 %v2946_v38, %v2896_v30  ;;  %4824 = vmatpush1.bf16.msra.mxu0 %v13237_v29  ;;  %v13254_v48 = vld [vmem:[%s18314_s1 + $0x4e4] ss:$12 sps:$4 sm:$0xff]   ;;  %v13284_v30 = vld [vmem:[%s18314_s1 + $0x5ec] ss:$12 sps:$4 sm:$0xff]  }
 0x160   : > { %4875 = vmatpush1.bf16.msra.mxu1 %v13240_v0  ;;  %v15679_v62 = vpop.f32.mrf.mxu0  ;;  %4825 = vmatprep.subr.bf16.mxu0 %v13245_v37  ;;  %v13278_v0 = vld [vmem:[%s18314_s1 + $0x484] ss:$12 sps:$4 sm:$0xff]   ;;  %v13273_v37 = vld [vmem:[%s18314_s1 + $0x300] ss:$12 sps:$4 sm:$0xff]  }
 0x161   : > { %v15681_v54 = vpop.f32.mrf.mxu1  ;;  %4876 = vmatprep.subr.bf16.mxu1 %v13248_v39  ;;  %v15689_v43 = vadd.f32 %v2948_v46, %v2898_v61  ;;  %v13281_v39 = vld [vmem:[%s18314_s1 + $0x46c] ss:$12 sps:$4 sm:$0xff]   ;;  %v13279_v46 = vld [vmem:[%s18314_s1 + $0x468] ss:$12 sps:$4 sm:$0xff]  }
 0x162   : > { %v2903_v1 = vpop.f32.mrf.mxu0  ;;  %4762 = vmatmul.mubr.bf16.gmra.mxu0 %v14658_v13 }
 0x163   : > { %v2954_v40 = vpop.f32.mrf.mxu1  ;;  %4813 = vmatmul.mubr.bf16.gmra.mxu1 %v14663_v16  ;;  %v2904_v3 = vadd.f32 %v2903_v1, %v15483_v9  ;;  %4826 = vmatpush1.bf16.msra.mxu0 %v13243_v50  ;;  %v13282_v50 = vld [vmem:[%s18314_s1 + $0x5e8] ss:$12 sps:$4 sm:$0xff]   ;;  %v13285_v1 = vld [vmem:[%s18314_s1 + $0x450] ss:$12 sps:$4 sm:$0xff]  }
 0x164   : > { %4877 = vmatpush1.bf16.msra.mxu1 %v13246_v42  ;;  %v2905_v47 = vpop.f32.mrf.mxu0  ;;  %4827 = vmatprep.subr.bf16.mxu0 %v13251_v21  ;;  %v13287_v42 = vld [vmem:[%s18314_s1 + $0x454] ss:$12 sps:$4 sm:$0xff]  }
 0x165   : > { %v2956_v5 = vpop.f32.mrf.mxu1  ;;  %4878 = vmatprep.subr.bf16.mxu1 %v13254_v48  ;;  %v2906_v9 = vadd.f32 %v2905_v47, %v15491_v11  ;;  %v15707_v55 = vadd.f32 %v2954_v40, %v2904_v3  ;;  %4853 = vmatprep.mubr.bf16.mxu0 %v14226_v14  ;;  %v13263_v11 = vld [vmem:[%s18314_s1 + $0x334] ss:$12 sps:$4 sm:$0xff]   ;;  %v13288_v40 = vld [vmem:[%s18314_s1 + $0x5d0] ss:$12 sps:$4 sm:$0xff]   ;;  %v13308_v14 = vld [vmem:[%s18314_s1 + $0x58c] ss:$12 sps:$4 sm:$0xff]  }
 0x166   : > { %4904 = vmatprep.mubr.bf16.mxu1 %v14227_v17  ;;  %v2907_v20 = vpop.f32.mrf.mxu0  ;;  %v13290_v21 = vld [vmem:[%s18314_s1 + $0x5d4] ss:$12 sps:$4 sm:$0xff]   ;;  %v13296_v3 = vld [vmem:[%s18314_s1 + $0x5bc] ss:$12 sps:$4 sm:$0xff]   ;;  %v13299_v47 = vld [vmem:[%s18314_s1 + $0x424] ss:$12 sps:$4 sm:$0xff]  }
 0x167   : > { %v2958_v18 = vpop.f32.mrf.mxu1  ;;  %v15717_v63 = vadd.f32 %v2956_v5, %v2906_v9  ;;  %4828 = vmatpush1.bf16.msra.mxu0 %v13249_v2  ;;  %v13293_v2 = vld [vmem:[%s18314_s1 + $0x43c] ss:$12 sps:$4 sm:$0xff]   ;;  %v13302_v5 = vld [vmem:[%s18314_s1 + $0x5a4] ss:$12 sps:$4 sm:$0xff]   ;;  %v13300_v9 = vld [vmem:[%s18314_s1 + $0x5a0] ss:$12 sps:$4 sm:$0xff]  }
 0x168   : > { %4879 = vmatpush1.bf16.msra.mxu1 %v13252_v25  ;;  %4829 = vmatprep.subr.bf16.mxu0 %v13257_v59  ;;  %v2908_v24 = vpop.f32.mrf.mxu0  ;;  %v13291_v25 = vld [vmem:[%s18314_s1 + $0x438] ss:$12 sps:$4 sm:$0xff]   ;;  %v13303_v17 = vld [vmem:[%s18314_s1 + $0x408] ss:$12 sps:$4 sm:$0xff]  }
 0x169   : > { %4880 = vmatprep.subr.bf16.mxu1 %v13260_v6  ;;  %v2959_v23 = vpop.f32.mrf.mxu1  ;;  %v13294_v59 = vld [vmem:[%s18314_s1 + $0x5b8] ss:$12 sps:$4 sm:$0xff]   ;;  %v13297_v6 = vld [vmem:[%s18314_s1 + $0x420] ss:$12 sps:$4 sm:$0xff]   ;;  %v13317_v24 = vld [vmem:[%s18314_s1 + $0x3dc] ss:$12 sps:$4 sm:$0xff]  }
 0x16a   : > { %v13311_v18 = vld [vmem:[%s18314_s1 + $0x3f4] ss:$12 sps:$4 sm:$0xff]  }
 0x16b   : > { %v15731_v26 = vpop.f32.mrf.mxu1  ;;  %4830 = vmatpush1.bf16.msra.mxu0 %v13255_v31  ;;  %v13305_v31 = vld [vmem:[%s18314_s1 + $0x40c] ss:$12 sps:$4 sm:$0xff]   ;;  %v13314_v20 = vld [vmem:[%s18314_s1 + $0x574] ss:$12 sps:$4 sm:$0xff]  }
 0x16c   : > { %4881 = vmatpush1.bf16.msra.mxu1 %v13258_v52  ;;  %4831 = vmatprep.subr.bf16.mxu0 %v13263_v11  ;;  %v13306_v52 = vld [vmem:[%s18314_s1 + $0x588] ss:$12 sps:$4 sm:$0xff]   ;;  %v13309_v11 = vld [vmem:[%s18314_s1 + $0x3f0] ss:$12 sps:$4 sm:$0xff]  }
 0x16d   : > { %4882 = vmatprep.subr.bf16.mxu1 %v13266_v58  ;;  %v15739_v29 = vpop.f32.mrf.mxu1  ;;  %v13312_v58 = vld [vmem:[%s18314_s1 + $0x570] ss:$12 sps:$4 sm:$0xff]  }
 0x16f   : > { %v15747_v33 = vpop.f32.mrf.mxu1  ;;  %4832 = vmatpush1.bf16.msra.mxu0 %v13261_v7  ;;  %v13320_v7 = vld [vmem:[%s18314_s1 + $0x55c] ss:$12 sps:$4 sm:$0xff]  }
 0x170   : > { %4883 = vmatpush1.bf16.msra.mxu1 %v13264_v19  ;;  %4833 = vmatprep.subr.bf16.mxu0 %v13269_v27  ;;  %v13315_v27 = vld [vmem:[%s18314_s1 + $0x3d8] ss:$12 sps:$4 sm:$0xff]  }
 0x171   : > { %4884 = vmatprep.subr.bf16.mxu1 %v13272_v12  ;;  %v15755_v35 = vpop.f32.mrf.mxu1 }
 0x173   : > { %v15763_v38 = vpop.f32.mrf.mxu1  ;;  %4834 = vmatpush1.bf16.msra.mxu0 %v13267_v4  ;;  %v13318_v4 = vld [vmem:[%s18314_s1 + $0x558] ss:$12 sps:$4 sm:$0xff]  }
 0x174   : > { %4885 = vmatpush1.bf16.msra.mxu1 %v13270_v53  ;;  %4835 = vmatprep.subr.bf16.mxu0 %v13275_v34  ;;  %v13323_v34 = vld [vmem:[%s18314_s1 + $0x3c4] ss:$12 sps:$4 sm:$0xff]  }
 0x175   : > { %4886 = vmatprep.subr.bf16.mxu1 %v13278_v0  ;;  %v15771_v56 = vpop.f32.mrf.mxu1  ;;  %v13326_v0 = vld [vmem:[%s18314_s1 + $0x544] ss:$12 sps:$4 sm:$0xff]  }
 0x177   : > { %v3060_v61 = vpop.f32.mrf.mxu1  ;;  %4836 = vmatpush1.bf16.msra.mxu0 %v13273_v37 }
 0x178   : > { %4887 = vmatpush1.bf16.msra.mxu1 %v13276_v8  ;;  %4837 = vmatprep.subr.bf16.mxu0 %v13281_v39  ;;  %v13321_v8 = vld [vmem:[%s18314_s1 + $0x3c0] ss:$12 sps:$4 sm:$0xff]  }
 0x179   : > { %4888 = vmatprep.subr.bf16.mxu1 %v13284_v30  ;;  %v3061_v48 = vpop.f32.mrf.mxu1  ;;  %v13324_v39 = vld [vmem:[%s18314_s1 + $0x540] ss:$12 sps:$4 sm:$0xff]  }
 0x17a   : > { %v13330_v48 = vld [vmem:[%s18314_s1 + $0x7c8] ss:$12 sps:$4 sm:$0xff]  }
 0x17b   : > { %4838 = vmatpush2.bf16.msra.mxu0 %v13279_v46  ;;  %v13329_v46 = vld [vmem:[%s18314_s1 + $0x6ac] ss:$12 sps:$4 sm:$0xff]  }
 0x17c   : > { %4889 = vmatpush2.bf16.msra.mxu1 %v13282_v50  ;;  %4839 = vmatprep.subr.bf16.mxu0 %v13287_v42  ;;  %v13332_v50 = vld [vmem:[%s18314_s1 + $0x7cc] ss:$12 sps:$4 sm:$0xff]   ;;  %v13327_v42 = vld [vmem:[%s18314_s1 + $0x6a8] ss:$12 sps:$4 sm:$0xff]  }
 0x17d   : > { %4890 = vmatprep.subr.bf16.mxu1 %v13290_v21 }
 0x17f   : > { %4840 = vmatpush2.bf16.msra.mxu0 %v13285_v1 }
 0x180   : > { %4891 = vmatpush2.bf16.msra.mxu1 %v13288_v40  ;;  %4841 = vmatprep.subr.bf16.mxu0 %v13293_v2  ;;  %v13335_v40 = vld [vmem:[%s18314_s1 + $0x694] ss:$12 sps:$4 sm:$0xff]  }
 0x181   : > { %4892 = vmatprep.subr.bf16.mxu1 %v13296_v3  ;;  %v13338_v2 = vld [vmem:[%s18314_s1 + $0x7b4] ss:$12 sps:$4 sm:$0xff]  }
 0x183   : > { %4842 = vmatpush2.bf16.msra.mxu0 %v13291_v25  ;;  %v13333_v25 = vld [vmem:[%s18314_s1 + $0x690] ss:$12 sps:$4 sm:$0xff]  }
 0x184   : > { %4893 = vmatpush2.bf16.msra.mxu1 %v13294_v59  ;;  %4843 = vmatprep.subr.bf16.mxu0 %v13299_v47  ;;  %v14228_v47 = vld [vmem:[%s14605_s25 + $0x10] ss:$44 sps:$4 sm:$0xff]  }
 0x185   : > { %4894 = vmatprep.subr.bf16.mxu1 %v13302_v5  ;;  %v14229_v5 = vld [vmem:[%s14605_s25 + $0x18] ss:$44 sps:$4 sm:$0xff]  }
 0x187   : > { %4844 = vmatpush2.bf16.msra.mxu0 %v13297_v6  ;;  %v13336_v6 = vld [vmem:[%s18314_s1 + $0x7b0] ss:$12 sps:$4 sm:$0xff]  }
 0x188   : > { %4895 = vmatpush2.bf16.msra.mxu1 %v13300_v9  ;;  %4845 = vmatprep.subr.bf16.mxu0 %v13305_v31  ;;  %v13341_v31 = vld [vmem:[%s18314_s1 + $0x67c] ss:$12 sps:$4 sm:$0xff]  }
 0x189   : > { %4896 = vmatprep.subr.bf16.mxu1 %v13308_v14 }
 0x18b   : > { %v12250_v23 = vpop.f32.mrf.mxu1  ;;  %4846 = vmatpush2.bf16.msra.mxu0 %v13303_v17  ;;  %v13344_v17 = vld [vmem:[%s18314_s1 + $0x79c] ss:$12 sps:$4 sm:$0xff]  }
 0x18c   : > { %4897 = vmatpush2.bf16.msra.mxu1 %v13306_v52  ;;  %4847 = vmatprep.subr.bf16.mxu0 %v13311_v18 }
 0x18d   : > { %4898 = vmatprep.subr.bf16.mxu1 %v13314_v20  ;;  %v12251_v19 = vpop.f32.mrf.mxu1 }
 0x18e   : > { %v15848_v12 = vadd.f32 %v12251_v19, %v12250_v23 }
 0x18f   : > { %v15853_v53 = vpop.f32.mrf.mxu1  ;;  %4848 = vmatpush2.bf16.msra.mxu0 %v13309_v11  ;;  %v13342_v11 = vld [vmem:[%s18314_s1 + $0x798] ss:$12 sps:$4 sm:$0xff]  }
 0x190   : > { %4899 = vmatpush2.bf16.msra.mxu1 %v13312_v58  ;;  %4849 = vmatprep.subr.bf16.mxu0 %v13317_v24 }
 0x191   : > { %4900 = vmatprep.subr.bf16.mxu1 %v13320_v7  ;;  %v15861_v37 = vpop.f32.mrf.mxu1 }
 0x193   : > { %v12256_v30 = vpop.f32.mrf.mxu1  ;;  %4850 = vmatpush2.bf16.msra.mxu0 %v13315_v27 }
 0x194   : > { %4901 = vmatpush2.bf16.msra.mxu1 %v13318_v4  ;;  %4851 = vmatprep.subr.bf16.mxu0 %v13323_v34  ;;  %v13353_v4 = vld [vmem:[%s18314_s1 + $0x64c] ss:$12 sps:$4 sm:$0xff]   ;;  %v13354_v34 = vld [vmem:[%s18314_s1 + $0x170] ss:$12 sps:$4 sm:$0xff]  }
 0x195   : > { %4902 = vmatprep.subr.bf16.mxu1 %v13326_v0  ;;  %v12257_v61 = vpop.f32.mrf.mxu1 }
 0x196   : > { %v15878_v21 = vadd.f32 %v12257_v61, %v12256_v30  ;;  %v13355_v30 = vld [vmem:[%s18314_s1 + $0xb0] ss:$12 sps:$4 sm:$0xff]  }
 0x197   : > { %v12259_v1 = vpop.f32.mrf.mxu1  ;;  %4852 = vmatpush2.bf16.msra.mxu0 %v13321_v8  ;;  %v13351_v8 = vld [vmem:[%s18314_s1 + $0x648] ss:$12 sps:$4 sm:$0xff]  }
 0x198   : > { %4903 = vmatpush2.bf16.msra.mxu1 %v13324_v39  ;;  %4923 = vmatprep.subr.bf16.mxu0 %v13329_v46  ;;  %v14231_v1 = vld [vmem:[%s14605_s25 + $0x28] ss:$44 sps:$4 sm:$0xff]  }
 0x199   : > { %4982 = vmatprep.subr.bf16.mxu1 %v13332_v50  ;;  %v12260_v3 = vpop.f32.mrf.mxu1 }
 0x19a   : > { %v2995_v59 = vpop.f32.mrf.mxu0  ;;  %4854 = vmatmul.mubr.bf16.vlgmr.msra.gmra.mxu0 %v14228_v47  ;;  %v13364_v3 = vld [vmem:[%s18314_s1 + $0x140] ss:$12 sps:$4 sm:$0xff]  }
 0x19b   : > { %4905 = vmatmul.mubr.bf16.vlgmr.msra.gmra.mxu1 %v14229_v5  ;;  %v2996_v9 = vadd.f32 %v2995_v59, %v15666_v41  ;;  %4924 = vmatpush1.bf16.msra.mxu0 %v13327_v42  ;;  %v13339_v41 = vld [vmem:[%s18314_s1 + $0x678] ss:$12 sps:$4 sm:$0xff]   ;;  %v13356_v42 = vld [vmem:[%s18314_s1 + $0x630] ss:$12 sps:$4 sm:$0xff]   ;;  %v13365_v47 = vld [vmem:[%s18314_s1 + $0x80] ss:$12 sps:$4 sm:$0xff]  }
 0x19c   : > { %4983 = vmatpush1.bf16.msra.mxu1 %v13330_v48  ;;  %v2997_v14 = vpop.f32.mrf.mxu0  ;;  %4925 = vmatprep.subr.bf16.mxu0 %v13335_v40  ;;  %v13363_v40 = vld [vmem:[%s18314_s1 + $0x61c] ss:$12 sps:$4 sm:$0xff]   ;;  %v13361_v59 = vld [vmem:[%s18314_s1 + $0x618] ss:$12 sps:$4 sm:$0xff]  }
 0x19d   : > { %4984 = vmatprep.subr.bf16.mxu1 %v13338_v2  ;;  %v2998_v52 = vadd.f32 %v2997_v14, %v15674_v49  ;;  %4863 = vmatprep.mubr.bf16.mxu0 %v14820_v22  ;;  %v15911_v18 = vadd.f32 %v15731_v26, %v2996_v9  ;;  %v13347_v49 = vld [vmem:[%s18314_s1 + $0x664] ss:$12 sps:$4 sm:$0xff]  }
 0x19e   : > { %4914 = vmatprep.mubr.bf16.mxu1 %v14841_v32  ;;  %v2999_v20 = vpop.f32.mrf.mxu0  ;;  %v13350_v26 = vld [vmem:[%s18314_s1 + $0x784] ss:$12 sps:$4 sm:$0xff]  }
 0x19f   : > { %v3000_v58 = vadd.f32 %v2999_v20, %v15689_v43  ;;  %4926 = vmatpush1.bf16.msra.mxu0 %v13333_v25  ;;  %v15921_v23 = vadd.f32 %v15739_v29, %v2998_v52  ;;  %v13345_v43 = vld [vmem:[%s18314_s1 + $0x660] ss:$12 sps:$4 sm:$0xff]  }
 0x1a0   : > { %4985 = vmatpush1.bf16.msra.mxu1 %v13336_v6  ;;  %v15923_v24 = vpop.f32.mrf.mxu0  ;;  %4927 = vmatprep.subr.bf16.mxu0 %v13341_v31  ;;  %v13348_v29 = vld [vmem:[%s18314_s1 + $0x780] ss:$12 sps:$4 sm:$0xff]   ;;  %v13368_v6 = vld [vmem:[%s18314_s1 + $0x604] ss:$12 sps:$4 sm:$0xff]   ;;  %v13369_v31 = vld [vmem:[%s18314_s1 + $0x128] ss:$12 sps:$4 sm:$0xff]  }
 0x1a1   : > { %4986 = vmatprep.subr.bf16.mxu1 %v13344_v17  ;;  %v15932_v7 = vadd.f32 %v15747_v33, %v3000_v58  ;;  %v12255_v17 = vadd.f32 %v15861_v37, %v15853_v53  ;;  %v13374_v58 = vld [vmem:[%s18314_s1 + $0x110] ss:$12 sps:$4 sm:$0xff]   ;;  %v14232_v53 = vld [vmem:[%s14605_s25 + $0x80] ss:$0 sps:$4 sm:$0x77]  }
 0x1a2   : > { %v3005_v19 = vpop.f32.mrf.mxu0  ;;  %4864 = vmatmul.mubr.bf16.gmra.mxu0 %v14922_v10 }
 0x1a3   : > { %4915 = vmatmul.mubr.bf16.gmra.mxu1 %v14929_v15  ;;  %v3006_v27 = vadd.f32 %v3005_v19, %v15707_v55  ;;  %4928 = vmatpush1.bf16.msra.mxu0 %v13339_v41  ;;  %v14230_v55 = vld [vmem:[%s14605_s25 + $0x24] ss:$44 sps:$4 sm:$0xff]   ;;  %v13366_v41 = vld [vmem:[%s18314_s1 + $0x600] ss:$12 sps:$4 sm:$0xff]  }
 0x1a4   : > { %4987 = vmatpush1.bf16.msra.mxu1 %v13342_v11  ;;  %v3007_v33 = vpop.f32.mrf.mxu0  ;;  %4929 = vmatprep.subr.bf16.mxu0 %v13347_v49  ;;  %v13373_v11 = vld [vmem:[%s18314_s1 + $0x76c] ss:$12 sps:$4 sm:$0xff]   ;;  %v13375_v19 = vld [vmem:[%s18314_s1 + $0x50] ss:$12 sps:$4 sm:$0xff]  }
 0x1a5   : > { %4988 = vmatprep.subr.bf16.mxu1 %v13350_v26  ;;  %v3008_v0 = vadd.f32 %v3007_v33, %v15717_v63  ;;  %5006 = vmatprep.mubr.bf16.mxu1 %v14337_v28  ;;  %v15953_v39 = vadd.f32 %v15763_v38, %v3006_v27  ;;  %v13358_v63 = vld [vmem:[%s18314_s1 + $0x634] ss:$12 sps:$4 sm:$0xff]   ;;  %v13359_v38 = vld [vmem:[%s18314_s1 + $0x158] ss:$12 sps:$4 sm:$0xff]  }
 0x1a6   : > { %4955 = vmatprep.mubr.bf16.mxu0 %v14230_v55  ;;  %v3009_v46 = vpop.f32.mrf.mxu0  ;;  %v13378_v27 = vld [vmem:[%s18314_s1 + $0x754] ss:$12 sps:$4 sm:$0xff]   ;;  %v13380_v55 = vld [vmem:[%s18314_s1 + $0x38] ss:$12 sps:$4 sm:$0xff]  }
 0x1a7   : > { %4930 = vmatpush1.bf16.msra.mxu0 %v13345_v43  ;;  %v15962_v50 = vadd.f32 %v15771_v56, %v3008_v0  ;;  %v13360_v56 = vld [vmem:[%s18314_s1 + $0x98] ss:$12 sps:$4 sm:$0xff]   ;;  %v13371_v43 = vld [vmem:[%s18314_s1 + $0x768] ss:$12 sps:$4 sm:$0xff]  }
 0x1a8   : > { %4989 = vmatpush1.bf16.msra.mxu1 %v13348_v29  ;;  %4931 = vmatprep.subr.bf16.mxu0 %v13353_v4  ;;  %v3010_v61 = vpop.f32.mrf.mxu0  ;;  %v14233_v29 = vld [vmem:[%s14605_s25 + $0x4] ss:$44 sps:$4 sm:$0xff]   ;;  %v13383_v46 = vld [vmem:[%s18314_s1 + $0x73c] ss:$12 sps:$4 sm:$0xff]  }
 0x1a9   : > { %12380 = vmatprep.subr.bf16.mxu1 %v13354_v34  ;;  %v13379_v4 = vld [vmem:[%s18314_s1 + $0xf8] ss:$12 sps:$4 sm:$0xff]  }
 0x1aa   : > { %v13381_v61 = vld [vmem:[%s18314_s1 + $0x738] ss:$12 sps:$4 sm:$0xff]  }
 0x1ab   : > { %v12278_v48 = vpop.f32.mrf.mxu1  ;;  %11227 = vmatmul.mubr.msk.bf16.vlgmr.msra.gmra.mxu1 %vm2750_vm1, %v14231_v1  ;;  %4932 = vmatpush1.bf16.msra.mxu0 %v13351_v8  ;;  %v13376_v8 = vld [vmem:[%s18314_s1 + $0x750] ss:$12 sps:$4 sm:$0xff]  }
 0x1ac   : > { %12381 = vmatpush3.bf16.msra.mxu1 %v13355_v30  ;;  %4933 = vmatprep.subr.bf16.mxu0 %v13358_v63  ;;  %v13388_v1 = vld [vmem:[%s18314_s1 + $0x724] ss:$12 sps:$4 sm:$0xff]  }
 0x1ad   : > { %v12279_v2 = vpop.f32.mrf.mxu1  ;;  %12382 = vmatprep.subr.bf16.mxu1 %v13359_v38  ;;  %5016 = vmatprep.mubr.bf16.mxu1 %v14337_v28 }
 0x1ae   : > { %v12280_v25 = vadd.f32 %v12279_v2, %v12278_v48 }
 0x1af   : > { %v12281_v5 = vpop.f32.mrf.mxu1  ;;  %4934 = vmatpush1.bf16.msra.mxu0 %v13356_v42  ;;  %v13385_v42 = vld [vmem:[%s18314_s1 + $0x20] ss:$12 sps:$4 sm:$0xff]  }
 0x1b0   : > { %v3146_v9 = vadd.f32 %v12280_v25, %v15848_v12  ;;  %12383 = vmatpush3.bf16.msra.mxu1 %v13360_v56  ;;  %4935 = vmatprep.subr.bf16.mxu0 %v13363_v40  ;;  %v13370_v12 = vld [vmem:[%s18314_s1 + $0x68] ss:$12 sps:$4 sm:$0xff]   ;;  %v13386_v25 = vld [vmem:[%s18314_s1 + $0x720] ss:$12 sps:$4 sm:$0xff]  }
 0x1b1   : > { %v12282_v14 = vpop.f32.mrf.mxu1  ;;  %12384 = vmatprep.subr.bf16.mxu1 %v13364_v3  ;;  %v13389_v56 = vld [vmem:[%s18314_s1 + $0xc8] ss:$12 sps:$4 sm:$0xff]  }
 0x1b2   : > { %v12283_v52 = vadd.f32 %v12282_v14, %v12281_v5  ;;  %v13393_v5 = vld [vmem:[%s18314_s1 + $0x70c] ss:$12 sps:$4 sm:$0xff]  }
 0x1b3   : > { %v12284_v20 = vpop.f32.mrf.mxu1  ;;  %11228 = vmatmul.mubr.msk.bf16.gmra.mxu1 %vm2750_vm1, %v14232_v53  ;;  %4936 = vmatpush1.bf16.msra.mxu0 %v13361_v59  ;;  %v13390_v59 = vld [vmem:[%s18314_s1 + $0x8] ss:$12 sps:$4 sm:$0xff]   ;;  %v13396_v53 = vld [vmem:[%s18314_s1 + $0x6f0] ss:$12 sps:$4 sm:$0xff]  }
 0x1b4   : > { %v3149_v37 = vadd.f32 %v12283_v52, %v12255_v17  ;;  %12385 = vmatpush3.bf16.msra.mxu1 %v13365_v47  ;;  %4937 = vmatprep.subr.bf16.mxu0 %v13368_v6  ;;  %v13394_v6 = vld [vmem:[%s18314_s1 + $0x2f0] ss:$12 sps:$4 sm:$0xff]   ;;  %v13391_v17 = vld [vmem:[%s18314_s1 + $0x708] ss:$12 sps:$4 sm:$0xff]  }
 0x1b5   : > { %v12285_v49 = vpop.f32.mrf.mxu1  ;;  %12386 = vmatprep.subr.bf16.mxu1 %v13369_v31  ;;  %5057 = vmatprep.mubr.bf16.mxu1 %v14233_v29  ;;  %v13395_v52 = vld [vmem:[%s18314_s1 + $0x230] ss:$12 sps:$4 sm:$0xff]  }
 0x1b6   : > { %v12286_v26 = vadd.f32 %v12285_v49, %v12284_v20 }
 0x1b7   : > { %v12287_v33 = vpop.f32.mrf.mxu1  ;;  %4938 = vmatpush1.bf16.msra.mxu0 %v13366_v41  ;;  %v13398_v41 = vld [vmem:[%s18314_s1 + $0x6f4] ss:$12 sps:$4 sm:$0xff]  }
 0x1b8   : > { %v3154_v34 = vadd.f32 %v12286_v26, %v15878_v21  ;;  %12387 = vmatpush3.bf16.msra.mxu1 %v13370_v12  ;;  %4939 = vmatprep.subr.bf16.mxu0 %v13373_v11  ;;  %v13384_v21 = vld [vmem:[%s18314_s1 + $0xe0] ss:$12 sps:$4 sm:$0xff]   ;;  %v13399_v12 = vld [vmem:[%s18314_s1 + $0x2d8] ss:$12 sps:$4 sm:$0xff]  }
 0x1b9   : > { %12388 = vmatprep.subr.bf16.mxu1 %v13374_v58  ;;  %v12288_v0 = vpop.f32.mrf.mxu1  ;;  %v14234_v26 = vld [vmem:[%s14605_s25] ss:$44 sps:$4 sm:$0xff]  }
 0x1ba   : > { %v12306_v30 = vpop.f32.mrf.mxu0  ;;  %v13405_v33 = vld [vmem:[%s18314_s1 + $0x200] ss:$12 sps:$4 sm:$0xff]   ;;  %v13408_v0 = vld [vmem:[%s18314_s1 + $0x6c4] ss:$12 sps:$4 sm:$0xff]  }
 0x1bb   : > { %4940 = vmatpush2.bf16.msra.mxu0 %v13371_v43  ;;  %v13403_v43 = vld [vmem:[%s18314_s1 + $0x6dc] ss:$12 sps:$4 sm:$0xff]  }
 0x1bc   : > { %12389 = vmatpush3.bf16.msra.mxu1 %v13375_v19  ;;  %v12307_v63 = vpop.f32.mrf.mxu0  ;;  %4941 = vmatprep.subr.bf16.mxu0 %v13378_v27  ;;  %v13404_v19 = vld [vmem:[%s18314_s1 + $0x2c0] ss:$12 sps:$4 sm:$0xff]  }
 0x1bd   : > { %12390 = vmatprep.subr.bf16.mxu1 %v13379_v4  ;;  %v12308_v38 = vadd.f32 %v12307_v63, %v12306_v30  ;;  %v13401_v4 = vld [vmem:[%s18314_s1 + $0x6d8] ss:$12 sps:$4 sm:$0xff]  }
 0x1be   : > { %v12309_v48 = vpop.f32.mrf.mxu0 }
 0x1bf   : > { %v3194_v40 = vadd.f32 %v12308_v38, %v3146_v9  ;;  %4942 = vmatpush2.bf16.msra.mxu0 %v13376_v8  ;;  %v13409_v8 = vld [vmem:[%s18314_s1 + $0x2a8] ss:$12 sps:$4 sm:$0xff]   ;;  %v13411_v38 = vld [vmem:[%s18314_s1 + $0x290] ss:$12 sps:$4 sm:$0xff]  }
 0x1c0   : > { %12391 = vmatpush3.bf16.msra.mxu1 %v13380_v55  ;;  %v12310_v2 = vpop.f32.mrf.mxu0  ;;  %4943 = vmatprep.subr.bf16.mxu0 %v13383_v46  ;;  %v13406_v46 = vld [vmem:[%s18314_s1 + $0x6c0] ss:$12 sps:$4 sm:$0xff]  }
 0x1c1   : > { %12392 = vmatprep.subr.bf16.mxu1 %v13384_v21  ;;  %v12311_v3 = vadd.f32 %v12310_v2, %v12309_v48  ;;  %v13410_v21 = vld [vmem:[%s18314_s1 + $0x1e8] ss:$12 sps:$4 sm:$0xff]  }
 0x1c2   : > { %v12312_v47 = vpop.f32.mrf.mxu0 }
 0x1c3   : > { %v3197_v9 = vadd.f32 %v12311_v3, %v3149_v37  ;;  %4944 = vmatpush2.bf16.msra.mxu0 %v13381_v61  ;;  %v13400_v37 = vld [vmem:[%s18314_s1 + $0x218] ss:$12 sps:$4 sm:$0xff]   ;;  %v13412_v61 = vld [vmem:[%s18314_s1 + $0x470] ss:$12 sps:$4 sm:$0xff]  }
 0x1c4   : > { %12393 = vmatpush3.bf16.msra.mxu1 %v13385_v42  ;;  %v12313_v31 = vpop.f32.mrf.mxu0  ;;  %4945 = vmatprep.subr.bf16.mxu0 %v13388_v1  ;;  %v13415_v3 = vld [vmem:[%s18314_s1 + $0x278] ss:$12 sps:$4 sm:$0xff]  }
 0x1c5   : > { %12394 = vmatprep.subr.bf16.mxu1 %v13389_v56  ;;  %v12314_v14 = vadd.f32 %v12313_v31, %v12312_v47  ;;  %v13413_v56 = vld [vmem:[%s18314_s1 + $0x1d0] ss:$12 sps:$4 sm:$0xff]   ;;  %v16132_v31 = vld [vmem:[%s14605_s25 + $0x20] ss:$44 sps:$4 sm:$0xff]  }
 0x1c6   : > { %v12315_v20 = vpop.f32.mrf.mxu0 }
 0x1c7   : > { %v3202_v11 = vadd.f32 %v12314_v14, %v3154_v34  ;;  %4946 = vmatpush2.bf16.msra.mxu0 %v13386_v25  ;;  %v13416_v25 = vld [vmem:[%s18314_s1 + $0x458] ss:$12 sps:$4 sm:$0xff]  }
 0x1c8   : > { %12395 = vmatpush3.bf16.msra.mxu1 %v13390_v59  ;;  %4947 = vmatprep.subr.bf16.mxu0 %v13393_v5  ;;  %v12316_v58 = vpop.f32.mrf.mxu0  ;;  %v13417_v5 = vld [vmem:[%s18314_s1 + $0x1b8] ss:$12 sps:$4 sm:$0xff]  }
 0x1c9   : > { %12408 = vmatprep.subr.bf16.mxu1 %v13394_v6  ;;  %v13418_v6 = vld [vmem:[%s18314_s1 + $0x398] ss:$12 sps:$4 sm:$0xff]   ;;  %v13422_v58 = vld [vmem:[%s18314_s1 + $0x380] ss:$12 sps:$4 sm:$0xff]  }
 0x1cb   : > { %v12334_v49 = vpop.f32.mrf.mxu1  ;;  %5058 = vmatmul.mubr.bf16.vlgmr.msra.gmra.mxu1 %v14234_v26  ;;  %4948 = vmatpush2.bf16.msra.mxu0 %v13391_v17  ;;  %v13419_v17 = vld [vmem:[%s18314_s1 + $0x260] ss:$12 sps:$4 sm:$0xff]   ;;  %v13424_v26 = vld [vmem:[%s18314_s1 + $0x428] ss:$12 sps:$4 sm:$0xff]  }
 0x1cc   : > { %12409 = vmatpush3.bf16.msra.mxu1 %v13395_v52  ;;  %4949 = vmatprep.subr.bf16.mxu0 %v13398_v41  ;;  %v13420_v52 = vld [vmem:[%s18314_s1 + $0x440] ss:$12 sps:$4 sm:$0xff]  }
 0x1cd   : > { %v12335_v29 = vpop.f32.mrf.mxu1  ;;  %12410 = vmatprep.subr.bf16.mxu1 %v13399_v12  ;;  %5065 = vmatprep.mubr.bf16.mxu1 %v14621_v51 }
 0x1ce   : > { %v12336_v27 = vadd.f32 %v12335_v29, %v12334_v49  ;;  %v13423_v49 = vld [vmem:[%s18314_s1 + $0x248] ss:$12 sps:$4 sm:$0xff]  }
 0x1cf   : > { %v12337_v34 = vpop.f32.mrf.mxu1  ;;  %4950 = vmatpush2.bf16.msra.mxu0 %v13396_v53 }
 0x1d0   : > { %v3242_v55 = vadd.f32 %v12336_v27, %v3194_v40  ;;  %12411 = vmatpush3.bf16.msra.mxu1 %v13400_v37  ;;  %4951 = vmatprep.subr.bf16.mxu0 %v13403_v43  ;;  %v14235_v40 = vld [vmem:[%s14605_s25 + $0xc] ss:$44 sps:$4 sm:$0xff]  }
 0x1d1   : > { %v12338_v51 = vpop.f32.mrf.mxu1  ;;  %12412 = vmatprep.subr.bf16.mxu1 %v13404_v19 }
 0x1d2   : > { %v12339_v30 = vadd.f32 %v12338_v51, %v12337_v34 }
 0x1d3   : > { %v12340_v63 = vpop.f32.mrf.mxu1  ;;  %5066 = vmatmul.mubr.bf16.gmra.mxu1 %v14658_v13  ;;  %4952 = vmatpush2.bf16.msra.mxu0 %v13401_v4  ;;  %v13414_v13 = vld [vmem:[%s18314_s1 + $0x3b0] ss:$12 sps:$4 sm:$0xff]   ;;  %v13425_v4 = vld [vmem:[%s18314_s1 + $0x188] ss:$12 sps:$4 sm:$0xff]  }
 0x1d4   : > { %v3245_v42 = vadd.f32 %v12339_v30, %v3197_v9  ;;  %12413 = vmatpush3.bf16.msra.mxu1 %v13405_v33  ;;  %4953 = vmatprep.subr.bf16.mxu0 %v13408_v0  ;;  %v13426_v33 = vld [vmem:[%s18314_s1 + $0x368] ss:$12 sps:$4 sm:$0xff]  }
 0x1d5   : > { %v12341_v48 = vpop.f32.mrf.mxu1  ;;  %12414 = vmatprep.subr.bf16.mxu1 %v13409_v8  ;;  %5105 = vmatprep.mubr.bf16.mxu1 %v14235_v40  ;;  %v13427_v8 = vld [vmem:[%s18314_s1 + $0x410] ss:$12 sps:$4 sm:$0xff]   ;;  %v13433_v40 = vld [vmem:[%s18314_s1 + $0x338] ss:$12 sps:$4 sm:$0xff]  }
 0x1d6   : > { %v12342_v1 = vadd.f32 %v12341_v48, %v12340_v63  ;;  %v13429_v63 = vld [vmem:[%s18314_s1 + $0x350] ss:$12 sps:$4 sm:$0xff]   ;;  %v13432_v48 = vld [vmem:[%s18314_s1 + $0x5d8] ss:$12 sps:$4 sm:$0xff]  }
 0x1d7   : > { %v12343_v2 = vpop.f32.mrf.mxu1  ;;  %4954 = vmatpush2.bf16.msra.mxu0 %v13406_v46 }
 0x1d8   : > { %v3250_v59 = vadd.f32 %v12342_v1, %v3202_v11  ;;  %12415 = vmatpush3.bf16.msra.mxu1 %v13410_v21  ;;  %12436 = vmatprep.subr.bf16.mxu0 %v13412_v61  ;;  %v13421_v11 = vld [vmem:[%s18314_s1 + $0x1a0] ss:$12 sps:$4 sm:$0xff]   ;;  %v13434_v2 = vld [vmem:[%s18314_s1 + $0x518] ss:$12 sps:$4 sm:$0xff]  }
 0x1d9   : > { %12416 = vmatprep.subr.bf16.mxu1 %v13411_v38  ;;  %v12344_v47 = vpop.f32.mrf.mxu1  ;;  %v13430_v38 = vld [vmem:[%s18314_s1 + $0x530] ss:$12 sps:$4 sm:$0xff]   ;;  %v14237_v61 = vld [vmem:[%s14605_s25 + $0x14] ss:$44 sps:$4 sm:$0xff]  }
 0x1da   : > { %v12362_v9 = vpop.f32.mrf.mxu0  ;;  %4956 = vmatmul.mubr.bf16.vlgmr.msra.gmra.mxu0 %v16132_v31  ;;  %v13436_v47 = vld [vmem:[%s18314_s1 + $0x5c0] ss:$12 sps:$4 sm:$0xff]  }
 0x1db   : > { %v12648_v14 = vpop.f32.mrf.mxu1  ;;  %12437 = vmatpush3.bf16.msra.mxu0 %v13414_v13  ;;  %4965 = vmatprep.mubr.bf16.mxu0 %v15073_v44 }
 0x1dc   : > { %12417 = vmatpush3.bf16.msra.mxu1 %v13413_v56  ;;  %v12363_v41 = vpop.f32.mrf.mxu0  ;;  %12438 = vmatprep.subr.bf16.mxu0 %v13416_v25  ;;  %v14238_v25 = vld [vmem:[%s14605_s25 + $0x8] ss:$44 sps:$4 sm:$0xff]  }
 0x1dd   : > { %12418 = vmatprep.subr.bf16.mxu1 %v13415_v3  ;;  %v3337_v12 = vpop.f32.mrf.mxu1  ;;  %v12364_v20 = vadd.f32 %v12363_v41, %v12362_v9  ;;  %v13439_v9 = vld [vmem:[%s18314_s1 + $0x3c8] ss:$12 sps:$4 sm:$0xff]   ;;  %v13444_v41 = vld [vmem:[%s18314_s1 + $0x770] ss:$12 sps:$4 sm:$0xff]  }
 0x1de   : > { %v12365_v53 = vpop.f32.mrf.mxu0 }
 0x1df   : > { %v12649_v37 = vpop.f32.mrf.mxu1  ;;  %12439 = vmatpush3.bf16.msra.mxu0 %v13418_v6  ;;  %v3290_v43 = vadd.f32 %v12364_v20, %v3242_v55  ;;  %v13428_v55 = vld [vmem:[%s18314_s1 + $0x5f0] ss:$12 sps:$4 sm:$0xff]   ;;  %v13438_v6 = vld [vmem:[%s18314_s1 + $0x500] ss:$12 sps:$4 sm:$0xff]  }
 0x1e0   : > { %12419 = vmatpush3.bf16.msra.mxu1 %v13417_v5  ;;  %v12366_v19 = vpop.f32.mrf.mxu0  ;;  %12440 = vmatprep.subr.bf16.mxu0 %v13420_v52  ;;  %v13437_v5 = vld [vmem:[%s18314_s1 + $0x320] ss:$12 sps:$4 sm:$0xff]   ;;  %v13443_v52 = vld [vmem:[%s18314_s1 + $0x590] ss:$12 sps:$4 sm:$0xff]   ;;  %v13450_v37 = vld [vmem:[%s18314_s1 + $0x698] ss:$12 sps:$4 sm:$0xff]  }
 0x1e1   : > { %12420 = vmatprep.subr.bf16.mxu1 %v13419_v17  ;;  %v12367_v29 = vadd.f32 %v12366_v19, %v12365_v53  ;;  %v16154_v27 = vadd.f32 %v3337_v12, %v3290_v43  ;;  %v3340_v0 = vpop.f32.mrf.mxu1  ;;  %v13442_v17 = vld [vmem:[%s18314_s1 + $0x4e8] ss:$12 sps:$4 sm:$0xff]   ;;  %v13445_v12 = vld [vmem:[%s18314_s1 + $0x4d0] ss:$12 sps:$4 sm:$0xff]   ;;  %v13449_v53 = vld [vmem:[%s18314_s1 + $0x4b8] ss:$12 sps:$4 sm:$0xff]  }
 0x1e2   : > { %v12368_v34 = vpop.f32.mrf.mxu0  ;;  %4966 = vmatmul.mubr.bf16.gmra.mxu0 %v15185_v60  ;;  %v14239_v20 = vld [vmem:[%s14605_s25 + $0x1c] ss:$44 sps:$4 sm:$0xff]   ;;  %v13452_v43 = vld [vmem:[%s18314_s1 + $0x740] ss:$12 sps:$4 sm:$0xff]  }
 0x1e3   : > { %12441 = vmatpush3.bf16.msra.mxu0 %v13422_v58  ;;  %v3293_v51 = vadd.f32 %v12367_v29, %v3245_v42  ;;  %5153 = vmatprep.mubr.bf16.mxu0 %v14237_v61  ;;  %v13431_v42 = vld [vmem:[%s18314_s1 + $0x3f8] ss:$12 sps:$4 sm:$0xff]   ;;  %v13453_v19 = vld [vmem:[%s18314_s1 + $0x4a0] ss:$12 sps:$4 sm:$0xff]   ;;  %v13466_v61 = vld [vmem:[%s18314_s1 + $0x608] ss:$12 sps:$4 sm:$0xff]  }
 0x1e4   : > { %12421 = vmatpush3.bf16.msra.mxu1 %v13421_v11  ;;  %v12369_v30 = vpop.f32.mrf.mxu0  ;;  %12442 = vmatprep.subr.bf16.mxu0 %v13424_v26  ;;  %v13447_v11 = vld [vmem:[%s18314_s1 + $0x578] ss:$12 sps:$4 sm:$0xff]   ;;  %v13451_v26 = vld [vmem:[%s18314_s1 + $0x560] ss:$12 sps:$4 sm:$0xff]  }
 0x1e5   : > { %12422 = vmatprep.subr.bf16.mxu1 %v13423_v49  ;;  %v12370_v46 = vadd.f32 %v12369_v30, %v12368_v34  ;;  %v16169_v21 = vadd.f32 %v3340_v0, %v3293_v51  ;;  %v13448_v58 = vld [vmem:[%s18314_s1 + $0x758] ss:$12 sps:$4 sm:$0xff]   ;;  %v14240_v49 = vld [vmem:[%s14605_s25 + $0x10] ss:$44 sps:$4 sm:$0xff]   ;;  %v13454_v29 = vld [vmem:[%s18314_s1 + $0x680] ss:$12 sps:$4 sm:$0xff]  }
 0x1e6   : > { %v12371_v1 = vpop.f32.mrf.mxu0  ;;  %v13458_v34 = vld [vmem:[%s18314_s1 + $0x668] ss:$12 sps:$4 sm:$0xff]   ;;  %v13459_v0 = vld [vmem:[%s18314_s1 + $0x710] ss:$12 sps:$4 sm:$0xff]   ;;  %v13461_v51 = vld [vmem:[%s18314_s1 + $0x6f8] ss:$12 sps:$4 sm:$0xff]  }
 0x1e7   : > { %v3298_v56 = vadd.f32 %v12370_v46, %v3250_v59  ;;  %12443 = vmatpush3.bf16.msra.mxu0 %v13426_v33  ;;  %v13435_v59 = vld [vmem:[%s18314_s1 + $0x3e0] ss:$12 sps:$4 sm:$0xff]   ;;  %v13456_v33 = vld [vmem:[%s18314_s1 + $0x728] ss:$12 sps:$4 sm:$0xff]   ;;  %v14242_v30 = vld [vmem:[%s14605_s25 + $0x18] ss:$44 sps:$4 sm:$0xff]  }
 0x1e8   : > { %12423 = vmatpush3.bf16.msra.mxu1 %v13425_v4  ;;  %12444 = vmatprep.subr.bf16.mxu0 %v13427_v8  ;;  %v12372_v13 = vpop.f32.mrf.mxu0  ;;  %v13455_v4 = vld [vmem:[%s18314_s1 + $0x548] ss:$12 sps:$4 sm:$0xff]   ;;  %v13460_v8 = vld [vmem:[%s18314_s1 + $0x650] ss:$12 sps:$4 sm:$0xff]   ;;  %v13463_v46 = vld [vmem:[%s18314_s1 + $0x6e0] ss:$12 sps:$4 sm:$0xff]  }
 0x1e9   : > { %12464 = vmatprep.subr.bf16.mxu1 %v13428_v55  ;;  %v16190_v3 = vadd.f32 %v12648_v14, %v3298_v56  ;;  %v13440_v14 = vld [vmem:[%s18314_s1 + $0x5a8] ss:$12 sps:$4 sm:$0xff]   ;;  %v14241_v55 = vld [vmem:[%s14605_s25 + $0x24] ss:$44 sps:$4 sm:$0xff]  }
 0x1eb   : > { %5106 = vmatmul.mubr.bf16.vlgmr.msra.gmra.mxu1 %v14238_v25  ;;  %12445 = vmatpush3.bf16.msra.mxu0 %v13429_v63  ;;  %v13464_v63 = vld [vmem:[%s18314_s1 + $0x620] ss:$12 sps:$4 sm:$0xff]  }
 0x1ec   : > { %12465 = vmatpush3.bf16.msra.mxu1 %v13430_v38  ;;  %12446 = vmatprep.subr.bf16.mxu0 %v13431_v42  ;;  %v13465_v38 = vld [vmem:[%s18314_s1 + $0x6c8] ss:$12 sps:$4 sm:$0xff]   ;;  %v13468_v42 = vld [vmem:[%s18314_s1 + $0x7b8] ss:$12 sps:$4 sm:$0xff]  }
 0x1ed   : > { %12466 = vmatprep.subr.bf16.mxu1 %v13432_v48  ;;  %5113 = vmatprep.mubr.bf16.mxu1 %v14628_v57  ;;  %v13441_v57 = vld [vmem:[%s18314_s1 + $0x308] ss:$12 sps:$4 sm:$0xff]  }
 0x1ef   : > { %12447 = vmatpush3.bf16.msra.mxu0 %v13433_v40  ;;  %v13469_v40 = vld [vmem:[%s18314_s1 + $0x7a0] ss:$12 sps:$4 sm:$0xff]  }
 0x1f0   : > { %12467 = vmatpush3.bf16.msra.mxu1 %v13434_v2  ;;  %12448 = vmatprep.subr.bf16.mxu0 %v13435_v59 }
 0x1f1   : > { %12468 = vmatprep.subr.bf16.mxu1 %v13436_v47 }
 0x1f3   : > { %5114 = vmatmul.mubr.bf16.gmra.mxu1 %v14663_v16  ;;  %12449 = vmatpush3.bf16.msra.mxu0 %v13437_v5  ;;  %v13446_v16 = vld [vmem:[%s18314_s1 + $0x6b0] ss:$12 sps:$4 sm:$0xff]  }
 0x1f4   : > { %12469 = vmatpush3.bf16.msra.mxu1 %v13438_v6  ;;  %12450 = vmatprep.subr.bf16.mxu0 %v13439_v9 }
 0x1f5   : > { %12470 = vmatprep.subr.bf16.mxu1 %v13440_v14  ;;  %5201 = vmatprep.mubr.bf16.mxu1 %v14239_v20 }
 0x1f7   : > { %12451 = vmatpush3.bf16.msra.mxu0 %v13441_v57 }
 0x1f8   : > { %12471 = vmatpush3.bf16.msra.mxu1 %v13442_v17  ;;  %12492 = vmatprep.subr.bf16.mxu0 %v13444_v41  ;;  %v14243_v17 = vld [vmem:[%s14605_s25 + $0x28] ss:$44 sps:$4 sm:$0xff]  }
 0x1f9   : > { %12472 = vmatprep.subr.bf16.mxu1 %v13443_v52 }
 0x1fa   : > { %5154 = vmatmul.mubr.bf16.vlgmr.msra.gmra.mxu0 %v14240_v49 }
 0x1fb   : > { %12493 = vmatpush3.bf16.msra.mxu0 %v13446_v16  ;;  %5161 = vmatprep.mubr.bf16.mxu0 %v14820_v22  ;;  %v13457_v22 = vld [vmem:[%s18314_s1 + $0x488] ss:$12 sps:$4 sm:$0xff]  }
 0x1fc   : > { %12473 = vmatpush3.bf16.msra.mxu1 %v13445_v12  ;;  %12494 = vmatprep.subr.bf16.mxu0 %v13448_v58 }
 0x1fd   : > { %12474 = vmatprep.subr.bf16.mxu1 %v13447_v11 }
 0x1ff   : > { %12495 = vmatpush3.bf16.msra.mxu0 %v13450_v37 }
 0x200   : > { %12475 = vmatpush3.bf16.msra.mxu1 %v13449_v53  ;;  %12496 = vmatprep.subr.bf16.mxu0 %v13452_v43  ;;  %v14244_v53 = vld [vmem:[%s14605_s25 + $0x80] ss:$0 sps:$4 sm:$0x77]   ;;  %s10555_s25 = scalar_lea.sflag [#allocation3], %s18229_s23 }
 0x201   : > { %12476 = vmatprep.subr.bf16.mxu1 %v13451_v26 }
 0x202   : > { %5162 = vmatmul.mubr.bf16.gmra.mxu0 %v14922_v10  ;;  %v13462_v10 = vld [vmem:[%s18314_s1 + $0x638] ss:$12 sps:$4 sm:$0xff]  }
 0x203   : > { %12497 = vmatpush3.bf16.msra.mxu0 %v13454_v29  ;;  %5249 = vmatprep.mubr.bf16.mxu0 %v14241_v55 }
 0x204   : > { %12477 = vmatpush3.bf16.msra.mxu1 %v13453_v19  ;;  %12498 = vmatprep.subr.bf16.mxu0 %v13456_v33 }
 0x205   : > { %12478 = vmatprep.subr.bf16.mxu1 %v13455_v4 }
 0x207   : > { %12499 = vmatpush3.bf16.msra.mxu0 %v13458_v34 }
 0x208   : > { %12479 = vmatpush3.bf16.msra.mxu1 %v13457_v22  ;;  %12500 = vmatprep.subr.bf16.mxu0 %v13459_v0 }
 0x20b   : > { %5202 = vmatmul.mubr.bf16.vlgmr.msra.gmra.mxu1 %v14242_v30  ;;  %12501 = vmatpush3.bf16.msra.mxu0 %v13460_v8 }
 0x20c   : > { %5209 = vmatprep.mubr.bf16.mxu1 %v14841_v32  ;;  %12502 = vmatprep.subr.bf16.mxu0 %v13461_v51  ;;  %v13467_v32 = vld [vmem:[%s18314_s1 + $0x7d0] ss:$12 sps:$4 sm:$0xff]  }
 0x20f   : > { %12503 = vmatpush3.bf16.msra.mxu0 %v13462_v10 }
 0x210   : > { %12504 = vmatprep.subr.bf16.mxu0 %v13463_v46 }
 0x213   : > { %5210 = vmatmul.mubr.bf16.gmra.mxu1 %v14929_v15  ;;  %12505 = vmatpush3.bf16.msra.mxu0 %v13464_v63 }
 0x214   : > { %5407 = vmatprep.mubr.bf16.mxu1 %v14337_v28  ;;  %12506 = vmatprep.subr.bf16.mxu0 %v13465_v38 }
 0x217   : > { %12507 = vmatpush3.bf16.msra.mxu0 %v13466_v61 }
 0x218   : > { %12650 = vmatprep.subr.bf16.mxu0 %v13467_v32 }
 0x21a   : > { %v4753_v48 = vpop.f32.mrf.mxu0  ;;  %5250 = vmatmul.mubr.bf16.vlgmr.msra.gmra.mxu0 %v16132_v31 }
 0x21b   : > { %v4804_v1 = vpop.f32.mrf.mxu1  ;;  %v4754_v15 = vadd.f32 %v4753_v48, %v15911_v18  ;;  %12651 = vmatpush3.bf16.msra.mxu0 %v13467_v32  ;;  %5257 = vmatprep.mubr.bf16.mxu0 %v15073_v44  ;;  %v13470_v18 = vld [vmem:[%s18314_s1 + $0x788] ss:$12 sps:$4 sm:$0xff]  }
 0x21c   : > { %v4755_v56 = vpop.f32.mrf.mxu0  ;;  %12652 = vmatprep.subr.bf16.mxu0 %v13468_v42 }
 0x21d   : > { %v4806_v13 = vpop.f32.mrf.mxu1  ;;  %v4756_v2 = vadd.f32 %v4755_v56, %v15921_v23  ;;  %v4805_v25 = vadd.f32 %v4804_v1, %v4754_v15 }
 0x21e   : > { %v4757_v59 = vpop.f32.mrf.mxu0 }
 0x21f   : > { %v4808_v47 = vpop.f32.mrf.mxu1  ;;  %v4758_v31 = vadd.f32 %v4757_v59, %v15932_v7  ;;  %v4807_v44 = vadd.f32 %v4806_v13, %v4756_v2  ;;  %12653 = vmatpush3.bf16.msra.mxu0 %v13468_v42  ;;  %v14338_v59 = vmov 0.0  }
 0x220   : > { %v4759_v5 = vpop.f32.mrf.mxu0  ;;  %12654 = vmatprep.subr.bf16.mxu0 %v13469_v40 }
 0x221   : > { %v4810_v6 = vpop.f32.mrf.mxu1  ;;  %v4809_v9 = vadd.f32 %v4808_v47, %v4758_v31 }
 0x222   : > { %v4763_v14 = vpop.f32.mrf.mxu0  ;;  %5258 = vmatmul.mubr.bf16.gmra.mxu0 %v15185_v60 }
 0x223   : > { %v4814_v23 = vpop.f32.mrf.mxu1  ;;  %v4764_v57 = vadd.f32 %v4763_v14, %v15953_v39  ;;  %12655 = vmatpush3.bf16.msra.mxu0 %v13469_v40  ;;  %12658 = vmatprep.mubr.msk.bf16.mxu0 %vm2750_vm1, %v14243_v17  ;;  %v2849_v39 = vadd.f32 %v15468_v45, %v15466_v36 }
 0x224   : > { %v4765_v52 = vpop.f32.mrf.mxu0  ;;  %12656 = vmatprep.subr.bf16.mxu0 %v13470_v18 }
 0x225   : > { %v4816_v41 = vpop.f32.mrf.mxu1  ;;  %v4766_v7 = vadd.f32 %v4765_v52, %v15962_v50  ;;  %v4815_v12 = vadd.f32 %v4814_v23, %v4764_v57  ;;  %v2900_v37 = vadd.f32 %v15679_v62, %v2849_v39  ;;  %v5315_v57 = vlaneseq }
 0x226   : > { %v4767_v16 = vpop.f32.mrf.mxu0 }
 0x227   : > { %v4818_v20 = vpop.f32.mrf.mxu1  ;;  %v16322_v11 = vadd.f32 %v4816_v41, %v4766_v7  ;;  %12657 = vmatpush3.bf16.msra.mxu0 %v13470_v18  ;;  %v2951_v49 = vadd.f32 %v15681_v54, %v2900_v37 }
 0x228   : > { %v4768_v60 = vpop.f32.mrf.mxu0  ;;  %12662 = vmatprep.subr.bf16.mxu0 %v14338_v59 }
 0x229   : > { %v4819_v58 = vpop.f32.mrf.mxu1  ;;  %v3002_v50 = vadd.f32 %v15923_v24, %v2951_v49 }
 0x22a   : > { %12659 = vmatmul.mubr.msk.bf16.vlgmr.msra.gmra.mxu0 %vm2750_vm1, %v14244_v53  ;;  %v16352_v53 = vld [vmem:[%s18316_s3] sm:$0x7] }
 0x22b   : > { %v3053_v26 = vadd.f32 %v15755_v35, %v3002_v50  ;;  %12666 = vmatprep.mubr.msk.bf16.mxu0 %vm14339_vm2, %v14338_v59 }
 0x22d   : > { %v4760_v29 = vadd.f32 %v4759_v5, %v3053_v26 }
 0x22f   : > { %v4811_v51 = vadd.f32 %v4810_v6, %v4760_v29 }
 0x25a   : > { %v4855_v43 = vpop.f32.mrf.mxu0 }
 0x25b   : > { %v4906_v19 = vpop.f32.mrf.mxu1  ;;  %v4856_v4 = vadd.f32 %v4855_v43, %v4805_v25 }
 0x25c   : > { %v4857_v33 = vpop.f32.mrf.mxu0 }
 0x25d   : > { %v4908_v22 = vpop.f32.mrf.mxu1  ;;  %v4858_v34 = vadd.f32 %v4857_v33, %v4807_v44  ;;  %v4907_v0 = vadd.f32 %v4906_v19, %v4856_v4 }
 0x25e   : > { %v4859_v8 = vpop.f32.mrf.mxu0 }
 0x25f   : > { %v4910_v55 = vpop.f32.mrf.mxu1  ;;  %v4860_v36 = vadd.f32 %v4859_v8, %v4809_v9  ;;  %v4909_v45 = vadd.f32 %v4908_v22, %v4858_v34 }
 0x260   : > { %v4861_v62 = vpop.f32.mrf.mxu0 }
 0x261   : > { %v4912_v10 = vpop.f32.mrf.mxu1  ;;  %v4862_v54 = vadd.f32 %v4861_v62, %v4811_v51  ;;  %v4911_v30 = vadd.f32 %v4910_v55, %v4860_v36 }
 0x262   : > { %v4865_v24 = vpop.f32.mrf.mxu0 }
 0x263   : > { %v4916_v46 = vpop.f32.mrf.mxu1  ;;  %v4866_v35 = vadd.f32 %v4865_v24, %v4815_v12  ;;  %v4913_v63 = vadd.f32 %v4912_v10, %v4862_v54  ;;  %v16341_v12 = vshrl.u32 %v5315_v57, 7 }
 0x264   : > { %v4867_v38 = vpop.f32.mrf.mxu0 }
 0x265   : > { %v4918_v61 = vpop.f32.mrf.mxu1  ;;  %v4917_v32 = vadd.f32 %v4916_v46, %v4866_v35  ;;  %v16347_v58 = vsub.s32 0, %v16341_v12  ;;  %v4868_v29 = vadd.f32 %v4867_v38, %v16322_v11 }
 0x266   : > { %v4869_v48 = vpop.f32.mrf.mxu0 }
 0x267   : > { %v4920_v42 = vpop.f32.mrf.mxu1  ;;  %v5318_v49 = vrot.slane %v16352_v53, %v16347_v58  ;;  %v4919_v36 = vadd.f32 %v4918_v61, %v4868_v29  ;;  %v13484_v29 = vld [vmem:[%s18318_s5 + $0x244] ss:$12 sps:$4 sm:$0xff]  }
 0x268   : > { %v4870_v15 = vpop.f32.mrf.mxu0 }
 0x269   : > { %v4921_v1 = vpop.f32.mrf.mxu1 }
 0x26b   : > { %v5008_v56 = vpop.f32.mrf.mxu1 }
 0x26d   : > { %v5010_v13 = vpop.f32.mrf.mxu1 }
 0x26f   : > { %v5012_v40 = vpop.f32.mrf.mxu1 }
 0x271   : > { %v5014_v2 = vpop.f32.mrf.mxu1 }
 0x273   : > { %v5018_v25 = vpop.f32.mrf.mxu1 }
 0x275   : > { %v5020_v47 = vpop.f32.mrf.mxu1 }
 0x277   : > { %v5022_v18 = vpop.f32.mrf.mxu1 }
 0x279   : > { %v5023_v31 = vpop.f32.mrf.mxu1 }
 0x28b   : > { %v12396_v44 = vpop.f32.mrf.mxu1 }
 0x28d   : > { %v12397_v5 = vpop.f32.mrf.mxu1 }
 0x28e   : > { %v12398_v6 = vadd.f32 %v12397_v5, %v12396_v44 }
 0x28f   : > { %v12399_v9 = vpop.f32.mrf.mxu1 }
 0x290   : > { %v16336_v14 = vadd.f32 %v12398_v6, %v16154_v27 }
 0x291   : > { %v12400_v23 = vpop.f32.mrf.mxu1 }
 0x292   : > { %v12401_v17 = vadd.f32 %v12400_v23, %v12399_v9  ;;  %v16388_v9 = vld [vmem:[%s18317_s4] sm:$0x1f]  }
 0x293   : > { %v12402_v52 = vpop.f32.mrf.mxu1 }
 0x294   : > { %v16339_v41 = vadd.f32 %v12401_v17, %v16169_v21  ;;  %v16355_v21 = vsub.s32 1, %v16341_v12 }
 0x295   : > { %v12403_v7 = vpop.f32.mrf.mxu1 }
 0x296   : > { %v12404_v16 = vadd.f32 %v12403_v7, %v12402_v52  ;;  %v5322_v43 = vrot.slane %v16352_v53, %v16355_v21  ;;  %v13475_v52 = vld [vmem:[%s18318_s5 + $0x28c] ss:$12 sps:$4 sm:$0xff]  }
 0x297   : > { %v12405_v20 = vpop.f32.mrf.mxu1 }
 0x298   : > { %v16344_v60 = vadd.f32 %v12404_v16, %v16190_v3  ;;  %v16408_v16 = vld [vmem:[%s18317_s4 + $0x8] sm:$0x1f]  }
 0x299   : > { %v12406_v27 = vpop.f32.mrf.mxu1 }
 0x29a   : > { %v4957_v39 = vpop.f32.mrf.mxu0  ;;  %v13473_v27 = vld [vmem:[%s18318_s5 + $0x288] ss:$12 sps:$4 sm:$0xff]  }
 0x29b   : > { %v4958_v37 = vadd.f32 %v4957_v39, %v4907_v0  ;;  %v13478_v39 = vld [vmem:[%s18318_s5 + $0x274] ss:$12 sps:$4 sm:$0xff]  }
 0x29c   : > { %v4959_v50 = vpop.f32.mrf.mxu0 }
 0x29d   : > { %v5009_v3 = vadd.f32 %v5008_v56, %v4958_v37  ;;  %v4960_v26 = vadd.f32 %v4959_v50, %v4909_v45  ;;  %v13476_v50 = vld [vmem:[%s18318_s5 + $0x270] ss:$12 sps:$4 sm:$0xff]  }
 0x29e   : > { %v4961_v19 = vpop.f32.mrf.mxu0 }
 0x29f   : > { %v5011_v4 = vadd.f32 %v5010_v13, %v4960_v26  ;;  %v4962_v33 = vadd.f32 %v4961_v19, %v4911_v30  ;;  %v5330_v22 = vadd.f32 %v5318_v49, %v5009_v3  ;;  %v13481_v3 = vld [vmem:[%s18318_s5 + $0x25c] ss:$12 sps:$4 sm:$0xff]   ;;  %v13479_v19 = vld [vmem:[%s18318_s5 + $0x258] ss:$12 sps:$4 sm:$0xff]  }
 0x2a0   : > { %v4963_v34 = vpop.f32.mrf.mxu0 }
 0x2a1   : > { %v5013_v8 = vadd.f32 %v5012_v40, %v4962_v33  ;;  %v4964_v55 = vadd.f32 %v4963_v34, %v4913_v63  ;;  %v5331_v51 = vadd.f32 %v5322_v43, %v5011_v4  ;;  %v5339_v24 = vmax.f32 %v5330_v22, 0.0  ;;  %v13482_v22 = vld [vmem:[%s18318_s5 + $0x240] ss:$12 sps:$4 sm:$0xff]  }
 0x2a2   : > { %v4967_v0 = vpop.f32.mrf.mxu0  ;;  %v13487_v34 = vld [vmem:[%s18318_s5 + $0x22c] ss:$12 sps:$4 sm:$0xff]  }
 0x2a3   : > { %v5333_v62 = vadd.f32 %v5318_v49, %v5013_v8  ;;  %v5015_v10 = vadd.f32 %v5014_v2, %v4964_v55  ;;  %v4968_v54 = vadd.f32 %v4967_v0, %v4917_v32  ;;  %v5340_v1 = vmax.f32 %v5331_v51, 0.0  ;;  %v13485_v51 = vld [vmem:[%s18318_s5 + $0x228] ss:$12 sps:$4 sm:$0xff]  }
 0x2a4   : > { %v4969_v45 = vpop.f32.mrf.mxu0  ;;  %v13490_v0 = vld [vmem:[%s18318_s5 + $0x214] ss:$12 sps:$4 sm:$0xff]  }
 0x2a5   : > { %v5342_v46 = vmax.f32 %v5333_v62, 0.0  ;;  %v5334_v35 = vadd.f32 %v5322_v43, %v5015_v10  ;;  %v5019_v42 = vadd.f32 %v5018_v25, %v4968_v54  ;;  %v4970_v48 = vadd.f32 %v4969_v45, %v4919_v36  ;;  %v13488_v10 = vld [vmem:[%s18318_s5 + $0x210] ss:$12 sps:$4 sm:$0xff]  }
 0x2a6   : > { %v4971_v11 = vpop.f32.mrf.mxu0  ;;  %v13493_v54 = vld [vmem:[%s18318_s5 + $0x1fc] ss:$12 sps:$4 sm:$0xff]  }
 0x2a7   : > { %v16362_v38 = vpack.c.bf16 %v5342_v46, %v5339_v24  ;;  %v5336_v30 = vadd.f32 %v5318_v49, %v5019_v42  ;;  %v5021_v15 = vadd.f32 %v5020_v47, %v4970_v48  ;;  %v5343_v56 = vmax.f32 %v5334_v35, 0.0  ;;  %v13491_v46 = vld [vmem:[%s18318_s5 + $0x1f8] ss:$12 sps:$4 sm:$0xff]  }
 0x2a8   : > { %v4972_v63 = vpop.f32.mrf.mxu0  ;;  %v13496_v35 = vld [vmem:[%s18318_s5 + $0x1e4] ss:$12 sps:$4 sm:$0xff]   ;;  %v13499_v11 = vld [vmem:[%s18318_s5 + $0x34c] ss:$12 sps:$4 sm:$0xff]  }
 0x2a9   : > { %v5345_v13 = vmax.f32 %v5336_v30, 0.0  ;;  %v5337_v40 = vadd.f32 %v5322_v43, %v5021_v15  ;;  %v16364_v61 = vpack.c.bf16 %v5343_v56, %v5340_v1  ;;  %v13494_v1 = vld [vmem:[%s18318_s5 + $0x1e0] ss:$12 sps:$4 sm:$0xff]   ;;  %v13497_v56 = vld [vmem:[%s18318_s5 + $0x348] ss:$12 sps:$4 sm:$0xff]  }
 0x2aa   : > { %v13502_v63 = vld [vmem:[%s18318_s5 + $0x334] ss:$12 sps:$4 sm:$0xff]  }
 0x2ab   : > { %v16366_v2 = vpop.f32.mrf.mxu1  ;;  %v5346_v32 = vmax.f32 %v5337_v40, 0.0  ;;  %v5351_v18 = vpack.c.bf16 %v5345_v13, %v5345_v13 }
 0x2ad   : > { %v16368_v31 = vpop.f32.mrf.mxu1  ;;  %v16370_v25 = vpack.c.bf16 %v5346_v32, %v5346_v32  ;;  %v16377_v47 = vsel %vm5365_vm3, %v5351_v18, 0 }
 0x2ae   : > { %v12426_v32 = vadd.f32 %v16368_v31, %v16366_v2 }
 0x2af   : > { %v16372_v44 = vpop.f32.mrf.mxu1  ;;  %11232 = vmatprep.subr.msk.bf16.mxu1 %vm5365_vm3, %v16370_v25 }
 0x2b0   : > { %5388 = vmatpush1.bf16.msra.mxu1 %v16377_v47  ;;  %v5108_v2 = vadd.f32 %v12426_v32, %v16336_v14  ;;  %v13514_v32 = vld [vmem:[%s18318_s5 + $0x2d4] ss:$12 sps:$4 sm:$0xff]  }
 0x2b1   : > { %v16379_v5 = vpop.f32.mrf.mxu1  ;;  %5389 = vmatprep.subr.bf16.mxu1 %v16364_v61 }
 0x2b3   : > { %v16383_v6 = vpop.f32.mrf.mxu1 }
 0x2b4   : > { %5390 = vmatpush1.bf16.msra.mxu1 %v16362_v38 }
 0x2b5   : > { %v16390_v23 = vpop.f32.mrf.mxu1  ;;  %11238 = vmatprep.subr.msk.bf16.mxu1 %vm5365_vm3, %v16370_v25 }
 0x2b6   : > { %v12432_v40 = vadd.f32 %v16390_v23, %v16383_v6 }
 0x2b7   : > { %v12433_v57 = vpop.f32.mrf.mxu1  ;;  %11233 = vmatmul.mubr.msk.bf16.vlgmr.msra.gmra.mxu1 %vm5361_vm4, %v16388_v9 }
 0x2b8   : > { %5566 = vmatpush1.bf16.msra.mxu1 %v16377_v47  ;;  %5585 = vmatprep.mubr.bf16.mxu1 %v14337_v28  ;;  %v13500_v57 = vld [vmem:[%s18318_s5 + $0x330] ss:$12 sps:$4 sm:$0xff]  }
 0x2b9   : > { %v12434_v17 = vpop.f32.mrf.mxu1  ;;  %5567 = vmatprep.subr.bf16.mxu1 %v16364_v61 }
 0x2ba   : > { %v16403_v7 = vpop.f32.mrf.mxu0 }
 0x2bc   : > { %v16410_v20 = vpop.f32.mrf.mxu0  ;;  %5568 = vmatpush1.bf16.msra.mxu1 %v16362_v38 }
 0x2bd   : > { %6044 = vmatprep.subr.bf16.mxu1 %v13475_v52  ;;  %v13505_v52 = vld [vmem:[%s18318_s5 + $0x31c] ss:$12 sps:$4 sm:$0xff]   ;;  %v12454_v6 = vadd.f32 %v16410_v20, %v16403_v7  ;;  %v13508_v7 = vld [vmem:[%s18318_s5 + $0x304] ss:$12 sps:$4 sm:$0xff]  }
 0x2be   : > { %v16419_v37 = vpop.f32.mrf.mxu0 }
 0x2bf   : > { %11239 = vmatmul.mubr.msk.bf16.vlgmr.msra.gmra.mxu1 %vm5361_vm4, %v16408_v16  ;;  %v5156_v20 = vadd.f32 %v12454_v6, %v5108_v2  ;;  %v13560_v6 = vld [vmem:[%s18318_s5 + $0x3a8] ss:$12 sps:$4 sm:$0xff]  }
 0x2c0   : > { %v16423_v49 = vpop.f32.mrf.mxu0  ;;  %6045 = vmatpush1.bf16.msra.mxu1 %v13473_v27  ;;  %v13574_v2 = vld [vmem:[%s18318_s5 + $0x37c] ss:$12 sps:$4 sm:$0xff]  }
 0x2c1   : > { %6046 = vmatprep.subr.bf16.mxu1 %v13478_v39  ;;  %v5116_v39 = vadd.f32 %v12432_v40, %v16344_v60  ;;  %v13509_v40 = vld [vmem:[%s18318_s5 + $0x2e8] ss:$12 sps:$4 sm:$0xff]  }
 0x2c2   : > { %v12458_v26 = vpop.f32.mrf.mxu0 }
 0x2c4   : > { %v12459_v43 = vpop.f32.mrf.mxu0  ;;  %6047 = vmatpush1.bf16.msra.mxu1 %v13476_v50  ;;  %v5325_v50 = vsub.s32 2, %v16341_v12 }
 0x2c5   : > { %6048 = vmatprep.subr.bf16.mxu1 %v13481_v3  ;;  %v12460_v17 = vadd.f32 %v12459_v43, %v12458_v26  ;;  %v13503_v3 = vld [vmem:[%s18318_s5 + $0x318] ss:$12 sps:$4 sm:$0xff]   ;;  %v12429_v26 = vadd.f32 %v16379_v5, %v16372_v44  ;;  %v13506_v5 = vld [vmem:[%s18318_s5 + $0x300] ss:$12 sps:$4 sm:$0xff]  }
 0x2c6   : > { %v12461_v4 = vpop.f32.mrf.mxu0  ;;  %v5326_v44 = vrot.slane %v16352_v53, %v5325_v50 }
 0x2c7   : > { %v5164_v43 = vadd.f32 %v12460_v17, %v5116_v39  ;;  %v13515_v17 = vld [vmem:[%s18318_s5 + $0x2b8] ss:$12 sps:$4 sm:$0xff]  }
 0x2c8   : > { %v12462_v33 = vpop.f32.mrf.mxu0  ;;  %6049 = vmatpush1.bf16.msra.mxu1 %v13479_v19  ;;  %v13562_v39 = vld [vmem:[%s18318_s5 + $0x3ac] ss:$12 sps:$4 sm:$0xff]  }
 0x2c9   : > { %6050 = vmatprep.subr.bf16.mxu1 %v13484_v29  ;;  %v12457_v29 = vadd.f32 %v16423_v49, %v16419_v37 }
 0x2cb   : > { %v12480_v8 = vpop.f32.mrf.mxu1 }
 0x2cc   : > { %6051 = vmatpush1.bf16.msra.mxu1 %v13482_v22 }
 0x2cd   : > { %v12481_v55 = vpop.f32.mrf.mxu1  ;;  %6052 = vmatprep.subr.bf16.mxu1 %v13487_v34  ;;  %v5111_v34 = vadd.f32 %v12429_v26, %v16339_v41  ;;  %v13578_v26 = vld [vmem:[%s18318_s5 + $0x360] ss:$12 sps:$4 sm:$0xff]  }
 0x2ce   : > { %v12482_v19 = vadd.f32 %v12481_v55, %v12480_v8 }
 0x2cf   : > { %v12483_v36 = vpop.f32.mrf.mxu1  ;;  %v5159_v37 = vadd.f32 %v12457_v29, %v5111_v34 }
 0x2d0   : > { %6053 = vmatpush1.bf16.msra.mxu1 %v13485_v51  ;;  %v5204_v8 = vadd.f32 %v12482_v19, %v5156_v20 }
 0x2d1   : > { %v12484_v62 = vpop.f32.mrf.mxu1  ;;  %6054 = vmatprep.subr.bf16.mxu1 %v13490_v0 }
 0x2d2   : > { %v12485_v55 = vadd.f32 %v12484_v62, %v12483_v36 }
 0x2d3   : > { %v12486_v24 = vpop.f32.mrf.mxu1 }
 0x2d4   : > { %6055 = vmatpush1.bf16.msra.mxu1 %v13488_v10 }
 0x2d5   : > { %v12487_v45 = vpop.f32.mrf.mxu1  ;;  %6056 = vmatprep.subr.bf16.mxu1 %v13493_v54 }
 0x2d6   : > { %v12488_v23 = vadd.f32 %v12487_v45, %v12486_v24  ;;  %v5207_v45 = vadd.f32 %v12485_v55, %v5159_v37  ;;  %v13526_v55 = vld [vmem:[%s18318_s5 + $0x94] ss:$12 sps:$4 sm:$0xff]   ;;  %v13527_v37 = vld [vmem:[%s18318_s5 + $0x78] ss:$12 sps:$4 sm:$0xff]  }
 0x2d7   : > { %v12489_v42 = vpop.f32.mrf.mxu1 }
 0x2d8   : > { %6057 = vmatpush1.bf16.msra.mxu1 %v13491_v46  ;;  %v5212_v4 = vadd.f32 %v12488_v23, %v5164_v43  ;;  %v13566_v23 = vld [vmem:[%s18318_s5 + $0x390] ss:$12 sps:$4 sm:$0xff]  }
 0x2d9   : > { %v12490_v48 = vpop.f32.mrf.mxu1  ;;  %6058 = vmatprep.subr.bf16.mxu1 %v13496_v35  ;;  %v13581_v43 = vld [vmem:[%s18318_s5 + $0x350] ss:$12 sps:$4 sm:$0xff]  }
 0x2da   : > { %v12508_v30 = vpop.f32.mrf.mxu0 }
 0x2dc   : > { %v12509_v15 = vpop.f32.mrf.mxu0  ;;  %6059 = vmatpush1.bf16.msra.mxu1 %v13494_v1 }
 0x2dd   : > { %6060 = vmatprep.subr.bf16.mxu1 %v13499_v11  ;;  %v12510_v33 = vadd.f32 %v12509_v15, %v12508_v30 }
 0x2de   : > { %v12511_v13 = vpop.f32.mrf.mxu0 }
 0x2df   : > { %v5252_v54 = vadd.f32 %v12510_v33, %v5204_v8  ;;  %v13521_v8 = vld [vmem:[%s18318_s5 + $0xa8] ss:$12 sps:$4 sm:$0xff]  }
 0x2e0   : > { %v12512_v18 = vpop.f32.mrf.mxu0  ;;  %6061 = vmatpush2.bf16.msra.mxu1 %v13497_v56 }
 0x2e1   : > { %6062 = vmatprep.subr.bf16.mxu1 %v13502_v63  ;;  %v12513_v49 = vadd.f32 %v12512_v18, %v12511_v13  ;;  %v13511_v63 = vld [vmem:[%s18318_s5 + $0x2ec] ss:$12 sps:$4 sm:$0xff]   ;;  %v13512_v18 = vld [vmem:[%s18318_s5 + $0x2d0] ss:$12 sps:$4 sm:$0xff]  }
 0x2e2   : > { %v12514_v27 = vpop.f32.mrf.mxu0 }
 0x2e3   : > { %v5255_v48 = vadd.f32 %v12513_v49, %v5207_v45  ;;  %v13532_v49 = vld [vmem:[%s18318_s5 + $0x64] ss:$12 sps:$4 sm:$0xff]   ;;  %v13538_v45 = vld [vmem:[%s18318_s5 + $0x34] ss:$12 sps:$4 sm:$0xff]  }
 0x2e4   : > { %v12515_v31 = vpop.f32.mrf.mxu0  ;;  %6063 = vmatpush2.bf16.msra.mxu1 %v13500_v57  ;;  %v13517_v57 = vld [vmem:[%s18318_s5 + $0x2bc] ss:$12 sps:$4 sm:$0xff]  }
 0x2e5   : > { %v12516_v60 = vadd.f32 %v12515_v31, %v12514_v27  ;;  %6064 = vmatprep.subr.bf16.mxu1 %v13505_v52  ;;  %v13518_v52 = vld [vmem:[%s18318_s5 + $0x2a0] ss:$12 sps:$4 sm:$0xff]   ;;  %v13572_v31 = vld [vmem:[%s18318_s5 + $0x378] ss:$12 sps:$4 sm:$0xff]  }
 0x2e6   : > { %v12517_v14 = vpop.f32.mrf.mxu0  ;;  %v13523_v27 = vld [vmem:[%s18318_s5 + $0xac] ss:$12 sps:$4 sm:$0xff]  }
 0x2e7   : > { %v5260_v51 = vadd.f32 %v12516_v60, %v5212_v4 }
 0x2e8   : > { %v12518_v22 = vpop.f32.mrf.mxu0  ;;  %6065 = vmatpush2.bf16.msra.mxu1 %v13503_v3  ;;  %v13580_v3 = vld [vmem:[%s18318_s5 + $0x364] ss:$12 sps:$4 sm:$0xff]  }
 0x2e9   : > { %6066 = vmatprep.subr.bf16.mxu1 %v13508_v7 }
 0x2ea   : > { %v12660_v0 = vpop.f32.mrf.mxu0 }
 0x2eb   : > { %v5308_v10 = vadd.f32 %v12660_v0, %v5260_v51  ;;  %v13524_v51 = vld [vmem:[%s18318_s5 + $0x90] ss:$12 sps:$4 sm:$0xff]  }
 0x2ec   : > { %v5299_v24 = vpop.f32.mrf.mxu0  ;;  %6067 = vmatpush2.bf16.msra.mxu1 %v13506_v5  ;;  %v13529_v0 = vld [vmem:[%s18318_s5 + $0x7c] ss:$12 sps:$4 sm:$0xff]  }
 0x2ed   : > { %v5338_v53 = vadd.f32 %v5326_v44, %v5308_v10  ;;  %v5300_v46 = vadd.f32 %v5299_v24, %v5252_v54  ;;  %6068 = vmatprep.subr.bf16.mxu1 %v13511_v63  ;;  %v13530_v10 = vld [vmem:[%s18318_s5 + $0x60] ss:$12 sps:$4 sm:$0xff]   ;;  %v13533_v24 = vld [vmem:[%s18318_s5 + $0x48] ss:$12 sps:$4 sm:$0xff]  }
 0x2ee   : > { %v12661_v35 = vpop.f32.mrf.mxu0  ;;  %v13535_v54 = vld [vmem:[%s18318_s5 + $0x4c] ss:$12 sps:$4 sm:$0xff]  }
 0x2ef   : > { %v5347_v42 = vmax.f32 %v5338_v53, 0.0  ;;  %v5332_v41 = vadd.f32 %v5326_v44, %v5300_v46  ;;  %v13536_v53 = vld [vmem:[%s18318_s5 + $0x30] ss:$12 sps:$4 sm:$0xff]   ;;  %v13539_v35 = vld [vmem:[%s18318_s5 + $0x18] ss:$12 sps:$4 sm:$0xff]  }
 0x2f0   : > { %v5302_v1 = vpop.f32.mrf.mxu0  ;;  %6069 = vmatpush2.bf16.msra.mxu1 %v13509_v40  ;;  %v13541_v46 = vld [vmem:[%s18318_s5 + $0x1c] ss:$12 sps:$4 sm:$0xff]   ;;  %v13554_v63 = vld [vmem:[%s18318_s5 + $0x120] ss:$12 sps:$4 sm:$0xff]  }
 0x2f1   : > { %v5353_v11 = vpack.c.bf16 %v5347_v42, %v5347_v42  ;;  %v5303_v30 = vadd.f32 %v5302_v1, %v5255_v48  ;;  %v5341_v15 = vmax.f32 %v5332_v41, 0.0  ;;  %6070 = vmatprep.subr.bf16.mxu1 %v13514_v32  ;;  %v13544_v42 = vld [vmem:[%s18318_s5 + $0x4] ss:$12 sps:$4 sm:$0xff]   ;;  %v13542_v48 = vld [vmem:[%s18318_s5] ss:$12 sps:$4 sm:$0xff]  }
 0x2f2   : > { %v13547_v1 = vld [vmem:[%s18318_s5 + $0x16c] ss:$12 sps:$4 sm:$0xff]   ;;  %v13550_v41 = vld [vmem:[%s18318_s5 + $0x154] ss:$12 sps:$4 sm:$0xff]  }
 0x2f3   : > { %v5335_v36 = vadd.f32 %v5326_v44, %v5303_v30  ;;  %v16506_v62 = vsel %vm5365_vm3, %v5353_v11, 0  ;;  %v13545_v11 = vld [vmem:[%s18318_s5 + $0x168] ss:$12 sps:$4 sm:$0xff]   ;;  %v13548_v30 = vld [vmem:[%s18318_s5 + $0x150] ss:$12 sps:$4 sm:$0xff]  }
 0x2f4   : > { %12663 = vmatpush3.bf16.msra.mxu0 %v16506_v62  ;;  %6071 = vmatpush2.bf16.msra.mxu1 %v13512_v18  ;;  %v13559_v40 = vld [vmem:[%s18318_s5 + $0x10c] ss:$12 sps:$4 sm:$0xff]   ;;  %v13557_v32 = vld [vmem:[%s18318_s5 + $0x108] ss:$12 sps:$4 sm:$0xff]  }
 0x2f5   : > { %v5344_v56 = vmax.f32 %v5335_v36, 0.0  ;;  %12664 = vmatprep.subr.bf16.mxu0 %v14338_v59  ;;  %6072 = vmatprep.subr.bf16.mxu1 %v13517_v57  ;;  %v13553_v36 = vld [vmem:[%s18318_s5 + $0x13c] ss:$12 sps:$4 sm:$0xff]   ;;  %v13565_v18 = vld [vmem:[%s18318_s5 + $0xf4] ss:$12 sps:$4 sm:$0xff]  }
 0x2f6   : > { %v13563_v57 = vld [vmem:[%s18318_s5 + $0xf0] ss:$12 sps:$4 sm:$0xff]  }
 0x2f7   : > { %v16513_v13 = vpack.c.bf16 %v5344_v56, %v5341_v15  ;;  %v13551_v15 = vld [vmem:[%s18318_s5 + $0x138] ss:$12 sps:$4 sm:$0xff]  }
 0x2f8   : > { %6073 = vmatpush2.bf16.msra.mxu1 %v13515_v17  ;;  %v13556_v56 = vld [vmem:[%s18318_s5 + $0x124] ss:$12 sps:$4 sm:$0xff]   ;;  %v13571_v17 = vld [vmem:[%s18318_s5 + $0xdc] ss:$12 sps:$4 sm:$0xff]  }
 0x2f9   : > { %12665 = vmatpush3.bf16.msra.mxu0 %v16513_v13 }
 0x2fa   : > { %12670 = vmatprep.subr.bf16.mxu0 %v14338_v59 }
 0x2fc   : > { %12667 = vmatmul.mubr.msk.bf16.vlgmr.msra.gmra.mxu0 %vm5361_vm4, %v16388_v9  ;;  %v13520_v9 = vld [vmem:[%s18318_s5 + $0x2a4] ss:$12 sps:$4 sm:$0xff]  }
 0x2fd   : > { %12671 = vmatpush3.bf16.msra.mxu0 %v16506_v62  ;;  %12674 = vmatprep.mubr.msk.bf16.mxu0 %vm14339_vm2, %v14338_v59 }
 0x2fe   : > { %12672 = vmatprep.subr.bf16.mxu0 %v14338_v59  ;;  %6074 = vmatprep.subr.bf16.mxu1 %v13520_v9 }
 0x2ff   : > { %6075 = vmatpush2.bf16.msra.mxu1 %v13518_v52 }
 0x300   : > { %6535 = vmatprep.subr.bf16.mxu1 %v13523_v27  ;;  %v13569_v27 = vld [vmem:[%s18318_s5 + $0xd8] ss:$12 sps:$4 sm:$0xff]  }
 0x301   : > { %12673 = vmatpush3.bf16.msra.mxu0 %v16513_v13 }
 0x302   : > { %6095 = vmatprep.subr.bf16.mxu0 %v13562_v39  ;;  %v13577_v39 = vld [vmem:[%s18318_s5 + $0xc4] ss:$12 sps:$4 sm:$0xff]  }
 0x304   : > { %12675 = vmatmul.mubr.msk.bf16.vlgmr.msra.gmra.mxu0 %vm5361_vm4, %v16408_v16  ;;  %v13568_v16 = vld [vmem:[%s18318_s5 + $0x394] ss:$12 sps:$4 sm:$0xff]  }
 0x305   : > { %6119 = vmatprep.mubr.bf16.mxu0 %v14337_v28  ;;  %6096 = vmatpush1.bf16.msra.mxu0 %v13560_v6 }
 0x306   : > { %6097 = vmatprep.subr.bf16.mxu0 %v13568_v16 }
 0x309   : > { %6098 = vmatpush1.bf16.msra.mxu0 %v13566_v23 }
 0x30a   : > { %6099 = vmatprep.subr.bf16.mxu0 %v13574_v2  ;;  %v13575_v2 = vld [vmem:[%s18318_s5 + $0xc0] ss:$12 sps:$4 sm:$0xff]  }
 0x30d   : > { %6100 = vmatpush1.bf16.msra.mxu0 %v13572_v31 }
 0x30e   : > { %6101 = vmatprep.subr.bf16.mxu0 %v13580_v3 }
 0x311   : > { %6102 = vmatpush1.bf16.msra.mxu0 %v13578_v26 }
 0x312   : > { %12532 = vmatprep.subr.bf16.mxu0 %v13581_v43  ;;  %v13582_v43 = vld [vmem:[%s18318_s5 + $0x290] ss:$12 sps:$4 sm:$0xff]  }
 0x377   : > { %v5409_v19 = vpop.f32.mrf.mxu1 }
 0x379   : > { %v5411_v60 = vpop.f32.mrf.mxu1 }
 0x37b   : > { %v5413_v7 = vpop.f32.mrf.mxu1 }
 0x37c   : > { %v16578_v14 = vpack.c.bf16 %v5413_v7, %v5409_v19 }
 0x37d   : > { %v5415_v20 = vpop.f32.mrf.mxu1 }
 0x37e   : > { %v16582_v5 = vpack.c.bf16 %v5415_v20, %v5411_v60  ;;  %v13583_v60 = vld [vmem:[%s18318_s5 + $0x338] ss:$12 sps:$4 sm:$0xff]   ;;  %v13585_v20 = vld [vmem:[%s18318_s5 + $0x320] ss:$12 sps:$4 sm:$0xff]  }
 0x37f   : > { %v5587_v29 = vpop.f32.mrf.mxu1 }
 0x381   : > { %v5589_v4 = vpop.f32.mrf.mxu1 }
 0x383   : > { %v5591_v33 = vpop.f32.mrf.mxu1 }
 0x384   : > { %v16580_v22 = vpack.c.bf16 %v5591_v33, %v5587_v29  ;;  %v13587_v29 = vld [vmem:[%s18318_s5 + $0x308] ss:$12 sps:$4 sm:$0xff]   ;;  %v13590_v33 = vld [vmem:[%s18318_s5 + $0x230] ss:$12 sps:$4 sm:$0xff]  }
 0x385   : > { %v5593_v44 = vpop.f32.mrf.mxu1 }
 0x386   : > { %v16584_v34 = vpack.c.bf16 %v5593_v44, %v5589_v4  ;;  %v13588_v4 = vld [vmem:[%s18318_s5 + $0x248] ss:$12 sps:$4 sm:$0xff]   ;;  %v13591_v44 = vld [vmem:[%s18318_s5 + $0x2d8] ss:$12 sps:$4 sm:$0xff]  }
 0x388   : > { %6076 = vmatprep.mubr.bf16.mxu1 %v16584_v34 }
 0x389   : > { %6077 = vmatmul.mubr.bf16.vlgmr.msra.gmra.mxu1 %v16580_v22 }
 0x38a   : > { %6536 = vmatpush1.bf16.msra.mxu1 %v13521_v8  ;;  %6567 = vmatprep.mubr.bf16.mxu1 %v16582_v5  ;;  %v13593_v8 = vld [vmem:[%s18318_s5 + $0x2c0] ss:$12 sps:$4 sm:$0xff]  }
 0x38b   : > { %6537 = vmatprep.subr.bf16.mxu1 %v13526_v55  ;;  %v13594_v55 = vld [vmem:[%s18318_s5 + $0x200] ss:$12 sps:$4 sm:$0xff]  }
 0x38e   : > { %6538 = vmatpush1.bf16.msra.mxu1 %v13524_v51  ;;  %v13595_v51 = vld [vmem:[%s18318_s5 + $0x2a8] ss:$12 sps:$4 sm:$0xff]  }
 0x38f   : > { %6539 = vmatprep.subr.bf16.mxu1 %v13529_v0  ;;  %v13596_v0 = vld [vmem:[%s18318_s5 + $0x1e8] ss:$12 sps:$4 sm:$0xff]  }
 0x392   : > { %6540 = vmatpush1.bf16.msra.mxu1 %v13527_v37  ;;  %v13597_v37 = vld [vmem:[%s18318_s5 + $0x3b0] ss:$12 sps:$4 sm:$0xff]  }
 0x393   : > { %6541 = vmatprep.subr.bf16.mxu1 %v13532_v49  ;;  %v13598_v49 = vld [vmem:[%s18318_s5 + $0x398] ss:$12 sps:$4 sm:$0xff]  }
 0x396   : > { %6542 = vmatpush1.bf16.msra.mxu1 %v13530_v10  ;;  %v13599_v10 = vld [vmem:[%s18318_s5 + $0x380] ss:$12 sps:$4 sm:$0xff]  }
 0x397   : > { %6543 = vmatprep.subr.bf16.mxu1 %v13535_v54  ;;  %v13603_v54 = vld [vmem:[%s18318_s5 + $0x1cc] ss:$12 sps:$4 sm:$0xff]  }
 0x39a   : > { %6544 = vmatpush1.bf16.msra.mxu1 %v13533_v24  ;;  %v13601_v24 = vld [vmem:[%s18318_s5 + $0x1c8] ss:$12 sps:$4 sm:$0xff]  }
 0x39b   : > { %6545 = vmatprep.subr.bf16.mxu1 %v13538_v45  ;;  %v13606_v45 = vld [vmem:[%s18318_s5 + $0x1b4] ss:$12 sps:$4 sm:$0xff]  }
 0x39e   : > { %6546 = vmatpush1.bf16.msra.mxu1 %v13536_v53  ;;  %v13604_v53 = vld [vmem:[%s18318_s5 + $0x1b0] ss:$12 sps:$4 sm:$0xff]  }
 0x39f   : > { %6547 = vmatprep.subr.bf16.mxu1 %v13541_v46  ;;  %v13609_v46 = vld [vmem:[%s18318_s5 + $0x19c] ss:$12 sps:$4 sm:$0xff]  }
 0x3a2   : > { %6548 = vmatpush1.bf16.msra.mxu1 %v13539_v35  ;;  %v13607_v35 = vld [vmem:[%s18318_s5 + $0x198] ss:$12 sps:$4 sm:$0xff]  }
 0x3a3   : > { %6549 = vmatprep.subr.bf16.mxu1 %v13544_v42  ;;  %v13612_v42 = vld [vmem:[%s18318_s5 + $0x184] ss:$12 sps:$4 sm:$0xff]  }
 0x3a6   : > { %6550 = vmatpush1.bf16.msra.mxu1 %v13542_v48  ;;  %v13610_v48 = vld [vmem:[%s18318_s5 + $0x180] ss:$12 sps:$4 sm:$0xff]  }
 0x3a7   : > { %6551 = vmatprep.subr.bf16.mxu1 %v13547_v1  ;;  %v13613_v1 = vld [vmem:[%s18318_s5 + $0x170] ss:$12 sps:$4 sm:$0xff]  }
 0x3aa   : > { %6552 = vmatpush2.bf16.msra.mxu1 %v13545_v11  ;;  %v13614_v11 = vld [vmem:[%s18318_s5 + $0xb0] ss:$12 sps:$4 sm:$0xff]  }
 0x3ab   : > { %6553 = vmatprep.subr.bf16.mxu1 %v13550_v41  ;;  %v13615_v41 = vld [vmem:[%s18318_s5 + $0x158] ss:$12 sps:$4 sm:$0xff]  }
 0x3ae   : > { %6554 = vmatpush2.bf16.msra.mxu1 %v13548_v30  ;;  %v13616_v30 = vld [vmem:[%s18318_s5 + $0x98] ss:$12 sps:$4 sm:$0xff]  }
 0x3af   : > { %6555 = vmatprep.subr.bf16.mxu1 %v13553_v36  ;;  %v13617_v36 = vld [vmem:[%s18318_s5 + $0x140] ss:$12 sps:$4 sm:$0xff]  }
 0x3b2   : > { %6556 = vmatpush2.bf16.msra.mxu1 %v13551_v15  ;;  %v13618_v15 = vld [vmem:[%s18318_s5 + $0x80] ss:$12 sps:$4 sm:$0xff]  }
 0x3b3   : > { %6557 = vmatprep.subr.bf16.mxu1 %v13556_v56  ;;  %v13619_v56 = vld [vmem:[%s18318_s5 + $0x128] ss:$12 sps:$4 sm:$0xff]  }
 0x3b6   : > { %6558 = vmatpush2.bf16.msra.mxu1 %v13554_v63  ;;  %v13621_v63 = vld [vmem:[%s18318_s5 + $0x110] ss:$12 sps:$4 sm:$0xff]  }
 0x3b7   : > { %6559 = vmatprep.subr.bf16.mxu1 %v13559_v40  ;;  %v13622_v40 = vld [vmem:[%s18318_s5 + $0x50] ss:$12 sps:$4 sm:$0xff]  }
 0x3ba   : > { %6560 = vmatpush2.bf16.msra.mxu1 %v13557_v32  ;;  %v13623_v32 = vld [vmem:[%s18318_s5 + $0xf8] ss:$12 sps:$4 sm:$0xff]  }
 0x3bb   : > { %6561 = vmatprep.subr.bf16.mxu1 %v13565_v18  ;;  %v13624_v18 = vld [vmem:[%s18318_s5 + $0x38] ss:$12 sps:$4 sm:$0xff]  }
 0x3bc   : > { %v5452_v9 = vpop.f32.mrf.mxu0 }
 0x3be   : > { %6562 = vmatpush2.bf16.msra.mxu1 %v13563_v57  ;;  %v12668_v52 = vpop.f32.mrf.mxu0  ;;  %v13625_v57 = vld [vmem:[%s18318_s5 + $0xe0] ss:$12 sps:$4 sm:$0xff]  }
 0x3bf   : > { %6563 = vmatprep.subr.bf16.mxu1 %v13571_v17  ;;  %v13626_v17 = vld [vmem:[%s18318_s5 + $0x20] ss:$12 sps:$4 sm:$0xff]   ;;  %v13628_v52 = vld [vmem:[%s18318_s5 + $0x8] ss:$12 sps:$4 sm:$0xff]  }
 0x3c0   : > { %v5455_v6 = vpop.f32.mrf.mxu0 }
 0x3c1   : > { %v16679_v16 = vpack.c.bf16 %v5455_v6, %v5452_v9  ;;  %v13627_v9 = vld [vmem:[%s18318_s5 + $0xc8] ss:$12 sps:$4 sm:$0xff]   ;;  %v13631_v6 = vld [vmem:[%s18318_s5 + $0x1a0] ss:$12 sps:$4 sm:$0xff]  }
 0x3c2   : > { %6564 = vmatpush2.bf16.msra.mxu1 %v13569_v27  ;;  %v12669_v23 = vpop.f32.mrf.mxu0  ;;  %v13629_v27 = vld [vmem:[%s18318_s5 + $0x1d0] ss:$12 sps:$4 sm:$0xff]  }
 0x3c3   : > { %6565 = vmatprep.subr.bf16.mxu1 %v13577_v39  ;;  %v13630_v39 = vld [vmem:[%s18318_s5 + $0x1b8] ss:$12 sps:$4 sm:$0xff]   ;;  %v13634_v23 = vld [vmem:[%s18318_s5 + $0x468] ss:$12 sps:$4 sm:$0xff]  }
 0x3c4   : > { %v5630_v31 = vpop.f32.mrf.mxu0 }
 0x3c6   : > { %6566 = vmatpush2.bf16.msra.mxu1 %v13575_v2  ;;  %v12676_v3 = vpop.f32.mrf.mxu0  ;;  %v13636_v2 = vld [vmem:[%s18318_s5 + $0x46c] ss:$12 sps:$4 sm:$0xff]  }
 0x3c7   : > { %11448 = vmatprep.subr.msk.bf16.mxu1 %vm5365_vm3, %v16370_v25  ;;  %v13584_v25 = vld [vmem:[%s18318_s5 + $0x278] ss:$12 sps:$4 sm:$0xff]  }
 0x3c8   : > { %v5633_v26 = vpop.f32.mrf.mxu0  ;;  %v13645_v3 = vld [vmem:[%s18318_s5 + $0x424] ss:$12 sps:$4 sm:$0xff]  }
 0x3c9   : > { %v5639_v19 = vpack.c.bf16 %v5633_v26, %v5630_v31  ;;  %6568 = vmatmul.mubr.bf16.vlgmr.msra.gmra.mxu1 %v16578_v14  ;;  %v13640_v31 = vld [vmem:[%s18318_s5 + $0x438] ss:$12 sps:$4 sm:$0xff]   ;;  %v13643_v26 = vld [vmem:[%s18318_s5 + $0x420] ss:$12 sps:$4 sm:$0xff]  }
 0x3ca   : > { %6727 = vmatpush1.bf16.msra.mxu1 %v16377_v47  ;;  %v12677_v7 = vpop.f32.mrf.mxu0  ;;  %6746 = vmatprep.mubr.bf16.mxu1 %v14337_v28  ;;  %v16707_v47 = vld [vmem:[%s18317_s4 + $0x10] sm:$0x1f]  }
 0x3cb   : > { %6728 = vmatprep.subr.bf16.mxu1 %v16364_v61  ;;  %11381 = vmatmul.mubr.msk.bf16.vlgmr.msra.gmra.mxu0 %vm2750_vm1, %v5639_v19  ;;  %v13586_v61 = vld [vmem:[%s18318_s5 + $0x260] ss:$12 sps:$4 sm:$0xff]   ;;  %v13649_v7 = vld [vmem:[%s18318_s5 + $0x3f0] ss:$12 sps:$4 sm:$0xff]  }
 0x3cc   : > { %12533 = vmatpush3.bf16.msra.mxu0 %v13582_v43  ;;  %6162 = vmatprep.mubr.bf16.mxu0 %v16584_v34  ;;  %v13592_v34 = vld [vmem:[%s18318_s5 + $0x218] ss:$12 sps:$4 sm:$0xff]  }
 0x3cd   : > { %12534 = vmatprep.subr.bf16.mxu0 %v13583_v60  ;;  %v13648_v43 = vld [vmem:[%s18318_s5 + $0x40c] ss:$12 sps:$4 sm:$0xff]   ;;  %v13651_v60 = vld [vmem:[%s18318_s5 + $0x3f4] ss:$12 sps:$4 sm:$0xff]  }
 0x3ce   : > { %6729 = vmatpush1.bf16.msra.mxu1 %v16362_v38  ;;  %v13589_v38 = vld [vmem:[%s18318_s5 + $0x2f0] ss:$12 sps:$4 sm:$0xff]  }
 0x3cf   : > { %7205 = vmatprep.subr.bf16.mxu1 %v13636_v2 }
 0x3d0   : > { %12535 = vmatpush3.bf16.msra.mxu0 %v13584_v25  ;;  %v13654_v25 = vld [vmem:[%s18318_s5 + $0x3dc] ss:$12 sps:$4 sm:$0xff]  }
 0x3d1   : > { %12536 = vmatprep.subr.bf16.mxu0 %v13585_v20  ;;  %11449 = vmatmul.mubr.msk.bf16.vlgmr.msra.gmra.mxu1 %vm5361_vm4, %v16707_v47  ;;  %v13652_v20 = vld [vmem:[%s18318_s5 + $0x3d8] ss:$12 sps:$4 sm:$0xff]  }
 0x3d2   : > { %7206 = vmatpush1.bf16.msra.mxu1 %v13634_v23 }
 0x3d4   : > { %12537 = vmatpush3.bf16.msra.mxu0 %v13586_v61  ;;  %v13655_v61 = vld [vmem:[%s18318_s5 + $0x3c0] ss:$12 sps:$4 sm:$0xff]  }
 0x3d5   : > { %12538 = vmatprep.subr.bf16.mxu0 %v13587_v29  ;;  %v13660_v29 = vld [vmem:[%s18318_s5 + $0x52c] ss:$12 sps:$4 sm:$0xff]  }
 0x3d8   : > { %12539 = vmatpush3.bf16.msra.mxu0 %v13588_v4  ;;  %v13658_v4 = vld [vmem:[%s18318_s5 + $0x528] ss:$12 sps:$4 sm:$0xff]  }
 0x3d9   : > { %12540 = vmatprep.subr.bf16.mxu0 %v13589_v38  ;;  %v13663_v38 = vld [vmem:[%s18318_s5 + $0x514] ss:$12 sps:$4 sm:$0xff]  }
 0x3dc   : > { %12541 = vmatpush3.bf16.msra.mxu0 %v13590_v33  ;;  %v13661_v33 = vld [vmem:[%s18318_s5 + $0x510] ss:$12 sps:$4 sm:$0xff]  }
 0x3dd   : > { %12542 = vmatprep.subr.bf16.mxu0 %v13591_v44  ;;  %v13666_v44 = vld [vmem:[%s18318_s5 + $0x4fc] ss:$12 sps:$4 sm:$0xff]  }
 0x3e0   : > { %12543 = vmatpush3.bf16.msra.mxu0 %v13592_v34  ;;  %v13664_v34 = vld [vmem:[%s18318_s5 + $0x4f8] ss:$12 sps:$4 sm:$0xff]  }
 0x3e1   : > { %12544 = vmatprep.subr.bf16.mxu0 %v13593_v8  ;;  %v13669_v8 = vld [vmem:[%s18318_s5 + $0x4e4] ss:$12 sps:$4 sm:$0xff]  }
 0x3e4   : > { %12545 = vmatpush3.bf16.msra.mxu0 %v13594_v55  ;;  %v13670_v55 = vld [vmem:[%s18318_s5 + $0x588] ss:$12 sps:$4 sm:$0xff]  }
 0x3e5   : > { %12546 = vmatprep.subr.bf16.mxu0 %v13595_v51  ;;  %v13667_v51 = vld [vmem:[%s18318_s5 + $0x4e0] ss:$12 sps:$4 sm:$0xff]  }
 0x3e8   : > { %12547 = vmatpush3.bf16.msra.mxu0 %v13596_v0  ;;  %v13672_v0 = vld [vmem:[%s18318_s5 + $0x58c] ss:$12 sps:$4 sm:$0xff]  }
 0x3e9   : > { %12678 = vmatprep.subr.bf16.mxu0 %v14338_v59 }
 0x3eb   : > { %6163 = vmatmul.mubr.bf16.vlgmr.msra.gmra.mxu0 %v16580_v22  ;;  %v13600_v22 = vld [vmem:[%s18318_s5 + $0x368] ss:$12 sps:$4 sm:$0xff]  }
 0x3ec   : > { %12679 = vmatpush3.bf16.msra.mxu0 %v13597_v37  ;;  %12686 = vmatprep.mubr.msk.bf16.mxu0 %vm14339_vm2, %v14338_v59  ;;  %v13675_v37 = vld [vmem:[%s18318_s5 + $0x4cc] ss:$12 sps:$4 sm:$0xff]  }
 0x3ed   : > { %12680 = vmatprep.subr.bf16.mxu0 %v14338_v59 }
 0x3f0   : > { %12681 = vmatpush3.bf16.msra.mxu0 %v13598_v49  ;;  %v13673_v49 = vld [vmem:[%s18318_s5 + $0x4c8] ss:$12 sps:$4 sm:$0xff]  }
 0x3f1   : > { %12682 = vmatprep.subr.bf16.mxu0 %v14338_v59 }
 0x3f4   : > { %12683 = vmatpush3.bf16.msra.mxu0 %v13599_v10 }
 0x3f5   : > { %12684 = vmatprep.subr.bf16.mxu0 %v14338_v59 }
 0x3f8   : > { %12685 = vmatpush3.bf16.msra.mxu0 %v13600_v22  ;;  %v13678_v22 = vld [vmem:[%s18318_s5 + $0x574] ss:$12 sps:$4 sm:$0xff]  }
 0x3f9   : > { %6586 = vmatprep.subr.bf16.mxu0 %v13603_v54  ;;  %v13676_v54 = vld [vmem:[%s18318_s5 + $0x570] ss:$12 sps:$4 sm:$0xff]  }
 0x3fb   : > { %12687 = vmatmul.mubr.msk.bf16.vlgmr.msra.gmra.mxu0 %vm2750_vm1, %v5639_v19  ;;  %v13646_v19 = vld [vmem:[%s18318_s5 + $0x408] ss:$12 sps:$4 sm:$0xff]  }
 0x3fc   : > { %6587 = vmatpush1.bf16.msra.mxu0 %v13601_v24  ;;  %6610 = vmatprep.mubr.bf16.mxu0 %v14337_v28  ;;  %v13681_v24 = vld [vmem:[%s18318_s5 + $0x4b4] ss:$12 sps:$4 sm:$0xff]  }
 0x3fd   : > { %6588 = vmatprep.subr.bf16.mxu0 %v13606_v45 }
 0x400   : > { %6589 = vmatpush1.bf16.msra.mxu0 %v13604_v53  ;;  %v13679_v53 = vld [vmem:[%s18318_s5 + $0x4b0] ss:$12 sps:$4 sm:$0xff]  }
 0x401   : > { %6590 = vmatprep.subr.bf16.mxu0 %v13609_v46  ;;  %v13684_v46 = vld [vmem:[%s18318_s5 + $0x55c] ss:$12 sps:$4 sm:$0xff]  }
 0x404   : > { %6591 = vmatpush1.bf16.msra.mxu0 %v13607_v35  ;;  %v13682_v35 = vld [vmem:[%s18318_s5 + $0x558] ss:$12 sps:$4 sm:$0xff]  }
 0x405   : > { %6592 = vmatprep.subr.bf16.mxu0 %v13612_v42  ;;  %v13687_v42 = vld [vmem:[%s18318_s5 + $0x49c] ss:$12 sps:$4 sm:$0xff]  }
 0x408   : > { %6593 = vmatpush1.bf16.msra.mxu0 %v13610_v48 }
 0x409   : > { %12559 = vmatprep.subr.bf16.mxu0 %v13613_v1  ;;  %v13685_v1 = vld [vmem:[%s18318_s5 + $0x498] ss:$12 sps:$4 sm:$0xff]  }
 0x40b   : > { %11443 = vmatmul.mubr.msk.bf16.vlgmr.msra.gmra.mxu0 %vm2750_vm1, %v16679_v16 }
 0x40c   : > { %12560 = vmatpush3.bf16.msra.mxu0 %v13614_v11  ;;  %6653 = vmatprep.mubr.bf16.mxu0 %v16582_v5  ;;  %v13620_v5 = vld [vmem:[%s18318_s5 + $0x68] ss:$12 sps:$4 sm:$0xff]   ;;  %v13690_v11 = vld [vmem:[%s18318_s5 + $0x544] ss:$12 sps:$4 sm:$0xff]  }
 0x40d   : > { %12561 = vmatprep.subr.bf16.mxu0 %v13615_v41  ;;  %v13688_v41 = vld [vmem:[%s18318_s5 + $0x540] ss:$12 sps:$4 sm:$0xff]  }
 0x410   : > { %12562 = vmatpush3.bf16.msra.mxu0 %v13616_v30  ;;  %v13693_v30 = vld [vmem:[%s18318_s5 + $0x484] ss:$12 sps:$4 sm:$0xff]  }
 0x411   : > { %12563 = vmatprep.subr.bf16.mxu0 %v13617_v36 }
 0x414   : > { %12564 = vmatpush3.bf16.msra.mxu0 %v13618_v15  ;;  %v13691_v15 = vld [vmem:[%s18318_s5 + $0x480] ss:$12 sps:$4 sm:$0xff]  }
 0x415   : > { %12565 = vmatprep.subr.bf16.mxu0 %v13619_v56  ;;  %v13694_v56 = vld [vmem:[%s18318_s5 + $0x530] ss:$12 sps:$4 sm:$0xff]  }
 0x418   : > { %12566 = vmatpush3.bf16.msra.mxu0 %v13620_v5 }
 0x419   : > { %12567 = vmatprep.subr.bf16.mxu0 %v13621_v63 }
 0x41c   : > { %12568 = vmatpush3.bf16.msra.mxu0 %v13622_v40 }
 0x41d   : > { %12569 = vmatprep.subr.bf16.mxu0 %v13623_v32 }
 0x420   : > { %12570 = vmatpush3.bf16.msra.mxu0 %v13624_v18 }
 0x421   : > { %12571 = vmatprep.subr.bf16.mxu0 %v13625_v57 }
 0x424   : > { %12572 = vmatpush3.bf16.msra.mxu0 %v13626_v17 }
 0x425   : > { %12573 = vmatprep.subr.bf16.mxu0 %v13627_v9 }
 0x428   : > { %12574 = vmatpush3.bf16.msra.mxu0 %v13628_v52 }
 0x429   : > { %12690 = vmatprep.subr.bf16.mxu0 %v14338_v59 }
 0x42b   : > { %6654 = vmatmul.mubr.bf16.vlgmr.msra.gmra.mxu0 %v16578_v14  ;;  %v13632_v14 = vld [vmem:[%s18318_s5 + $0x188] ss:$12 sps:$4 sm:$0xff]  }
 0x42c   : > { %12691 = vmatpush3.bf16.msra.mxu0 %v13629_v27  ;;  %12698 = vmatprep.mubr.msk.bf16.mxu0 %vm14339_vm2, %v14338_v59 }
 0x42d   : > { %12692 = vmatprep.subr.bf16.mxu0 %v14338_v59 }
 0x430   : > { %12693 = vmatpush3.bf16.msra.mxu0 %v13630_v39 }
 0x431   : > { %12694 = vmatprep.subr.bf16.mxu0 %v14338_v59 }
 0x434   : > { %12695 = vmatpush3.bf16.msra.mxu0 %v13631_v6 }
 0x435   : > { %12696 = vmatprep.subr.bf16.mxu0 %v14338_v59 }
 0x438   : > { %12697 = vmatpush3.bf16.msra.mxu0 %v13632_v14 }
 0x439   : > { %12702 = vmatprep.subr.bf16.mxu0 %v14338_v59 }
 0x43b   : > { %12699 = vmatmul.mubr.msk.bf16.vlgmr.msra.gmra.mxu0 %vm2750_vm1, %v16679_v16  ;;  %v13642_v16 = vld [vmem:[%s18318_s5 + $0x43c] ss:$12 sps:$4 sm:$0xff]  }
 0x43c   : > { %12703 = vmatpush3.bf16.msra.mxu0 %v16506_v62  ;;  %12706 = vmatprep.mubr.msk.bf16.mxu0 %vm14339_vm2, %v14338_v59  ;;  %v13639_v62 = vld [vmem:[%s18318_s5 + $0x454] ss:$12 sps:$4 sm:$0xff]  }
 0x43d   : > { %12704 = vmatprep.subr.bf16.mxu0 %v14338_v59  ;;  %7207 = vmatprep.subr.bf16.mxu1 %v13639_v62 }
 0x440   : > { %12705 = vmatpush3.bf16.msra.mxu0 %v16513_v13  ;;  %v13637_v13 = vld [vmem:[%s18318_s5 + $0x450] ss:$12 sps:$4 sm:$0xff]  }
 0x441   : > { %7208 = vmatpush1.bf16.msra.mxu1 %v13637_v13  ;;  %7256 = vmatprep.subr.bf16.mxu0 %v13672_v0 }
 0x442   : > { %7209 = vmatprep.subr.bf16.mxu1 %v13642_v16 }
 0x443   : > { %12707 = vmatmul.mubr.msk.bf16.vlgmr.msra.gmra.mxu0 %vm5361_vm4, %v16707_v47  ;;  %v13657_v47 = vld [vmem:[%s18318_s5 + $0x3c4] ss:$12 sps:$4 sm:$0xff]  }
 0x444   : > { %7280 = vmatprep.mubr.bf16.mxu0 %v14337_v28  ;;  %7257 = vmatpush1.bf16.msra.mxu0 %v13670_v55 }
 0x445   : > { %7210 = vmatpush1.bf16.msra.mxu1 %v13640_v31  ;;  %7258 = vmatprep.subr.bf16.mxu0 %v13678_v22  ;;  %v13728_v22 = vld [vmem:[%s18320_s7 + $0x34] ss:$8 sps:$4 sm:$0xff]  }
 0x446   : > { %7211 = vmatprep.subr.bf16.mxu1 %v13645_v3 }
 0x448   : > { %7259 = vmatpush1.bf16.msra.mxu0 %v13676_v54  ;;  %v13726_v54 = vld [vmem:[%s18320_s7 + $0x30] ss:$8 sps:$4 sm:$0xff]  }
 0x449   : > { %7212 = vmatpush1.bf16.msra.mxu1 %v13643_v26  ;;  %v6078_v10 = vpop.f32.mrf.mxu1  ;;  %7260 = vmatprep.subr.bf16.mxu0 %v13684_v46 }
 0x44a   : > { %7213 = vmatprep.subr.bf16.mxu1 %v13648_v43 }
 0x44b   : > { %v6080_v45 = vpop.f32.mrf.mxu1 }
 0x44c   : > { %7261 = vmatpush1.bf16.msra.mxu0 %v13682_v35  ;;  %v13729_v35 = vld [vmem:[%s18320_s7 + $0x20] ss:$8 sps:$4 sm:$0xff]  }
 0x44d   : > { %7214 = vmatpush1.bf16.msra.mxu1 %v13646_v19  ;;  %v6082_v48 = vpop.f32.mrf.mxu1  ;;  %7262 = vmatprep.subr.bf16.mxu0 %v13690_v11 }
 0x44e   : > { %7215 = vmatprep.subr.bf16.mxu1 %v13651_v60 }
 0x44f   : > { %v6084_v36 = vpop.f32.mrf.mxu1 }
 0x450   : > { %7263 = vmatpush1.bf16.msra.mxu0 %v13688_v41 }
 0x451   : > { %7216 = vmatpush1.bf16.msra.mxu1 %v13649_v7  ;;  %12589 = vmatprep.subr.bf16.mxu0 %v13694_v56  ;;  %v13735_v56 = vld [vmem:[%s18320_s7] ss:$8 sps:$4 sm:$0xff]  }
 0x452   : > { %7217 = vmatprep.subr.bf16.mxu1 %v13654_v25 }
 0x455   : > { %7218 = vmatpush1.bf16.msra.mxu1 %v13652_v20 }
 0x456   : > { %7219 = vmatprep.subr.bf16.mxu1 %v13657_v47 }
 0x459   : > { %7220 = vmatpush1.bf16.msra.mxu1 %v13655_v61  ;;  %v13714_v61 = vld [vmem:[%s18320_s7 + $0x70] ss:$8 sps:$4 sm:$0xff]  }
 0x45a   : > { %7221 = vmatprep.subr.bf16.mxu1 %v13660_v29  ;;  %v13716_v29 = vld [vmem:[%s18320_s7 + $0x74] ss:$8 sps:$4 sm:$0xff]  }
 0x45d   : > { %7222 = vmatpush2.bf16.msra.mxu1 %v13658_v4 }
 0x45e   : > { %7223 = vmatprep.subr.bf16.mxu1 %v13663_v38  ;;  %v13719_v38 = vld [vmem:[%s18320_s7 + $0x64] ss:$8 sps:$4 sm:$0xff]  }
 0x461   : > { %7224 = vmatpush2.bf16.msra.mxu1 %v13661_v33 }
 0x462   : > { %7225 = vmatprep.subr.bf16.mxu1 %v13666_v44 }
 0x465   : > { %7226 = vmatpush2.bf16.msra.mxu1 %v13664_v34  ;;  %v13717_v34 = vld [vmem:[%s18320_s7 + $0x60] ss:$8 sps:$4 sm:$0xff]  }
 0x466   : > { %7227 = vmatprep.subr.bf16.mxu1 %v13669_v8  ;;  %v13722_v8 = vld [vmem:[%s18320_s7 + $0x54] ss:$8 sps:$4 sm:$0xff]  }
 0x469   : > { %7228 = vmatpush2.bf16.msra.mxu1 %v13667_v51 }
 0x46a   : > { %7229 = vmatprep.subr.bf16.mxu1 %v13675_v37  ;;  %v13720_v37 = vld [vmem:[%s18320_s7 + $0x50] ss:$8 sps:$4 sm:$0xff]  }
 0x46d   : > { %7230 = vmatpush2.bf16.msra.mxu1 %v13673_v49  ;;  %v13725_v49 = vld [vmem:[%s18320_s7 + $0x44] ss:$8 sps:$4 sm:$0xff]  }
 0x46e   : > { %7231 = vmatprep.subr.bf16.mxu1 %v13681_v24  ;;  %v13731_v24 = vld [vmem:[%s18320_s7 + $0x24] ss:$8 sps:$4 sm:$0xff]  }
 0x471   : > { %7232 = vmatpush2.bf16.msra.mxu1 %v13679_v53 }
 0x472   : > { %7233 = vmatprep.subr.bf16.mxu1 %v13687_v42 }
 0x475   : > { %7234 = vmatpush2.bf16.msra.mxu1 %v13685_v1 }
 0x476   : > { %7235 = vmatprep.subr.bf16.mxu1 %v13693_v30  ;;  %v13732_v30 = vld [vmem:[%s18320_s7 + $0x10] ss:$8 sps:$4 sm:$0xff]  }
 0x479   : > { %7236 = vmatpush2.bf16.msra.mxu1 %v13691_v15  ;;  %v13737_v15 = vld [vmem:[%s18320_s7 + $0x4] ss:$8 sps:$4 sm:$0xff]  }
 0x47a   : > { %7632 = vmatprep.subr.bf16.mxu1 %v13716_v29  ;;  %v13696_v29 = vld [vmem:[%s18318_s5 + $0x518] ss:$12 sps:$4 sm:$0xff]  }
 0x489   : > { %v6569_v5 = vpop.f32.mrf.mxu1 }
 0x48b   : > { %v6121_v63 = vpop.f32.mrf.mxu0  ;;  %v6571_v40 = vpop.f32.mrf.mxu1 }
 0x48c   : > { %v6122_v32 = vadd.f32 %v6121_v63, %v6078_v10  ;;  %v13723_v10 = vld [vmem:[%s18320_s7 + $0x40] ss:$8 sps:$4 sm:$0xff]   ;;  %v13738_v63 = vld [vmem:[%s18320_s7 + $0xf0] ss:$8 sps:$4 sm:$0xff]  }
 0x48d   : > { %v6123_v18 = vpop.f32.mrf.mxu0  ;;  %v6573_v57 = vpop.f32.mrf.mxu1 }
 0x48e   : > { %v6124_v17 = vadd.f32 %v6123_v18, %v6080_v45  ;;  %v6570_v9 = vadd.f32 %v6569_v5, %v6122_v32  ;;  %v13740_v5 = vld [vmem:[%s18320_s7 + $0xf4] ss:$8 sps:$4 sm:$0xff]   ;;  %v13741_v32 = vld [vmem:[%s18320_s7 + $0xe0] ss:$8 sps:$4 sm:$0xff]  }
 0x48f   : > { %v6125_v52 = vpop.f32.mrf.mxu0  ;;  %v6575_v27 = vpop.f32.mrf.mxu1  ;;  %v13746_v18 = vld [vmem:[%s18320_s7 + $0xd4] ss:$8 sps:$4 sm:$0xff]  }
 0x490   : > { %v6126_v39 = vadd.f32 %v6125_v52, %v6082_v48  ;;  %v6572_v6 = vadd.f32 %v6571_v40, %v6124_v17  ;;  %v13734_v48 = vld [vmem:[%s18320_s7 + $0x14] ss:$8 sps:$4 sm:$0xff]   ;;  %v13743_v40 = vld [vmem:[%s18320_s7 + $0xe4] ss:$8 sps:$4 sm:$0xff]  }
 0x491   : > { %v6127_v14 = vpop.f32.mrf.mxu0  ;;  %v6748_v23 = vpop.f32.mrf.mxu1  ;;  %v13749_v17 = vld [vmem:[%s18320_s7 + $0xc4] ss:$8 sps:$4 sm:$0xff]  }
 0x492   : > { %v6128_v2 = vadd.f32 %v6127_v14, %v6084_v36  ;;  %v6574_v62 = vadd.f32 %v6573_v57, %v6126_v39  ;;  %v13744_v57 = vld [vmem:[%s18320_s7 + $0xd0] ss:$8 sps:$4 sm:$0xff]  }
 0x493   : > { %v6750_v13 = vpop.f32.mrf.mxu1 }
 0x494   : > { %v6576_v16 = vadd.f32 %v6575_v27, %v6128_v2 }
 0x495   : > { %v6752_v31 = vpop.f32.mrf.mxu1 }
 0x496   : > { %v16994_v3 = vpack.c.bf16 %v6752_v31, %v6748_v23 }
 0x497   : > { %v6754_v26 = vpop.f32.mrf.mxu1 }
 0x498   : > { %v16996_v43 = vpack.c.bf16 %v6754_v26, %v6750_v13 }
 0x49a   : > { %7237 = vmatprep.mubr.bf16.mxu1 %v16996_v43 }
 0x49b   : > { %7238 = vmatmul.mubr.bf16.vlgmr.msra.gmra.mxu1 %v16994_v3 }
 0x49c   : > { %7633 = vmatpush1.bf16.msra.mxu1 %v13714_v61 }
 0x49d   : > { %7634 = vmatprep.subr.bf16.mxu1 %v13719_v38  ;;  %v13697_v38 = vld [vmem:[%s18318_s5 + $0x458] ss:$12 sps:$4 sm:$0xff]  }
 0x4a0   : > { %7635 = vmatpush1.bf16.msra.mxu1 %v13717_v34  ;;  %v13700_v34 = vld [vmem:[%s18318_s5 + $0x4e8] ss:$12 sps:$4 sm:$0xff]  }
 0x4a1   : > { %7636 = vmatprep.subr.bf16.mxu1 %v13722_v8  ;;  %v13702_v8 = vld [vmem:[%s18318_s5 + $0x4d0] ss:$12 sps:$4 sm:$0xff]  }
 0x4a4   : > { %7637 = vmatpush1.bf16.msra.mxu1 %v13720_v37  ;;  %v13706_v37 = vld [vmem:[%s18318_s5 + $0x4a0] ss:$12 sps:$4 sm:$0xff]  }
 0x4a5   : > { %7638 = vmatprep.subr.bf16.mxu1 %v13725_v49  ;;  %v13707_v49 = vld [vmem:[%s18318_s5 + $0x3e0] ss:$12 sps:$4 sm:$0xff]  }
 0x4a8   : > { %7639 = vmatpush1.bf16.msra.mxu1 %v13723_v10  ;;  %v13708_v10 = vld [vmem:[%s18318_s5 + $0x488] ss:$12 sps:$4 sm:$0xff]  }
 0x4a9   : > { %7640 = vmatprep.subr.bf16.mxu1 %v13728_v22  ;;  %v13709_v22 = vld [vmem:[%s18318_s5 + $0x3c8] ss:$12 sps:$4 sm:$0xff]  }
 0x4ab   : > { %v12548_v19 = vpop.f32.mrf.mxu0 }
 0x4ac   : > { %7641 = vmatpush1.bf16.msra.mxu1 %v13726_v54  ;;  %v13710_v54 = vld [vmem:[%s18318_s5 + $0x590] ss:$12 sps:$4 sm:$0xff]  }
 0x4ad   : > { %v12549_v60 = vpop.f32.mrf.mxu0  ;;  %7642 = vmatprep.subr.bf16.mxu1 %v13731_v24  ;;  %v13711_v24 = vld [vmem:[%s18318_s5 + $0x578] ss:$12 sps:$4 sm:$0xff]  }
 0x4ae   : > { %v12550_v7 = vadd.f32 %v12549_v60, %v12548_v19 }
 0x4af   : > { %v12551_v25 = vpop.f32.mrf.mxu0 }
 0x4b0   : > { %7643 = vmatpush1.bf16.msra.mxu1 %v13729_v35  ;;  %v13750_v35 = vld [vmem:[%s18320_s7 + $0xb0] ss:$8 sps:$4 sm:$0xff]  }
 0x4b1   : > { %v12552_v20 = vpop.f32.mrf.mxu0  ;;  %7644 = vmatprep.subr.bf16.mxu1 %v13734_v48  ;;  %v13755_v48 = vld [vmem:[%s18320_s7 + $0xa4] ss:$8 sps:$4 sm:$0xff]  }
 0x4b2   : > { %v12553_v47 = vadd.f32 %v12552_v20, %v12551_v25 }
 0x4b4   : > { %7645 = vmatpush1.bf16.msra.mxu1 %v13732_v30  ;;  %v13761_v30 = vld [vmem:[%s18320_s7 + $0x84] ss:$8 sps:$4 sm:$0xff]  }
 0x4b5   : > { %7646 = vmatprep.subr.bf16.mxu1 %v13737_v15  ;;  %v13759_v15 = vld [vmem:[%s18320_s7 + $0x80] ss:$8 sps:$4 sm:$0xff]  }
 0x4b8   : > { %7647 = vmatpush1.bf16.msra.mxu1 %v13735_v56  ;;  %v13764_v56 = vld [vmem:[%s18320_s7 + $0x114] ss:$8 sps:$4 sm:$0xff]  }
 0x4b9   : > { %7648 = vmatprep.subr.bf16.mxu1 %v13740_v5  ;;  %v13762_v5 = vld [vmem:[%s18320_s7 + $0x110] ss:$8 sps:$4 sm:$0xff]  }
 0x4bb   : > { %v6205_v4 = vpop.f32.mrf.mxu0 }
 0x4bc   : > { %v6206_v33 = vadd.f32 %v12550_v7, %v6205_v4  ;;  %7649 = vmatpush2.bf16.msra.mxu1 %v13738_v63  ;;  %v13767_v63 = vld [vmem:[%s18320_s7 + $0x234] ss:$8 sps:$4 sm:$0xff]  }
 0x4bd   : > { %v12688_v44 = vpop.f32.mrf.mxu0  ;;  %7650 = vmatprep.subr.bf16.mxu1 %v13743_v40  ;;  %v13770_v40 = vld [vmem:[%s18320_s7 + $0x104] ss:$8 sps:$4 sm:$0xff]  }
 0x4be   : > { %v13699_v44 = vld [vmem:[%s18318_s5 + $0x440] ss:$12 sps:$4 sm:$0xff]  }
 0x4bf   : > { %v6208_v55 = vpop.f32.mrf.mxu0 }
 0x4c0   : > { %v6209_v51 = vadd.f32 %v12553_v47, %v6208_v55  ;;  %7651 = vmatpush2.bf16.msra.mxu1 %v13741_v32  ;;  %v13695_v47 = vld [vmem:[%s18318_s5 + $0x470] ss:$12 sps:$4 sm:$0xff]   ;;  %v13768_v32 = vld [vmem:[%s18320_s7 + $0x100] ss:$8 sps:$4 sm:$0xff]  }
 0x4c1   : > { %v12689_v0 = vpop.f32.mrf.mxu0  ;;  %7652 = vmatprep.subr.bf16.mxu1 %v13746_v18  ;;  %v13703_v55 = vld [vmem:[%s18318_s5 + $0x410] ss:$12 sps:$4 sm:$0xff]  }
 0x4c2   : > { %v13705_v0 = vld [vmem:[%s18318_s5 + $0x3f8] ss:$12 sps:$4 sm:$0xff]   ;;  %v13776_v18 = vld [vmem:[%s18320_s7 + $0x194] ss:$8 sps:$4 sm:$0xff]  }
 0x4c4   : > { %7653 = vmatpush2.bf16.msra.mxu1 %v13744_v57 }
 0x4c5   : > { %7654 = vmatprep.subr.bf16.mxu1 %v13749_v17 }
 0x4cb   : > { %v6612_v45 = vpop.f32.mrf.mxu0 }
 0x4cc   : > { %v17033_v53 = vadd.f32 %v6612_v45, %v6570_v9  ;;  %v13747_v9 = vld [vmem:[%s18320_s7 + $0xc0] ss:$8 sps:$4 sm:$0xff]  }
 0x4cd   : > { %v6614_v46 = vpop.f32.mrf.mxu0  ;;  %7655 = vmatpush2.bf16.msra.mxu1 %v13747_v9  ;;  %v13712_v45 = vld [vmem:[%s18318_s5 + $0x560] ss:$12 sps:$4 sm:$0xff]  }
 0x4ce   : > { %v17038_v42 = vadd.f32 %v6614_v46, %v6572_v6  ;;  %v13752_v46 = vld [vmem:[%s18320_s7 + $0xb4] ss:$8 sps:$4 sm:$0xff]  }
 0x4cf   : > { %v6616_v1 = vpop.f32.mrf.mxu0  ;;  %7656 = vmatprep.subr.bf16.mxu1 %v13752_v46 }
 0x4d0   : > { %v17043_v11 = vadd.f32 %v6616_v1, %v6574_v62  ;;  %v13758_v1 = vld [vmem:[%s18320_s7 + $0x94] ss:$8 sps:$4 sm:$0xff]  }
 0x4d1   : > { %v6618_v41 = vpop.f32.mrf.mxu0  ;;  %7657 = vmatpush2.bf16.msra.mxu1 %v13750_v35 }
 0x4d2   : > { %v17048_v36 = vadd.f32 %v6618_v41, %v6576_v16  ;;  %7658 = vmatprep.subr.bf16.mxu1 %v13755_v48  ;;  %v13756_v41 = vld [vmem:[%s18320_s7 + $0x90] ss:$8 sps:$4 sm:$0xff]  }
 0x4eb   : > { %v12575_v52 = vpop.f32.mrf.mxu0 }
 0x4ed   : > { %v12576_v27 = vpop.f32.mrf.mxu0 }
 0x4ee   : > { %v12577_v39 = vadd.f32 %v12576_v27, %v12575_v52  ;;  %v7379_v52 = vld [vmem:[%s18319_s6] sm:$0x7] }
 0x4ef   : > { %v12578_v6 = vpop.f32.mrf.mxu0  ;;  %v7392_v46 = vrot.slane %v7379_v52, %v5325_v50  ;;  %v13782_v50 = vld [vmem:[%s18320_s7 + $0x184] ss:$8 sps:$4 sm:$0xff]  }
 0x4f0   : > { %v6656_v14 = vadd.f32 %v12577_v39, %v6206_v33  ;;  %v13698_v33 = vld [vmem:[%s18318_s5 + $0x500] ss:$12 sps:$4 sm:$0xff]  }
 0x4f1   : > { %v12579_v23 = vpop.f32.mrf.mxu0 }
 0x4f2   : > { %v12580_v2 = vadd.f32 %v12579_v23, %v12578_v6  ;;  %v7384_v23 = vrot.slane %v7379_v52, %v16347_v58 }
 0x4f4   : > { %v6659_v62 = vadd.f32 %v12580_v2, %v6209_v51  ;;  %v13704_v51 = vld [vmem:[%s18318_s5 + $0x4b8] ss:$12 sps:$4 sm:$0xff]  }
 0x4fb   : > { %v6696_v13 = vpop.f32.mrf.mxu0 }
 0x4fc   : > { %v17080_v16 = vadd.f32 %v6696_v13, %v6656_v14 }
 0x4fd   : > { %v12700_v31 = vpop.f32.mrf.mxu0 }
 0x4ff   : > { %v6699_v26 = vpop.f32.mrf.mxu0 }
 0x500   : > { %v17082_v19 = vadd.f32 %v6699_v26, %v6659_v62  ;;  %v7388_v26 = vrot.slane %v7379_v52, %v16355_v21  ;;  %v13791_v52 = vld [vmem:[%s18320_s7 + $0x294] ss:$8 sps:$4 sm:$0xff]  }
 0x501   : > { %v12701_v60 = vpop.f32.mrf.mxu0 }
 0x503   : > { %v6791_v7 = vpop.f32.mrf.mxu0 }
 0x505   : > { %v12708_v25 = vpop.f32.mrf.mxu0 }
 0x507   : > { %v6794_v20 = vpop.f32.mrf.mxu0 }
 0x508   : > { %v6800_v61 = vpack.c.bf16 %v6794_v20, %v6791_v7 }
 0x509   : > { %v12709_v4 = vpop.f32.mrf.mxu0 }
 0x50a   : > { %11591 = vmatmul.mubr.msk.bf16.vlgmr.msra.gmra.mxu0 %vm2750_vm1, %v6800_v61 }
 0x50b   : > { %12590 = vmatpush3.bf16.msra.mxu0 %v13695_v47  ;;  %7323 = vmatprep.mubr.bf16.mxu0 %v16996_v43  ;;  %v13701_v43 = vld [vmem:[%s18318_s5 + $0x428] ss:$12 sps:$4 sm:$0xff]  }
 0x50c   : > { %12591 = vmatprep.subr.bf16.mxu0 %v13696_v29 }
 0x50f   : > { %12592 = vmatpush3.bf16.msra.mxu0 %v13697_v38 }
 0x510   : > { %12593 = vmatprep.subr.bf16.mxu0 %v13698_v33 }
 0x513   : > { %12594 = vmatpush3.bf16.msra.mxu0 %v13699_v44 }
 0x514   : > { %12595 = vmatprep.subr.bf16.mxu0 %v13700_v34 }
 0x517   : > { %12596 = vmatpush3.bf16.msra.mxu0 %v13701_v43 }
 0x518   : > { %12597 = vmatprep.subr.bf16.mxu0 %v13702_v8  ;;  %v13765_v8 = vld [vmem:[%s18320_s7 + $0x230] ss:$8 sps:$4 sm:$0xff]  }
 0x51b   : > { %12598 = vmatpush3.bf16.msra.mxu0 %v13703_v55  ;;  %v13779_v55 = vld [vmem:[%s18320_s7 + $0x2b4] ss:$8 sps:$4 sm:$0xff]  }
 0x51c   : > { %12599 = vmatprep.subr.bf16.mxu0 %v13704_v51 }
 0x51f   : > { %12600 = vmatpush3.bf16.msra.mxu0 %v13705_v0 }
 0x520   : > { %12601 = vmatprep.subr.bf16.mxu0 %v13706_v37 }
 0x523   : > { %12602 = vmatpush3.bf16.msra.mxu0 %v13707_v49 }
 0x524   : > { %12603 = vmatprep.subr.bf16.mxu0 %v13708_v10 }
 0x527   : > { %12604 = vmatpush3.bf16.msra.mxu0 %v13709_v22 }
 0x528   : > { %12710 = vmatprep.subr.bf16.mxu0 %v14338_v59 }
 0x52a   : > { %7324 = vmatmul.mubr.bf16.vlgmr.msra.gmra.mxu0 %v16994_v3  ;;  %v13713_v3 = vld [vmem:[%s18318_s5 + $0x548] ss:$12 sps:$4 sm:$0xff]  }
 0x52b   : > { %12711 = vmatpush3.bf16.msra.mxu0 %v13710_v54  ;;  %12718 = vmatprep.mubr.msk.bf16.mxu0 %vm14339_vm2, %v14338_v59 }
 0x52c   : > { %12712 = vmatprep.subr.bf16.mxu0 %v14338_v59 }
 0x52f   : > { %12713 = vmatpush3.bf16.msra.mxu0 %v13711_v24 }
 0x530   : > { %12714 = vmatprep.subr.bf16.mxu0 %v14338_v59 }
 0x533   : > { %12715 = vmatpush3.bf16.msra.mxu0 %v13712_v45 }
 0x534   : > { %12716 = vmatprep.subr.bf16.mxu0 %v14338_v59  ;;  %v13753_v59 = vld [vmem:[%s18320_s7 + $0xa0] ss:$8 sps:$4 sm:$0xff]  }
 0x535   : > { %7659 = vmatpush2.bf16.msra.mxu1 %v13753_v59 }
 0x536   : > { %7660 = vmatprep.subr.bf16.mxu1 %v13758_v1 }
 0x537   : > { %12717 = vmatpush3.bf16.msra.mxu0 %v13713_v3 }
 0x538   : > { %7685 = vmatprep.subr.bf16.mxu0 %v13764_v56 }
 0x539   : > { %7661 = vmatpush2.bf16.msra.mxu1 %v13756_v41 }
 0x53a   : > { %12719 = vmatmul.mubr.msk.bf16.vlgmr.msra.gmra.mxu0 %vm2750_vm1, %v6800_v61  ;;  %7662 = vmatprep.subr.bf16.mxu1 %v13761_v30 }
 0x53b   : > { %7705 = vmatprep.mubr.bf16.mxu0 %v14337_v28  ;;  %7686 = vmatpush1.bf16.msra.mxu0 %v13762_v5  ;;  %v13774_v5 = vld [vmem:[%s18320_s7 + $0x190] ss:$8 sps:$4 sm:$0xff]  }
 0x53c   : > { %7687 = vmatprep.subr.bf16.mxu0 %v13770_v40 }
 0x53d   : > { %7663 = vmatpush2.bf16.msra.mxu1 %v13759_v15 }
 0x53e   : > { %8016 = vmatprep.subr.bf16.mxu1 %v13767_v63 }
 0x53f   : > { %7688 = vmatpush1.bf16.msra.mxu0 %v13768_v32  ;;  %v13785_v32 = vld [vmem:[%s18320_s7 + $0x2a4] ss:$8 sps:$4 sm:$0xff]  }
 0x540   : > { %7963 = vmatprep.subr.bf16.mxu0 %v13776_v18  ;;  %v13780_v18 = vld [vmem:[%s18320_s7 + $0x180] ss:$8 sps:$4 sm:$0xff]  }
 0x55b   : > { %v7239_v57 = vpop.f32.mrf.mxu1 }
 0x55d   : > { %v7241_v17 = vpop.f32.mrf.mxu1 }
 0x55f   : > { %v7243_v27 = vpop.f32.mrf.mxu1 }
 0x561   : > { %v7245_v13 = vpop.f32.mrf.mxu1 }
 0x5ca   : > { %v7282_v9 = vpop.f32.mrf.mxu0 }
 0x5cb   : > { %v7283_v39 = vadd.f32 %v7282_v9, %v7239_v57  ;;  %v13783_v9 = vld [vmem:[%s18320_s7 + $0x2a0] ss:$8 sps:$4 sm:$0xff]  }
 0x5cc   : > { %v7284_v6 = vpop.f32.mrf.mxu0 }
 0x5cd   : > { %v7373_v14 = vadd.f32 %v7283_v39, %v17033_v53  ;;  %v7285_v2 = vadd.f32 %v7284_v6, %v7241_v17  ;;  %v13788_v17 = vld [vmem:[%s18320_s7 + $0x174] ss:$8 sps:$4 sm:$0xff]   ;;  %v13794_v39 = vld [vmem:[%s18320_s7 + $0x164] ss:$8 sps:$4 sm:$0xff]   ;;  %v13789_v6 = vld [vmem:[%s18320_s7 + $0x290] ss:$8 sps:$4 sm:$0xff]  }
 0x5ce   : > { %v7286_v62 = vpop.f32.mrf.mxu0 }
 0x5cf   : > { %v7374_v31 = vadd.f32 %v7285_v2, %v17038_v42  ;;  %v7287_v60 = vadd.f32 %v7286_v62, %v7243_v27  ;;  %v7396_v25 = vadd.f32 %v7384_v23, %v7373_v14  ;;  %v13786_v27 = vld [vmem:[%s18320_s7 + $0x170] ss:$8 sps:$4 sm:$0xff]   ;;  %v13797_v14 = vld [vmem:[%s18320_s7 + $0x284] ss:$8 sps:$4 sm:$0xff]   ;;  %v13800_v2 = vld [vmem:[%s18320_s7 + $0x154] ss:$8 sps:$4 sm:$0xff]  }
 0x5d0   : > { %v7288_v7 = vpop.f32.mrf.mxu0  ;;  %v13795_v62 = vld [vmem:[%s18320_s7 + $0x280] ss:$8 sps:$4 sm:$0xff]  }
 0x5d1   : > { %v7376_v20 = vadd.f32 %v7287_v60, %v17043_v11  ;;  %v7289_v47 = vadd.f32 %v7288_v7, %v7245_v13  ;;  %v7397_v61 = vadd.f32 %v7388_v26, %v7374_v31  ;;  %v7402_v53 = vmax.f32 %v7396_v25, 0.0  ;;  %v13773_v11 = vld [vmem:[%s18320_s7 + $0x224] ss:$8 sps:$4 sm:$0xff]   ;;  %v13803_v13 = vld [vmem:[%s18320_s7 + $0x274] ss:$8 sps:$4 sm:$0xff]  }
 0x5d2   : > { %v13798_v31 = vld [vmem:[%s18320_s7 + $0x150] ss:$8 sps:$4 sm:$0xff]   ;;  %v13809_v7 = vld [vmem:[%s18320_s7 + $0x264] ss:$8 sps:$4 sm:$0xff]   ;;  %v13804_v25 = vld [vmem:[%s18320_s7 + $0x140] ss:$8 sps:$4 sm:$0xff]  }
 0x5d3   : > { %v7399_v29 = vadd.f32 %v7384_v23, %v7376_v20  ;;  %v7377_v4 = vadd.f32 %v7289_v47, %v17048_v36  ;;  %v7403_v44 = vmax.f32 %v7397_v61, 0.0  ;;  %v13771_v36 = vld [vmem:[%s18320_s7 + $0x220] ss:$8 sps:$4 sm:$0xff]   ;;  %v13801_v60 = vld [vmem:[%s18320_s7 + $0x270] ss:$8 sps:$4 sm:$0xff]  }
 0x5d4   : > { %v13792_v23 = vld [vmem:[%s18320_s7 + $0x160] ss:$8 sps:$4 sm:$0xff]   ;;  %v13812_v20 = vld [vmem:[%s18320_s7 + $0x134] ss:$8 sps:$4 sm:$0xff]  }
 0x5d5   : > { %v7405_v38 = vmax.f32 %v7399_v29, 0.0  ;;  %v7400_v33 = vadd.f32 %v7388_v26, %v7377_v4  ;;  %v13806_v26 = vld [vmem:[%s18320_s7 + $0x144] ss:$8 sps:$4 sm:$0xff]   ;;  %v13807_v47 = vld [vmem:[%s18320_s7 + $0x260] ss:$8 sps:$4 sm:$0xff]  }
 0x5d6   : > { %v13815_v61 = vld [vmem:[%s18320_s7 + $0x254] ss:$8 sps:$4 sm:$0xff]   ;;  %v13810_v29 = vld [vmem:[%s18320_s7 + $0x130] ss:$8 sps:$4 sm:$0xff]   ;;  %v13818_v4 = vld [vmem:[%s18320_s7 + $0x124] ss:$8 sps:$4 sm:$0xff]  }
 0x5d7   : > { %v17203_v34 = vpack.c.bf16 %v7405_v38, %v7402_v53  ;;  %v7406_v43 = vmax.f32 %v7400_v33, 0.0  ;;  %v13813_v53 = vld [vmem:[%s18320_s7 + $0x250] ss:$8 sps:$4 sm:$0xff]   ;;  %v13821_v38 = vld [vmem:[%s18320_s7 + $0x244] ss:$8 sps:$4 sm:$0xff]  }
 0x5d8   : > { %v13816_v33 = vld [vmem:[%s18320_s7 + $0x120] ss:$8 sps:$4 sm:$0xff]  }
 0x5d9   : > { %v17205_v42 = vpack.c.bf16 %v7406_v43, %v7403_v44  ;;  %v13824_v44 = vld [vmem:[%s18320_s7 + $0x214] ss:$8 sps:$4 sm:$0xff]   ;;  %v13819_v43 = vld [vmem:[%s18320_s7 + $0x240] ss:$8 sps:$4 sm:$0xff]  }
 0x5db   : > { %7664 = vmatprep.mubr.bf16.mxu1 %v17205_v42  ;;  %v8105_v57 = vrot.slane %v17205_v42, 1 }
 0x5dc   : > { %7665 = vmatmul.mubr.bf16.vlgmr.msra.gmra.mxu1 %v17203_v34 }
 0x5dd   : > { %8017 = vmatpush1.bf16.msra.mxu1 %v13765_v8  ;;  %8036 = vmatprep.mubr.bf16.mxu1 %v14337_v28  ;;  %v13827_v8 = vld [vmem:[%s18320_s7 + $0x334] ss:$8 sps:$4 sm:$0xff]  }
 0x5de   : > { %8018 = vmatprep.subr.bf16.mxu1 %v13773_v11  ;;  %v13822_v11 = vld [vmem:[%s18320_s7 + $0x210] ss:$8 sps:$4 sm:$0xff]  }
 0x5e1   : > { %8019 = vmatpush1.bf16.msra.mxu1 %v13771_v36  ;;  %v13830_v36 = vld [vmem:[%s18320_s7 + $0x204] ss:$8 sps:$4 sm:$0xff]  }
 0x5e2   : > { %8292 = vmatprep.subr.bf16.mxu1 %v13779_v55  ;;  %v13825_v55 = vld [vmem:[%s18320_s7 + $0x330] ss:$8 sps:$4 sm:$0xff]  }
 0x5ea   : > { %v12605_v51 = vpop.f32.mrf.mxu0 }
 0x5ec   : > { %v12606_v0 = vpop.f32.mrf.mxu0 }
 0x5ed   : > { %v12607_v10 = vadd.f32 %v12606_v0, %v12605_v51  ;;  %v13833_v51 = vld [vmem:[%s18320_s7 + $0x324] ss:$8 sps:$4 sm:$0xff]   ;;  %v13828_v0 = vld [vmem:[%s18320_s7 + $0x200] ss:$8 sps:$4 sm:$0xff]  }
 0x5ee   : > { %v12608_v37 = vpop.f32.mrf.mxu0 }
 0x5f0   : > { %v12609_v49 = vpop.f32.mrf.mxu0 }
 0x5f1   : > { %v12610_v45 = vadd.f32 %v12609_v49, %v12608_v37  ;;  %v13836_v37 = vld [vmem:[%s18320_s7 + $0x1f4] ss:$8 sps:$4 sm:$0xff]   ;;  %v13831_v49 = vld [vmem:[%s18320_s7 + $0x320] ss:$8 sps:$4 sm:$0xff]  }
 0x5fa   : > { %v7366_v22 = vpop.f32.mrf.mxu0 }
 0x5fb   : > { %v7367_v54 = vadd.f32 %v12607_v10, %v7366_v22  ;;  %v13839_v10 = vld [vmem:[%s18320_s7 + $0x314] ss:$8 sps:$4 sm:$0xff]   ;;  %v13834_v22 = vld [vmem:[%s18320_s7 + $0x1f0] ss:$8 sps:$4 sm:$0xff]  }
 0x5fc   : > { %v12720_v24 = vpop.f32.mrf.mxu0 }
 0x5fd   : > { %v7375_v3 = vadd.f32 %v7367_v54, %v17080_v16  ;;  %v17235_v16 = vshrl.u32 %v17205_v42, 16  ;;  %v13842_v54 = vld [vmem:[%s18320_s7 + $0x1e4] ss:$8 sps:$4 sm:$0xff]   ;;  %v13837_v24 = vld [vmem:[%s18320_s7 + $0x310] ss:$8 sps:$4 sm:$0xff]  }
 0x5fe   : > { %v7369_v35 = vpop.f32.mrf.mxu0 }
 0x5ff   : > { %v7370_v48 = vadd.f32 %v12610_v45, %v7369_v35  ;;  %v7398_v1 = vadd.f32 %v7392_v46, %v7375_v3  ;;  %v13845_v45 = vld [vmem:[%s18320_s7 + $0x304] ss:$8 sps:$4 sm:$0xff]   ;;  %v13840_v3 = vld [vmem:[%s18320_s7 + $0x1e0] ss:$8 sps:$4 sm:$0xff]  }
 0x600   : > { %v12721_v59 = vpop.f32.mrf.mxu0  ;;  %v13843_v35 = vld [vmem:[%s18320_s7 + $0x300] ss:$8 sps:$4 sm:$0xff]  }
 0x601   : > { %v7378_v41 = vadd.f32 %v7370_v48, %v17082_v19  ;;  %v7404_v15 = vmax.f32 %v7398_v1, 0.0  ;;  %v13777_v19 = vld [vmem:[%s18320_s7 + $0x2b0] ss:$8 sps:$4 sm:$0xff]   ;;  %v13851_v48 = vld [vmem:[%s18320_s7 + $0x2f4] ss:$8 sps:$4 sm:$0xff]  }
 0x602   : > { %v13846_v59 = vld [vmem:[%s18320_s7 + $0x1d0] ss:$8 sps:$4 sm:$0xff]   ;;  %v13854_v1 = vld [vmem:[%s18320_s7 + $0x1c4] ss:$8 sps:$4 sm:$0xff]  }
 0x603   : > { %v7401_v30 = vadd.f32 %v7392_v46, %v7378_v41  ;;  %v13848_v46 = vld [vmem:[%s18320_s7 + $0x1d4] ss:$8 sps:$4 sm:$0xff]   ;;  %v13849_v41 = vld [vmem:[%s18320_s7 + $0x2f0] ss:$8 sps:$4 sm:$0xff]  }
 0x605   : > { %v7407_v56 = vmax.f32 %v7401_v30, 0.0  ;;  %v13857_v30 = vld [vmem:[%s18320_s7 + $0x2e4] ss:$8 sps:$4 sm:$0xff]  }
 0x607   : > { %v17229_v63 = vpack.c.bf16 %v7407_v56, %v7404_v15  ;;  %v13852_v15 = vld [vmem:[%s18320_s7 + $0x1c0] ss:$8 sps:$4 sm:$0xff]   ;;  %v13860_v56 = vld [vmem:[%s18320_s7 + $0x1b4] ss:$8 sps:$4 sm:$0xff]  }
 0x609   : > { %11629 = vmatmul.mubr.msk.bf16.vlgmr.msra.gmra.mxu0 %vm7628_vm5, %v17229_v63  ;;  %v17243_v40 = vshrl.u32 %v17229_v63, 16 }
 0x60a   : > { %7964 = vmatpush1.bf16.msra.mxu0 %v13774_v5  ;;  %7995 = vmatprep.mubr.bf16.mxu0 %v17235_v16  ;;  %v13855_v5 = vld [vmem:[%s18320_s7 + $0x2e0] ss:$8 sps:$4 sm:$0xff]  }
 0x60b   : > { %11702 = vmatmul.mubr.msk.bf16.vlgmr.msra.gmra.mxu1 %vm7628_vm5, %v17243_v40  ;;  %7965 = vmatprep.subr.bf16.mxu0 %v13782_v50  ;;  %v13863_v50 = vld [vmem:[%s18320_s7 + $0x2d4] ss:$8 sps:$4 sm:$0xff]  }
 0x60c   : > { %8293 = vmatpush1.bf16.msra.mxu1 %v13777_v19  ;;  %8324 = vmatprep.mubr.bf16.mxu1 %v8105_v57  ;;  %v13858_v19 = vld [vmem:[%s18320_s7 + $0x1b0] ss:$8 sps:$4 sm:$0xff]   ;;  %v13869_v57 = vld [vmem:[%s18320_s7 + $0x2c4] ss:$8 sps:$4 sm:$0xff]  }
 0x60d   : > { %8294 = vmatprep.subr.bf16.mxu1 %v13785_v32  ;;  %v13866_v32 = vld [vmem:[%s18320_s7 + $0x1a4] ss:$8 sps:$4 sm:$0xff]  }
 0x60e   : > { %7966 = vmatpush1.bf16.msra.mxu0 %v13780_v18  ;;  %v13861_v18 = vld [vmem:[%s18320_s7 + $0x2d0] ss:$8 sps:$4 sm:$0xff]  }
 0x60f   : > { %7967 = vmatprep.subr.bf16.mxu0 %v13788_v17  ;;  %v13864_v17 = vld [vmem:[%s18320_s7 + $0x1a0] ss:$8 sps:$4 sm:$0xff]  }
 0x610   : > { %8295 = vmatpush1.bf16.msra.mxu1 %v13783_v9  ;;  %v13872_v9 = vld [vmem:[%s18320_s7 + $0x354] ss:$8 sps:$4 sm:$0xff]  }
 0x611   : > { %8296 = vmatprep.subr.bf16.mxu1 %v13791_v52  ;;  %v13867_v52 = vld [vmem:[%s18320_s7 + $0x2c0] ss:$8 sps:$4 sm:$0xff]  }
 0x612   : > { %7968 = vmatpush1.bf16.msra.mxu0 %v13786_v27  ;;  %v13875_v27 = vld [vmem:[%s18320_s7 + $0x474] ss:$8 sps:$4 sm:$0xff]  }
 0x613   : > { %7969 = vmatprep.subr.bf16.mxu0 %v13794_v39  ;;  %v13870_v39 = vld [vmem:[%s18320_s7 + $0x350] ss:$8 sps:$4 sm:$0xff]  }
 0x614   : > { %8297 = vmatpush1.bf16.msra.mxu1 %v13789_v6  ;;  %v17436_v6 = vshrl.u32 %v17203_v34, 16 }
 0x615   : > { %8298 = vmatprep.subr.bf16.mxu1 %v13797_v14  ;;  %v13878_v14 = vld [vmem:[%s18320_s7 + $0x344] ss:$8 sps:$4 sm:$0xff]  }
 0x616   : > { %7970 = vmatpush1.bf16.msra.mxu0 %v13792_v23  ;;  %v13873_v23 = vld [vmem:[%s18320_s7 + $0x470] ss:$8 sps:$4 sm:$0xff]  }
 0x617   : > { %7971 = vmatprep.subr.bf16.mxu0 %v13800_v2  ;;  %v8104_v2 = vrot.slane %v17203_v34, 1 }
 0x618   : > { %8299 = vmatpush1.bf16.msra.mxu1 %v13795_v62  ;;  %v13881_v62 = vld [vmem:[%s18320_s7 + $0x464] ss:$8 sps:$4 sm:$0xff]  }
 0x619   : > { %8300 = vmatprep.subr.bf16.mxu1 %v13803_v13  ;;  %v13876_v13 = vld [vmem:[%s18320_s7 + $0x340] ss:$8 sps:$4 sm:$0xff]  }
 0x61a   : > { %7972 = vmatpush1.bf16.msra.mxu0 %v13798_v31  ;;  %v13884_v31 = vld [vmem:[%s18320_s7 + $0x3d4] ss:$8 sps:$4 sm:$0xff]  }
 0x61b   : > { %7973 = vmatprep.subr.bf16.mxu0 %v13806_v26  ;;  %v13879_v26 = vld [vmem:[%s18320_s7 + $0x460] ss:$8 sps:$4 sm:$0xff]  }
 0x61c   : > { %8301 = vmatpush1.bf16.msra.mxu1 %v13801_v60  ;;  %v13887_v60 = vld [vmem:[%s18320_s7 + $0x4f4] ss:$8 sps:$4 sm:$0xff]  }
 0x61d   : > { %8302 = vmatprep.subr.bf16.mxu1 %v13809_v7  ;;  %v13882_v7 = vld [vmem:[%s18320_s7 + $0x3d0] ss:$8 sps:$4 sm:$0xff]  }
 0x61e   : > { %7974 = vmatpush1.bf16.msra.mxu0 %v13804_v25  ;;  %v8106_v25 = vrot.slane %v17229_v63, 1 }
 0x61f   : > { %7975 = vmatprep.subr.bf16.mxu0 %v13812_v20  ;;  %v13890_v20 = vld [vmem:[%s18320_s7 + $0x3c4] ss:$8 sps:$4 sm:$0xff]  }
 0x620   : > { %8303 = vmatpush1.bf16.msra.mxu1 %v13807_v47  ;;  %v8431_v47 = vrot.slane %v17235_v16, 1 }
 0x621   : > { %8304 = vmatprep.subr.bf16.mxu1 %v13815_v61  ;;  %v13885_v61 = vld [vmem:[%s18320_s7 + $0x4f0] ss:$8 sps:$4 sm:$0xff]  }
 0x622   : > { %7976 = vmatpush1.bf16.msra.mxu0 %v13810_v29  ;;  %v8432_v29 = vrot.slane %v17243_v40, 1 }
 0x623   : > { %7977 = vmatprep.subr.bf16.mxu0 %v13818_v4  ;;  %v13893_v4 = vld [vmem:[%s18320_s7 + $0x4e4] ss:$8 sps:$4 sm:$0xff]  }
 0x624   : > { %8305 = vmatpush1.bf16.msra.mxu1 %v13813_v53  ;;  %v8757_v53 = vrot.slane %v17205_v42, 2 }
 0x625   : > { %8306 = vmatprep.subr.bf16.mxu1 %v13821_v38  ;;  %v13888_v38 = vld [vmem:[%s18320_s7 + $0x3c0] ss:$8 sps:$4 sm:$0xff]  }
 0x626   : > { %7978 = vmatpush1.bf16.msra.mxu0 %v13816_v33  ;;  %v13896_v33 = vld [vmem:[%s18320_s7 + $0x3b4] ss:$8 sps:$4 sm:$0xff]  }
 0x627   : > { %7979 = vmatprep.subr.bf16.mxu0 %v13824_v44  ;;  %v13891_v44 = vld [vmem:[%s18320_s7 + $0x4e0] ss:$8 sps:$4 sm:$0xff]  }
 0x628   : > { %8307 = vmatpush1.bf16.msra.mxu1 %v13819_v43  ;;  %v13899_v43 = vld [vmem:[%s18320_s7 + $0x4d4] ss:$8 sps:$4 sm:$0xff]  }
 0x629   : > { %8308 = vmatprep.subr.bf16.mxu1 %v13827_v8  ;;  %v13894_v8 = vld [vmem:[%s18320_s7 + $0x3b0] ss:$8 sps:$4 sm:$0xff]  }
 0x62a   : > { %7980 = vmatpush2.bf16.msra.mxu0 %v13822_v11  ;;  %v13902_v11 = vld [vmem:[%s18320_s7 + $0x3a4] ss:$8 sps:$4 sm:$0xff]  }
 0x62b   : > { %7981 = vmatprep.subr.bf16.mxu0 %v13830_v36  ;;  %v13897_v36 = vld [vmem:[%s18320_s7 + $0x4d0] ss:$8 sps:$4 sm:$0xff]  }
 0x62c   : > { %8309 = vmatpush2.bf16.msra.mxu1 %v13825_v55  ;;  %v13905_v55 = vld [vmem:[%s18320_s7 + $0x4c4] ss:$8 sps:$4 sm:$0xff]  }
 0x62d   : > { %8310 = vmatprep.subr.bf16.mxu1 %v13833_v51  ;;  %v13900_v51 = vld [vmem:[%s18320_s7 + $0x3a0] ss:$8 sps:$4 sm:$0xff]  }
 0x62e   : > { %7982 = vmatpush2.bf16.msra.mxu0 %v13828_v0  ;;  %v13908_v0 = vld [vmem:[%s18320_s7 + $0x394] ss:$8 sps:$4 sm:$0xff]  }
 0x62f   : > { %7983 = vmatprep.subr.bf16.mxu0 %v13836_v37  ;;  %v13903_v37 = vld [vmem:[%s18320_s7 + $0x4c0] ss:$8 sps:$4 sm:$0xff]  }
 0x630   : > { %8311 = vmatpush2.bf16.msra.mxu1 %v13831_v49  ;;  %v13911_v49 = vld [vmem:[%s18320_s7 + $0x4b4] ss:$8 sps:$4 sm:$0xff]  }
 0x631   : > { %8312 = vmatprep.subr.bf16.mxu1 %v13839_v10  ;;  %v13906_v10 = vld [vmem:[%s18320_s7 + $0x390] ss:$8 sps:$4 sm:$0xff]  }
 0x632   : > { %7984 = vmatpush2.bf16.msra.mxu0 %v13834_v22  ;;  %v13914_v22 = vld [vmem:[%s18320_s7 + $0x384] ss:$8 sps:$4 sm:$0xff]  }
 0x633   : > { %7985 = vmatprep.subr.bf16.mxu0 %v13842_v54  ;;  %v13909_v54 = vld [vmem:[%s18320_s7 + $0x4b0] ss:$8 sps:$4 sm:$0xff]  }
 0x634   : > { %8313 = vmatpush2.bf16.msra.mxu1 %v13837_v24  ;;  %v13917_v24 = vld [vmem:[%s18320_s7 + $0x4a4] ss:$8 sps:$4 sm:$0xff]  }
 0x635   : > { %8314 = vmatprep.subr.bf16.mxu1 %v13845_v45  ;;  %v13912_v45 = vld [vmem:[%s18320_s7 + $0x380] ss:$8 sps:$4 sm:$0xff]  }
 0x636   : > { %7986 = vmatpush2.bf16.msra.mxu0 %v13840_v3  ;;  %v13920_v3 = vld [vmem:[%s18320_s7 + $0x374] ss:$8 sps:$4 sm:$0xff]  }
 0x637   : > { %7987 = vmatprep.subr.bf16.mxu0 %v13848_v46  ;;  %v13915_v46 = vld [vmem:[%s18320_s7 + $0x4a0] ss:$8 sps:$4 sm:$0xff]  }
 0x638   : > { %8315 = vmatpush2.bf16.msra.mxu1 %v13843_v35  ;;  %v13923_v35 = vld [vmem:[%s18320_s7 + $0x494] ss:$8 sps:$4 sm:$0xff]  }
 0x639   : > { %8316 = vmatprep.subr.bf16.mxu1 %v13851_v48  ;;  %v13918_v48 = vld [vmem:[%s18320_s7 + $0x370] ss:$8 sps:$4 sm:$0xff]  }
 0x63a   : > { %7988 = vmatpush2.bf16.msra.mxu0 %v13846_v59  ;;  %v13926_v59 = vld [vmem:[%s18320_s7 + $0x364] ss:$8 sps:$4 sm:$0xff]  }
 0x63b   : > { %7989 = vmatprep.subr.bf16.mxu0 %v13854_v1  ;;  %v13921_v1 = vld [vmem:[%s18320_s7 + $0x490] ss:$8 sps:$4 sm:$0xff]  }
 0x63c   : > { %8317 = vmatpush2.bf16.msra.mxu1 %v13849_v41  ;;  %v13929_v41 = vld [vmem:[%s18320_s7 + $0x484] ss:$8 sps:$4 sm:$0xff]  }
 0x63d   : > { %8318 = vmatprep.subr.bf16.mxu1 %v13857_v30  ;;  %v13924_v30 = vld [vmem:[%s18320_s7 + $0x360] ss:$8 sps:$4 sm:$0xff]  }
 0x63e   : > { %7990 = vmatpush2.bf16.msra.mxu0 %v13852_v15  ;;  %v13932_v15 = vld [vmem:[%s18320_s7 + $0x454] ss:$8 sps:$4 sm:$0xff]  }
 0x63f   : > { %7991 = vmatprep.subr.bf16.mxu0 %v13860_v56  ;;  %v13927_v56 = vld [vmem:[%s18320_s7 + $0x480] ss:$8 sps:$4 sm:$0xff]  }
 0x640   : > { %8319 = vmatpush2.bf16.msra.mxu1 %v13855_v5  ;;  %v13935_v5 = vld [vmem:[%s18320_s7 + $0x574] ss:$8 sps:$4 sm:$0xff]  }
 0x641   : > { %8320 = vmatprep.subr.bf16.mxu1 %v13863_v50  ;;  %v13930_v50 = vld [vmem:[%s18320_s7 + $0x450] ss:$8 sps:$4 sm:$0xff]  }
 0x642   : > { %7992 = vmatpush2.bf16.msra.mxu0 %v13858_v19  ;;  %v13938_v19 = vld [vmem:[%s18320_s7 + $0x444] ss:$8 sps:$4 sm:$0xff]  }
 0x643   : > { %7993 = vmatprep.subr.bf16.mxu0 %v13866_v32  ;;  %v13933_v32 = vld [vmem:[%s18320_s7 + $0x570] ss:$8 sps:$4 sm:$0xff]  }
 0x644   : > { %8321 = vmatpush2.bf16.msra.mxu1 %v13861_v18  ;;  %v13941_v18 = vld [vmem:[%s18320_s7 + $0x564] ss:$8 sps:$4 sm:$0xff]  }
 0x645   : > { %8322 = vmatprep.subr.bf16.mxu1 %v13869_v57  ;;  %v13936_v57 = vld [vmem:[%s18320_s7 + $0x440] ss:$8 sps:$4 sm:$0xff]  }
 0x646   : > { %7994 = vmatpush2.bf16.msra.mxu0 %v13864_v17  ;;  %v13944_v17 = vld [vmem:[%s18320_s7 + $0x434] ss:$8 sps:$4 sm:$0xff]  }
 0x647   : > { %8345 = vmatprep.subr.bf16.mxu0 %v13872_v9  ;;  %v13939_v9 = vld [vmem:[%s18320_s7 + $0x560] ss:$8 sps:$4 sm:$0xff]  }
 0x648   : > { %8323 = vmatpush2.bf16.msra.mxu1 %v13867_v52  ;;  %v13947_v52 = vld [vmem:[%s18320_s7 + $0x554] ss:$8 sps:$4 sm:$0xff]  }
 0x649   : > { %7996 = vmatmul.mubr.bf16.vlgmr.msra.gmra.mxu0 %v17436_v6  ;;  %8671 = vmatprep.subr.bf16.mxu1 %v13875_v27  ;;  %v13942_v27 = vld [vmem:[%s18320_s7 + $0x430] ss:$8 sps:$4 sm:$0xff]  }
 0x64a   : > { %8346 = vmatpush1.bf16.msra.mxu0 %v13870_v39  ;;  %8365 = vmatprep.mubr.bf16.mxu0 %v14337_v28  ;;  %v13950_v39 = vld [vmem:[%s18320_s7 + $0x424] ss:$8 sps:$4 sm:$0xff]  }
 0x64b   : > { %8325 = vmatmul.mubr.bf16.vlgmr.msra.gmra.mxu1 %v8104_v2  ;;  %8347 = vmatprep.subr.bf16.mxu0 %v13878_v14  ;;  %v13945_v14 = vld [vmem:[%s18320_s7 + $0x550] ss:$8 sps:$4 sm:$0xff]   ;;  %v13948_v2 = vld [vmem:[%s18320_s7 + $0x420] ss:$8 sps:$4 sm:$0xff]  }
 0x64c   : > { %8672 = vmatpush1.bf16.msra.mxu1 %v13873_v23  ;;  %8691 = vmatprep.mubr.bf16.mxu1 %v14337_v28  ;;  %v13953_v23 = vld [vmem:[%s18320_s7 + $0x544] ss:$8 sps:$4 sm:$0xff]  }
 0x64d   : > { %8673 = vmatprep.subr.bf16.mxu1 %v13881_v62  ;;  %v13956_v62 = vld [vmem:[%s18320_s7 + $0x414] ss:$8 sps:$4 sm:$0xff]  }
 0x64e   : > { %8348 = vmatpush1.bf16.msra.mxu0 %v13876_v13  ;;  %v13951_v13 = vld [vmem:[%s18320_s7 + $0x540] ss:$8 sps:$4 sm:$0xff]  }
 0x64f   : > { %8618 = vmatprep.subr.bf16.mxu0 %v13884_v31  ;;  %v13959_v31 = vld [vmem:[%s18320_s7 + $0x534] ss:$8 sps:$4 sm:$0xff]  }
 0x650   : > { %8674 = vmatpush1.bf16.msra.mxu1 %v13879_v26  ;;  %v13954_v26 = vld [vmem:[%s18320_s7 + $0x410] ss:$8 sps:$4 sm:$0xff]  }
 0x651   : > { %11775 = vmatmul.mubr.msk.bf16.vlgmr.msra.gmra.mxu0 %vm7628_vm5, %v8106_v25  ;;  %8944 = vmatprep.subr.bf16.mxu1 %v13887_v60  ;;  %v13962_v60 = vld [vmem:[%s18320_s7 + $0x404] ss:$8 sps:$4 sm:$0xff]  }
 0x652   : > { %8619 = vmatpush1.bf16.msra.mxu0 %v13882_v7  ;;  %8650 = vmatprep.mubr.bf16.mxu0 %v8431_v47  ;;  %v13957_v7 = vld [vmem:[%s18320_s7 + $0x530] ss:$8 sps:$4 sm:$0xff]   ;;  %v13965_v25 = vld [vmem:[%s18320_s7 + $0x524] ss:$8 sps:$4 sm:$0xff]   ;;  %v13968_v47 = vld [vmem:[%s18320_s7 + $0x3f4] ss:$8 sps:$4 sm:$0xff]  }
 0x653   : > { %11848 = vmatmul.mubr.msk.bf16.vlgmr.msra.gmra.mxu1 %vm7628_vm5, %v8432_v29  ;;  %8620 = vmatprep.subr.bf16.mxu0 %v13890_v20  ;;  %v13960_v20 = vld [vmem:[%s18320_s7 + $0x400] ss:$8 sps:$4 sm:$0xff]   ;;  %v13971_v29 = vld [vmem:[%s18320_s7 + $0x514] ss:$8 sps:$4 sm:$0xff]  }
 0x654   : > { %8945 = vmatpush1.bf16.msra.mxu1 %v13885_v61  ;;  %8976 = vmatprep.mubr.bf16.mxu1 %v8757_v53  ;;  %v13963_v61 = vld [vmem:[%s18320_s7 + $0x520] ss:$8 sps:$4 sm:$0xff]   ;;  %v13974_v53 = vld [vmem:[%s18320_s7 + $0x3e4] ss:$8 sps:$4 sm:$0xff]  }
 0x655   : > { %8946 = vmatprep.subr.bf16.mxu1 %v13893_v4  ;;  %v13966_v4 = vld [vmem:[%s18320_s7 + $0x3f0] ss:$8 sps:$4 sm:$0xff]  }
 0x656   : > { %8621 = vmatpush1.bf16.msra.mxu0 %v13888_v38  ;;  %v13969_v38 = vld [vmem:[%s18320_s7 + $0x510] ss:$8 sps:$4 sm:$0xff]  }
 0x657   : > { %8622 = vmatprep.subr.bf16.mxu0 %v13896_v33  ;;  %v13977_v33 = vld [vmem:[%s18320_s7 + $0x504] ss:$8 sps:$4 sm:$0xff]  }
 0x658   : > { %8947 = vmatpush1.bf16.msra.mxu1 %v13891_v44  ;;  %v13972_v44 = vld [vmem:[%s18320_s7 + $0x3e0] ss:$8 sps:$4 sm:$0xff]  }
 0x659   : > { %8948 = vmatprep.subr.bf16.mxu1 %v13899_v43  ;;  %v13980_v43 = vld [vmem:[%s18320_s7 + $0x594] ss:$8 sps:$4 sm:$0xff]  }
 0x65a   : > { %8623 = vmatpush1.bf16.msra.mxu0 %v13894_v8  ;;  %v13975_v8 = vld [vmem:[%s18320_s7 + $0x500] ss:$8 sps:$4 sm:$0xff]  }
 0x65b   : > { %8624 = vmatprep.subr.bf16.mxu0 %v13902_v11  ;;  %v13983_v11 = vld [vmem:[%s18320_s7 + $0x6b4] ss:$8 sps:$4 sm:$0xff]  }
 0x65c   : > { %8949 = vmatpush1.bf16.msra.mxu1 %v13897_v36  ;;  %v13978_v36 = vld [vmem:[%s18320_s7 + $0x590] ss:$8 sps:$4 sm:$0xff]  }
 0x65d   : > { %8950 = vmatprep.subr.bf16.mxu1 %v13905_v55  ;;  %v8430_v55 = vrot.slane %v17436_v6, 1 }
 0x65e   : > { %8625 = vmatpush1.bf16.msra.mxu0 %v13900_v51  ;;  %v13986_v51 = vld [vmem:[%s18320_s7 + $0x584] ss:$8 sps:$4 sm:$0xff]  }
 0x65f   : > { %8626 = vmatprep.subr.bf16.mxu0 %v13908_v0  ;;  %v13981_v0 = vld [vmem:[%s18320_s7 + $0x6b0] ss:$8 sps:$4 sm:$0xff]  }
 0x660   : > { %8951 = vmatpush1.bf16.msra.mxu1 %v13903_v37  ;;  %v8756_v37 = vrot.slane %v17203_v34, 2 }
 0x661   : > { %8952 = vmatprep.subr.bf16.mxu1 %v13911_v49  ;;  %v13989_v49 = vld [vmem:[%s18320_s7 + $0x6a4] ss:$8 sps:$4 sm:$0xff]  }
 0x662   : > { %8627 = vmatpush1.bf16.msra.mxu0 %v13906_v10  ;;  %v13984_v10 = vld [vmem:[%s18320_s7 + $0x580] ss:$8 sps:$4 sm:$0xff]  }
 0x663   : > { %8628 = vmatprep.subr.bf16.mxu0 %v13914_v22  ;;  %v13992_v22 = vld [vmem:[%s18320_s7 + $0x614] ss:$8 sps:$4 sm:$0xff]  }
 0x664   : > { %8953 = vmatpush1.bf16.msra.mxu1 %v13909_v54  ;;  %v13987_v54 = vld [vmem:[%s18320_s7 + $0x6a0] ss:$8 sps:$4 sm:$0xff]  }
 0x665   : > { %8954 = vmatprep.subr.bf16.mxu1 %v13917_v24  ;;  %v13995_v24 = vld [vmem:[%s18320_s7 + $0x734] ss:$8 sps:$4 sm:$0xff]  }
 0x666   : > { %8629 = vmatpush1.bf16.msra.mxu0 %v13912_v45  ;;  %v13990_v45 = vld [vmem:[%s18320_s7 + $0x610] ss:$8 sps:$4 sm:$0xff]  }
 0x667   : > { %8630 = vmatprep.subr.bf16.mxu0 %v13920_v3  ;;  %v8758_v3 = vrot.slane %v17229_v63, 2 }
 0x668   : > { %8955 = vmatpush1.bf16.msra.mxu1 %v13915_v46  ;;  %v13998_v46 = vld [vmem:[%s18320_s7 + $0x604] ss:$8 sps:$4 sm:$0xff]  }
 0x669   : > { %8956 = vmatprep.subr.bf16.mxu1 %v13923_v35  ;;  %v9083_v35 = vrot.slane %v17235_v16, 2 }
 0x66a   : > { %8631 = vmatpush1.bf16.msra.mxu0 %v13918_v48  ;;  %v13993_v48 = vld [vmem:[%s18320_s7 + $0x730] ss:$8 sps:$4 sm:$0xff]  }
 0x66b   : > { %8632 = vmatprep.subr.bf16.mxu0 %v13926_v59  ;;  %v9084_v59 = vrot.slane %v17243_v40, 2 }
 0x66c   : > { %8957 = vmatpush1.bf16.msra.mxu1 %v13921_v1  ;;  %v14001_v1 = vld [vmem:[%s18320_s7 + $0x724] ss:$8 sps:$4 sm:$0xff]  }
 0x66d   : > { %8958 = vmatprep.subr.bf16.mxu1 %v13929_v41  ;;  %v9409_v41 = vrot.slane %v17205_v42, 3 }
 0x66e   : > { %8633 = vmatpush1.bf16.msra.mxu0 %v13924_v30  ;;  %v13996_v30 = vld [vmem:[%s18320_s7 + $0x600] ss:$8 sps:$4 sm:$0xff]  }
 0x66f   : > { %8634 = vmatprep.subr.bf16.mxu0 %v13932_v15  ;;  %v14004_v15 = vld [vmem:[%s18320_s7 + $0x5f4] ss:$8 sps:$4 sm:$0xff]  }
 0x670   : > { %8959 = vmatpush1.bf16.msra.mxu1 %v13927_v56 }
 0x671   : > { %8960 = vmatprep.subr.bf16.mxu1 %v13935_v5  ;;  %v13999_v5 = vld [vmem:[%s18320_s7 + $0x720] ss:$8 sps:$4 sm:$0xff]  }
 0x672   : > { %8635 = vmatpush2.bf16.msra.mxu0 %v13930_v50  ;;  %v14007_v50 = vld [vmem:[%s18320_s7 + $0x714] ss:$8 sps:$4 sm:$0xff]  }
 0x673   : > { %8636 = vmatprep.subr.bf16.mxu0 %v13938_v19 }
 0x674   : > { %8961 = vmatpush2.bf16.msra.mxu1 %v13933_v32  ;;  %v14002_v32 = vld [vmem:[%s18320_s7 + $0x5f0] ss:$8 sps:$4 sm:$0xff]  }
 0x675   : > { %8962 = vmatprep.subr.bf16.mxu1 %v13941_v18  ;;  %v14010_v18 = vld [vmem:[%s18320_s7 + $0x5e4] ss:$8 sps:$4 sm:$0xff]  }
 0x676   : > { %8637 = vmatpush2.bf16.msra.mxu0 %v13936_v57 }
 0x677   : > { %8638 = vmatprep.subr.bf16.mxu0 %v13944_v17  ;;  %v14005_v17 = vld [vmem:[%s18320_s7 + $0x710] ss:$8 sps:$4 sm:$0xff]  }
 0x678   : > { %8963 = vmatpush2.bf16.msra.mxu1 %v13939_v9  ;;  %v14013_v9 = vld [vmem:[%s18320_s7 + $0x704] ss:$8 sps:$4 sm:$0xff]  }
 0x679   : > { %8964 = vmatprep.subr.bf16.mxu1 %v13947_v52 }
 0x67a   : > { %8639 = vmatpush2.bf16.msra.mxu0 %v13942_v27  ;;  %v14008_v27 = vld [vmem:[%s18320_s7 + $0x5e0] ss:$8 sps:$4 sm:$0xff]  }
 0x67b   : > { %8640 = vmatprep.subr.bf16.mxu0 %v13950_v39  ;;  %v14016_v39 = vld [vmem:[%s18320_s7 + $0x5d4] ss:$8 sps:$4 sm:$0xff]  }
 0x67c   : > { %8965 = vmatpush2.bf16.msra.mxu1 %v13945_v14  ;;  %v14011_v14 = vld [vmem:[%s18320_s7 + $0x700] ss:$8 sps:$4 sm:$0xff]  }
 0x67d   : > { %8966 = vmatprep.subr.bf16.mxu1 %v13953_v23  ;;  %v14019_v23 = vld [vmem:[%s18320_s7 + $0x6f4] ss:$8 sps:$4 sm:$0xff]  }
 0x67e   : > { %8641 = vmatpush2.bf16.msra.mxu0 %v13948_v2  ;;  %v14014_v2 = vld [vmem:[%s18320_s7 + $0x5d0] ss:$8 sps:$4 sm:$0xff]  }
 0x67f   : > { %8642 = vmatprep.subr.bf16.mxu0 %v13956_v62  ;;  %v14022_v62 = vld [vmem:[%s18320_s7 + $0x5c4] ss:$8 sps:$4 sm:$0xff]  }
 0x680   : > { %8967 = vmatpush2.bf16.msra.mxu1 %v13951_v13  ;;  %v14017_v13 = vld [vmem:[%s18320_s7 + $0x6f0] ss:$8 sps:$4 sm:$0xff]  }
 0x681   : > { %8968 = vmatprep.subr.bf16.mxu1 %v13959_v31  ;;  %v14025_v31 = vld [vmem:[%s18320_s7 + $0x6e4] ss:$8 sps:$4 sm:$0xff]  }
 0x682   : > { %8643 = vmatpush2.bf16.msra.mxu0 %v13954_v26  ;;  %v14020_v26 = vld [vmem:[%s18320_s7 + $0x5c0] ss:$8 sps:$4 sm:$0xff]  }
 0x683   : > { %8644 = vmatprep.subr.bf16.mxu0 %v13962_v60  ;;  %v14028_v60 = vld [vmem:[%s18320_s7 + $0x5b4] ss:$8 sps:$4 sm:$0xff]  }
 0x684   : > { %8969 = vmatpush2.bf16.msra.mxu1 %v13957_v7  ;;  %v14023_v7 = vld [vmem:[%s18320_s7 + $0x6e0] ss:$8 sps:$4 sm:$0xff]  }
 0x685   : > { %8970 = vmatprep.subr.bf16.mxu1 %v13965_v25  ;;  %v14031_v25 = vld [vmem:[%s18320_s7 + $0x6d4] ss:$8 sps:$4 sm:$0xff]  }
 0x686   : > { %8645 = vmatpush2.bf16.msra.mxu0 %v13960_v20  ;;  %v14026_v20 = vld [vmem:[%s18320_s7 + $0x5b0] ss:$8 sps:$4 sm:$0xff]  }
 0x687   : > { %8646 = vmatprep.subr.bf16.mxu0 %v13968_v47  ;;  %v14034_v47 = vld [vmem:[%s18320_s7 + $0x5a4] ss:$8 sps:$4 sm:$0xff]  }
 0x688   : > { %8971 = vmatpush2.bf16.msra.mxu1 %v13963_v61  ;;  %v14029_v61 = vld [vmem:[%s18320_s7 + $0x6d0] ss:$8 sps:$4 sm:$0xff]  }
 0x689   : > { %8972 = vmatprep.subr.bf16.mxu1 %v13971_v29  ;;  %v14037_v29 = vld [vmem:[%s18320_s7 + $0x6c4] ss:$8 sps:$4 sm:$0xff]  }
 0x68a   : > { %8647 = vmatpush2.bf16.msra.mxu0 %v13966_v4  ;;  %v14032_v4 = vld [vmem:[%s18320_s7 + $0x5a0] ss:$8 sps:$4 sm:$0xff]  }
 0x68b   : > { %8648 = vmatprep.subr.bf16.mxu0 %v13974_v53  ;;  %v14040_v53 = vld [vmem:[%s18320_s7 + $0x694] ss:$8 sps:$4 sm:$0xff]  }
 0x68c   : > { %8973 = vmatpush2.bf16.msra.mxu1 %v13969_v38  ;;  %v14035_v38 = vld [vmem:[%s18320_s7 + $0x6c0] ss:$8 sps:$4 sm:$0xff]  }
 0x68d   : > { %8974 = vmatprep.subr.bf16.mxu1 %v13977_v33  ;;  %v14043_v33 = vld [vmem:[%s18320_s7 + $0x7b4] ss:$8 sps:$4 sm:$0xff]  }
 0x68e   : > { %8649 = vmatpush2.bf16.msra.mxu0 %v13972_v44  ;;  %v14038_v44 = vld [vmem:[%s18320_s7 + $0x690] ss:$8 sps:$4 sm:$0xff]  }
 0x68f   : > { %8997 = vmatprep.subr.bf16.mxu0 %v13980_v43  ;;  %v14046_v43 = vld [vmem:[%s18320_s7 + $0x684] ss:$8 sps:$4 sm:$0xff]  }
 0x690   : > { %8975 = vmatpush2.bf16.msra.mxu1 %v13975_v8  ;;  %v14041_v8 = vld [vmem:[%s18320_s7 + $0x7b0] ss:$8 sps:$4 sm:$0xff]  }
 0x691   : > { %8651 = vmatmul.mubr.bf16.vlgmr.msra.gmra.mxu0 %v8430_v55  ;;  %9323 = vmatprep.subr.bf16.mxu1 %v13983_v11  ;;  %v14049_v11 = vld [vmem:[%s18320_s7 + $0x7a4] ss:$8 sps:$4 sm:$0xff]   ;;  %v14052_v55 = vld [vmem:[%s18320_s7 + $0x674] ss:$8 sps:$4 sm:$0xff]  }
 0x692   : > { %8998 = vmatpush1.bf16.msra.mxu0 %v13978_v36  ;;  %9017 = vmatprep.mubr.bf16.mxu0 %v14337_v28  ;;  %v14044_v36 = vld [vmem:[%s18320_s7 + $0x680] ss:$8 sps:$4 sm:$0xff]  }
 0x693   : > { %8977 = vmatmul.mubr.bf16.vlgmr.msra.gmra.mxu1 %v8756_v37  ;;  %8999 = vmatprep.subr.bf16.mxu0 %v13986_v51  ;;  %v14047_v51 = vld [vmem:[%s18320_s7 + $0x7a0] ss:$8 sps:$4 sm:$0xff]   ;;  %v14050_v37 = vld [vmem:[%s18320_s7 + $0x670] ss:$8 sps:$4 sm:$0xff]  }
 0x694   : > { %9324 = vmatpush1.bf16.msra.mxu1 %v13981_v0  ;;  %9343 = vmatprep.mubr.bf16.mxu1 %v14337_v28  ;;  %v14055_v0 = vld [vmem:[%s18320_s7 + $0x794] ss:$8 sps:$4 sm:$0xff]  }
 0x695   : > { %9325 = vmatprep.subr.bf16.mxu1 %v13989_v49  ;;  %v14058_v49 = vld [vmem:[%s18320_s7 + $0x664] ss:$8 sps:$4 sm:$0xff]  }
 0x696   : > { %9000 = vmatpush1.bf16.msra.mxu0 %v13984_v10  ;;  %v14053_v10 = vld [vmem:[%s18320_s7 + $0x790] ss:$8 sps:$4 sm:$0xff]  }
 0x697   : > { %9270 = vmatprep.subr.bf16.mxu0 %v13992_v22  ;;  %v14061_v22 = vld [vmem:[%s18320_s7 + $0x784] ss:$8 sps:$4 sm:$0xff]  }
 0x698   : > { %9326 = vmatpush1.bf16.msra.mxu1 %v13987_v54  ;;  %v14056_v54 = vld [vmem:[%s18320_s7 + $0x660] ss:$8 sps:$4 sm:$0xff]  }
 0x699   : > { %11921 = vmatmul.mubr.msk.bf16.vlgmr.msra.gmra.mxu0 %vm7628_vm5, %v8758_v3  ;;  %9596 = vmatprep.subr.bf16.mxu1 %v13995_v24  ;;  %v14064_v24 = vld [vmem:[%s18320_s7 + $0x654] ss:$8 sps:$4 sm:$0xff]  }
 0x69a   : > { %9271 = vmatpush1.bf16.msra.mxu0 %v13990_v45  ;;  %9302 = vmatprep.mubr.bf16.mxu0 %v9083_v35  ;;  %v14059_v45 = vld [vmem:[%s18320_s7 + $0x780] ss:$8 sps:$4 sm:$0xff]   ;;  %v14067_v3 = vld [vmem:[%s18320_s7 + $0x774] ss:$8 sps:$4 sm:$0xff]   ;;  %v14070_v35 = vld [vmem:[%s18320_s7 + $0x644] ss:$8 sps:$4 sm:$0xff]  }
 0x69b   : > { %11994 = vmatmul.mubr.msk.bf16.vlgmr.msra.gmra.mxu1 %vm7628_vm5, %v9084_v59  ;;  %9272 = vmatprep.subr.bf16.mxu0 %v13998_v46  ;;  %v14062_v46 = vld [vmem:[%s18320_s7 + $0x650] ss:$8 sps:$4 sm:$0xff]  }
 0x69c   : > { %9597 = vmatpush1.bf16.msra.mxu1 %v13993_v48  ;;  %9628 = vmatprep.mubr.bf16.mxu1 %v9409_v41  ;;  %v17713_v56 = vpop.f32.mrf.mxu1  ;;  %v14065_v48 = vld [vmem:[%s18320_s7 + $0x770] ss:$8 sps:$4 sm:$0xff]  }
 0x69d   : > { %9598 = vmatprep.subr.bf16.mxu1 %v14001_v1  ;;  %v14073_v1 = vld [vmem:[%s18320_s7 + $0x764] ss:$8 sps:$4 sm:$0xff]  }
 0x69e   : > { %9273 = vmatpush1.bf16.msra.mxu0 %v13996_v30  ;;  %v17721_v19 = vpop.f32.mrf.mxu1  ;;  %v14068_v30 = vld [vmem:[%s18320_s7 + $0x640] ss:$8 sps:$4 sm:$0xff]  }
 0x69f   : > { %9274 = vmatprep.subr.bf16.mxu0 %v14004_v15 }
 0x6a0   : > { %9599 = vmatpush1.bf16.msra.mxu1 %v13999_v5  ;;  %v7670_v57 = vpop.f32.mrf.mxu1 }
 0x6a1   : > { %9600 = vmatprep.subr.bf16.mxu1 %v14007_v50  ;;  %v14076_v50 = vld [vmem:[%s18320_s7 + $0x634] ss:$8 sps:$4 sm:$0xff]  }
 0x6a2   : > { %9275 = vmatpush1.bf16.msra.mxu0 %v14002_v32  ;;  %v7671_v52 = vpop.f32.mrf.mxu1 }
 0x6a3   : > { %9276 = vmatprep.subr.bf16.mxu0 %v14010_v18 }
 0x6a4   : > { %9601 = vmatpush1.bf16.msra.mxu1 %v14005_v17  ;;  %v14079_v17 = vld [vmem:[%s18320_s7 + $0x754] ss:$8 sps:$4 sm:$0xff]  }
 0x6a5   : > { %9602 = vmatprep.subr.bf16.mxu1 %v14013_v9 }
 0x6a6   : > { %9277 = vmatpush1.bf16.msra.mxu0 %v14008_v27 }
 0x6a7   : > { %9278 = vmatprep.subr.bf16.mxu0 %v14016_v39  ;;  %v14082_v39 = vld [vmem:[%s18320_s7 + $0x624] ss:$8 sps:$4 sm:$0xff]  }
 0x6a8   : > { %9603 = vmatpush1.bf16.msra.mxu1 %v14011_v14  ;;  %v14077_v14 = vld [vmem:[%s18320_s7 + $0x750] ss:$8 sps:$4 sm:$0xff]  }
 0x6a9   : > { %9604 = vmatprep.subr.bf16.mxu1 %v14019_v23 }
 0x6aa   : > { %9279 = vmatpush1.bf16.msra.mxu0 %v14014_v2  ;;  %v14085_v2 = vld [vmem:[%s18320_s7 + $0x744] ss:$8 sps:$4 sm:$0xff]  }
 0x6ab   : > { %9280 = vmatprep.subr.bf16.mxu0 %v14022_v62  ;;  %v14080_v62 = vld [vmem:[%s18320_s7 + $0x620] ss:$8 sps:$4 sm:$0xff]  }
 0x6ac   : > { %9605 = vmatpush1.bf16.msra.mxu1 %v14017_v13  ;;  %v14088_v13 = vld [vmem:[%s18320_s7 + $0x7d4] ss:$8 sps:$4 sm:$0xff]  }
 0x6ad   : > { %9606 = vmatprep.subr.bf16.mxu1 %v14025_v31  ;;  %v14083_v31 = vld [vmem:[%s18320_s7 + $0x740] ss:$8 sps:$4 sm:$0xff]  }
 0x6ae   : > { %9281 = vmatpush1.bf16.msra.mxu0 %v14020_v26  ;;  %v14091_v26 = vld [vmem:[%s18320_s7 + $0x8f4] ss:$8 sps:$4 sm:$0xff]  }
 0x6af   : > { %9282 = vmatprep.subr.bf16.mxu0 %v14028_v60  ;;  %v14086_v60 = vld [vmem:[%s18320_s7 + $0x7d0] ss:$8 sps:$4 sm:$0xff]  }
 0x6b0   : > { %9607 = vmatpush1.bf16.msra.mxu1 %v14023_v7  ;;  %v9082_v7 = vrot.slane %v17436_v6, 2 }
 0x6b1   : > { %9608 = vmatprep.subr.bf16.mxu1 %v14031_v25  ;;  %v14094_v25 = vld [vmem:[%s18320_s7 + $0x7c4] ss:$8 sps:$4 sm:$0xff]  }
 0x6b2   : > { %9283 = vmatpush1.bf16.msra.mxu0 %v14026_v20  ;;  %v14089_v20 = vld [vmem:[%s18320_s7 + $0x8f0] ss:$8 sps:$4 sm:$0xff]  }
 0x6b3   : > { %9284 = vmatprep.subr.bf16.mxu0 %v14034_v47  ;;  %v9408_v47 = vrot.slane %v17203_v34, 3 }
 0x6b4   : > { %9609 = vmatpush1.bf16.msra.mxu1 %v14029_v61  ;;  %v14097_v61 = vld [vmem:[%s18320_s7 + $0x8e4] ss:$8 sps:$4 sm:$0xff]  }
 0x6b5   : > { %9610 = vmatprep.subr.bf16.mxu1 %v14037_v29  ;;  %v14092_v29 = vld [vmem:[%s18320_s7 + $0x7c0] ss:$8 sps:$4 sm:$0xff]  }
 0x6b6   : > { %9285 = vmatpush1.bf16.msra.mxu0 %v14032_v4  ;;  %v14100_v4 = vld [vmem:[%s18320_s7 + $0x854] ss:$8 sps:$4 sm:$0xff]  }
 0x6b7   : > { %9286 = vmatprep.subr.bf16.mxu0 %v14040_v53  ;;  %v14095_v53 = vld [vmem:[%s18320_s7 + $0x8e0] ss:$8 sps:$4 sm:$0xff]  }
 0x6b8   : > { %9611 = vmatpush1.bf16.msra.mxu1 %v14035_v38  ;;  %v14103_v38 = vld [vmem:[%s18320_s7 + $0x974] ss:$8 sps:$4 sm:$0xff]  }
 0x6b9   : > { %9612 = vmatprep.subr.bf16.mxu1 %v14043_v33  ;;  %v14098_v33 = vld [vmem:[%s18320_s7 + $0x850] ss:$8 sps:$4 sm:$0xff]  }
 0x6ba   : > { %9287 = vmatpush2.bf16.msra.mxu0 %v14038_v44  ;;  %v9410_v44 = vrot.slane %v17229_v63, 3 }
 0x6bb   : > { %9288 = vmatprep.subr.bf16.mxu0 %v14046_v43  ;;  %v14106_v43 = vld [vmem:[%s18320_s7 + $0x844] ss:$8 sps:$4 sm:$0xff]  }
 0x6bc   : > { %9613 = vmatpush2.bf16.msra.mxu1 %v14041_v8  ;;  %v9735_v8 = vrot.slane %v17235_v16, 3  ;;  %v14104_v16 = vld [vmem:[%s18320_s7 + $0x840] ss:$8 sps:$4 sm:$0xff]  }
 0x6bd   : > { %9614 = vmatprep.subr.bf16.mxu1 %v14049_v11  ;;  %v14101_v11 = vld [vmem:[%s18320_s7 + $0x970] ss:$8 sps:$4 sm:$0xff]  }
 0x6be   : > { %9289 = vmatpush2.bf16.msra.mxu0 %v14044_v36  ;;  %v9736_v36 = vrot.slane %v17243_v40, 3  ;;  %v14112_v40 = vld [vmem:[%s18320_s7 + $0x834] ss:$8 sps:$4 sm:$0xff]  }
 0x6bf   : > { %9290 = vmatprep.subr.bf16.mxu0 %v14052_v55  ;;  %v14109_v55 = vld [vmem:[%s18320_s7 + $0x964] ss:$8 sps:$4 sm:$0xff]  }
 0x6c0   : > { %9615 = vmatpush2.bf16.msra.mxu1 %v14047_v51  ;;  %v10061_v51 = vrot.slane %v17205_v42, 4  ;;  %v14115_v42 = vld [vmem:[%s18320_s7 + $0x954] ss:$8 sps:$4 sm:$0xff]  }
 0x6c1   : > { %9616 = vmatprep.subr.bf16.mxu1 %v14055_v0  ;;  %v14107_v0 = vld [vmem:[%s18320_s7 + $0x960] ss:$8 sps:$4 sm:$0xff]  }
 0x6c2   : > { %9291 = vmatpush2.bf16.msra.mxu0 %v14050_v37  ;;  %v14110_v37 = vld [vmem:[%s18320_s7 + $0x830] ss:$8 sps:$4 sm:$0xff]  }
 0x6c3   : > { %9292 = vmatprep.subr.bf16.mxu0 %v14058_v49  ;;  %v14118_v49 = vld [vmem:[%s18320_s7 + $0x824] ss:$8 sps:$4 sm:$0xff]  }
 0x6c4   : > { %9617 = vmatpush2.bf16.msra.mxu1 %v14053_v10  ;;  %v14113_v10 = vld [vmem:[%s18320_s7 + $0x950] ss:$8 sps:$4 sm:$0xff]  }
 0x6c5   : > { %9618 = vmatprep.subr.bf16.mxu1 %v14061_v22  ;;  %v14121_v22 = vld [vmem:[%s18320_s7 + $0x944] ss:$8 sps:$4 sm:$0xff]  }
 0x6c6   : > { %9293 = vmatpush2.bf16.msra.mxu0 %v14056_v54  ;;  %v14116_v54 = vld [vmem:[%s18320_s7 + $0x820] ss:$8 sps:$4 sm:$0xff]  }
 0x6c7   : > { %9294 = vmatprep.subr.bf16.mxu0 %v14064_v24  ;;  %v14124_v24 = vld [vmem:[%s18320_s7 + $0x814] ss:$8 sps:$4 sm:$0xff]  }
 0x6c8   : > { %9619 = vmatpush2.bf16.msra.mxu1 %v14059_v45  ;;  %v14119_v45 = vld [vmem:[%s18320_s7 + $0x940] ss:$8 sps:$4 sm:$0xff]  }
 0x6c9   : > { %v7707_v59 = vpop.f32.mrf.mxu0  ;;  %9620 = vmatprep.subr.bf16.mxu1 %v14067_v3  ;;  %v14127_v3 = vld [vmem:[%s18320_s7 + $0x934] ss:$8 sps:$4 sm:$0xff]  }
 0x6ca   : > { %v17856_v41 = vadd.f32 %v7707_v59, %v17713_v56  ;;  %9295 = vmatpush2.bf16.msra.mxu0 %v14062_v46  ;;  %v14071_v56 = vld [vmem:[%s18320_s7 + $0x760] ss:$8 sps:$4 sm:$0xff]   ;;  %v14122_v46 = vld [vmem:[%s18320_s7 + $0x810] ss:$8 sps:$4 sm:$0xff]   ;;  %v14133_v59 = vld [vmem:[%s18320_s7 + $0x924] ss:$8 sps:$4 sm:$0xff]  }
 0x6cb   : > { %v7709_v15 = vpop.f32.mrf.mxu0  ;;  %v17861_v5 = vpop.f32.mrf.mxu1  ;;  %9296 = vmatprep.subr.bf16.mxu0 %v14070_v35  ;;  %v14130_v35 = vld [vmem:[%s18320_s7 + $0x804] ss:$8 sps:$4 sm:$0xff]  }
 0x6cc   : > { %v17867_v32 = vadd.f32 %v7709_v15, %v17721_v19  ;;  %9621 = vmatpush2.bf16.msra.mxu1 %v14065_v48  ;;  %v14074_v19 = vld [vmem:[%s18320_s7 + $0x630] ss:$8 sps:$4 sm:$0xff]   ;;  %v14131_v15 = vld [vmem:[%s18320_s7 + $0x920] ss:$8 sps:$4 sm:$0xff]  }
 0x6cd   : > { %v7711_v18 = vpop.f32.mrf.mxu0  ;;  %v17872_v57 = vpop.f32.mrf.mxu1  ;;  %9622 = vmatprep.subr.bf16.mxu1 %v14073_v1  ;;  %v14125_v48 = vld [vmem:[%s18320_s7 + $0x930] ss:$8 sps:$4 sm:$0xff]   ;;  %v14128_v1 = vld [vmem:[%s18320_s7 + $0x800] ss:$8 sps:$4 sm:$0xff]  }
 0x6ce   : > { %v7716_v9 = vcombine.low %v17856_v41, %v17867_v32  ;;  %9297 = vmatpush2.bf16.msra.mxu0 %v14068_v30  ;;  %v14136_v30 = vld [vmem:[%s18320_s7 + $0x7f4] ss:$8 sps:$4 sm:$0xff]   ;;  %v14142_v18 = vld [vmem:[%s18320_s7 + $0x7e4] ss:$8 sps:$4 sm:$0xff]   ;;  %v14167_v41 = vld [vmem:[%s18320_s7 + $0x9c0] ss:$8 sps:$4 sm:$0xff]  }
 0x6cf   : > { %v7712_v52 = vpop.f32.mrf.mxu0  ;;  %v8042_v27 = vpop.f32.mrf.mxu1  ;;  %9298 = vmatprep.subr.bf16.mxu0 %v14076_v50  ;;  %v14139_v50 = vld [vmem:[%s18320_s7 + $0x914] ss:$8 sps:$4 sm:$0xff]  }
 0x6d0   : > { %9623 = vmatpush2.bf16.msra.mxu1 %v14071_v56  ;;  %v14134_v56 = vld [vmem:[%s18320_s7 + $0x7f0] ss:$8 sps:$4 sm:$0xff]   ;;  %v14140_v52 = vld [vmem:[%s18320_s7 + $0x7e0] ss:$8 sps:$4 sm:$0xff]   ;;  %v14148_v27 = vld [vmem:[%s18320_s7 + $0x8d4] ss:$8 sps:$4 sm:$0xff]  }
 0x6d1   : > { %v8043_v23 = vpop.f32.mrf.mxu1  ;;  %9624 = vmatprep.subr.bf16.mxu1 %v14079_v17  ;;  %v14137_v17 = vld [vmem:[%s18320_s7 + $0x910] ss:$8 sps:$4 sm:$0xff]  }
 0x6d2   : > { %9299 = vmatpush2.bf16.msra.mxu0 %v14074_v19  ;;  %v14145_v19 = vld [vmem:[%s18320_s7 + $0x904] ss:$8 sps:$4 sm:$0xff]   ;;  %v14340_v23 = vmov 1966171168  }
 0x6d3   : > { %9300 = vmatprep.subr.bf16.mxu0 %v14082_v39  ;;  %v14143_v39 = vld [vmem:[%s18320_s7 + $0x900] ss:$8 sps:$4 sm:$0xff]  }
 0x6d4   : > { %9625 = vmatpush2.bf16.msra.mxu1 %v14077_v14  ;;  %v14151_v14 = vld [vmem:[%s18320_s7 + $0x9f4] ss:$8 sps:$4 sm:$0xff]  }
 0x6d5   : > { %9626 = vmatprep.subr.bf16.mxu1 %v14085_v2  ;;  %v7718_v2 = vunpack.c.l.s4 %v14340_v23 }
 0x6d6   : > { %9301 = vmatpush2.bf16.msra.mxu0 %v14080_v62  ;;  %v14146_v62 = vld [vmem:[%s18320_s7 + $0x8d0] ss:$8 sps:$4 sm:$0xff]  }
 0x6d7   : > { %9649 = vmatprep.subr.bf16.mxu0 %v14088_v13  ;;  %v14154_v13 = vld [vmem:[%s18320_s7 + $0x8c4] ss:$8 sps:$4 sm:$0xff]  }
 0x6d8   : > { %9627 = vmatpush2.bf16.msra.mxu1 %v14083_v31  ;;  %v14149_v31 = vld [vmem:[%s18320_s7 + $0x9f0] ss:$8 sps:$4 sm:$0xff]  }
 0x6d9   : > { %9303 = vmatmul.mubr.bf16.vlgmr.msra.gmra.mxu0 %v9082_v7  ;;  %9975 = vmatprep.subr.bf16.mxu1 %v14091_v26  ;;  %v14157_v26 = vld [vmem:[%s18320_s7 + $0x9e4] ss:$8 sps:$4 sm:$0xff]   ;;  %v14152_v7 = vld [vmem:[%s18320_s7 + $0x8c0] ss:$8 sps:$4 sm:$0xff]  }
 0x6da   : > { %9650 = vmatpush1.bf16.msra.mxu0 %v14086_v60  ;;  %9669 = vmatprep.mubr.bf16.mxu0 %v14337_v28  ;;  %v7719_v60 = vunpack.c.0.s8 %v7718_v2  ;;  %v14185_v2 = vld [vmem:[%s18320_s7 + $0x990] ss:$8 sps:$4 sm:$0xff]  }
 0x6db   : > { %9629 = vmatmul.mubr.bf16.vlgmr.msra.gmra.mxu1 %v9408_v47  ;;  %9651 = vmatprep.subr.bf16.mxu0 %v14094_v25  ;;  %v14160_v25 = vld [vmem:[%s18320_s7 + $0x8b4] ss:$8 sps:$4 sm:$0xff]  }
 0x6dc   : > { %9976 = vmatpush1.bf16.msra.mxu1 %v14089_v20  ;;  %9995 = vmatprep.mubr.bf16.mxu1 %v14337_v28  ;;  %v14155_v20 = vld [vmem:[%s18320_s7 + $0x9e0] ss:$8 sps:$4 sm:$0xff]   ;;  %v14163_v47 = vld [vmem:[%s18320_s7 + $0x9d4] ss:$8 sps:$4 sm:$0xff]  }
 0x6dd   : > { %9977 = vmatprep.subr.bf16.mxu1 %v14097_v61  ;;  %v18058_v61 = vsub.s32 %v7719_v60, %v16341_v12  ;;  %v14169_v12 = vld [vmem:[%s18320_s7 + $0x9c4] ss:$8 sps:$4 sm:$0xff]   ;;  %v14196_v60 = vld [vmem:[%s18320_s7 + $0xa14] ss:$8 sps:$4 sm:$0xff]  }
 0x6de   : > { %9652 = vmatpush1.bf16.msra.mxu0 %v14092_v29  ;;  %v14158_v29 = vld [vmem:[%s18320_s7 + $0x8b0] ss:$8 sps:$4 sm:$0xff]  }
 0x6df   : > { %9922 = vmatprep.subr.bf16.mxu0 %v14100_v4  ;;  %v14166_v4 = vld [vmem:[%s18320_s7 + $0x8a4] ss:$8 sps:$4 sm:$0xff]  }
 0x6e0   : > { %9978 = vmatpush1.bf16.msra.mxu1 %v14095_v53  ;;  %v14161_v53 = vld [vmem:[%s18320_s7 + $0x9d0] ss:$8 sps:$4 sm:$0xff]  }
 0x6e1   : > { %12067 = vmatmul.mubr.msk.bf16.vlgmr.msra.gmra.mxu0 %vm7628_vm5, %v9410_v44  ;;  %10248 = vmatprep.subr.bf16.mxu1 %v14103_v38 }
 0x6e2   : > { %9923 = vmatpush1.bf16.msra.mxu0 %v14098_v33  ;;  %9954 = vmatprep.mubr.bf16.mxu0 %v9735_v8  ;;  %v7723_v33 = vrot.slane %v7716_v9, %v18058_v61  ;;  %v14175_v9 = vld [vmem:[%s18320_s7 + $0x9b4] ss:$8 sps:$4 sm:$0xff]  }
 0x6e3   : > { %12140 = vmatmul.mubr.msk.bf16.vlgmr.msra.gmra.mxu1 %vm7628_vm5, %v9736_v36  ;;  %9924 = vmatprep.subr.bf16.mxu0 %v14106_v43  ;;  %v14164_v43 = vld [vmem:[%s18320_s7 + $0x8a0] ss:$8 sps:$4 sm:$0xff]   ;;  %v14172_v36 = vld [vmem:[%s18320_s7 + $0x894] ss:$8 sps:$4 sm:$0xff]  }
 0x6e4   : > { %10249 = vmatpush1.bf16.msra.mxu1 %v14101_v11  ;;  %10280 = vmatprep.mubr.bf16.mxu1 %v10061_v51  ;;  %v7730_v51 = vrot.slane %v7723_v33, %v18058_v61 }
 0x6e5   : > { %10250 = vmatprep.subr.bf16.mxu1 %v14109_v55 }
 0x6e6   : > { %9925 = vmatpush1.bf16.msra.mxu0 %v14104_v16 }
 0x6e7   : > { %9926 = vmatprep.subr.bf16.mxu0 %v14112_v40  ;;  %v7411_v40 = vld [vmem:[%s18321_s8] sm:$0x3] }
 0x6e8   : > { %10251 = vmatpush1.bf16.msra.mxu1 %v14107_v0 }
 0x6e9   : > { %10252 = vmatprep.subr.bf16.mxu1 %v14115_v42 }
 0x6ea   : > { %9927 = vmatpush1.bf16.msra.mxu0 %v14110_v37  ;;  %v14178_v37 = vld [vmem:[%s18320_s7 + $0x884] ss:$8 sps:$4 sm:$0xff]  }
 0x6eb   : > { %9928 = vmatprep.subr.bf16.mxu0 %v14118_v49 }
 0x6ec   : > { %10253 = vmatpush1.bf16.msra.mxu1 %v14113_v10  ;;  %v14173_v10 = vld [vmem:[%s18320_s7 + $0x9b0] ss:$8 sps:$4 sm:$0xff]  }
 0x6ed   : > { %10254 = vmatprep.subr.bf16.mxu1 %v14121_v22 }
 0x6ee   : > { %9929 = vmatpush1.bf16.msra.mxu0 %v14116_v54 }
 0x6ef   : > { %9930 = vmatprep.subr.bf16.mxu0 %v14124_v24  ;;  %v14181_v24 = vld [vmem:[%s18320_s7 + $0x9a4] ss:$8 sps:$4 sm:$0xff]  }
 0x6f0   : > { %10255 = vmatpush1.bf16.msra.mxu1 %v14119_v45  ;;  %v7732_v45 = vadd.f32 %v7730_v51, %v7411_v40 }
 0x6f1   : > { %10256 = vmatprep.subr.bf16.mxu1 %v14127_v3 }
 0x6f2   : > { %9931 = vmatpush1.bf16.msra.mxu0 %v14122_v46 }
 0x6f3   : > { %9932 = vmatprep.subr.bf16.mxu0 %v14130_v35  ;;  %v14176_v35 = vld [vmem:[%s18320_s7 + $0x880] ss:$8 sps:$4 sm:$0xff]  }
 0x6f4   : > { %10257 = vmatpush1.bf16.msra.mxu1 %v14125_v48 }
 0x6f5   : > { %10258 = vmatprep.subr.bf16.mxu1 %v14133_v59 }
 0x6f6   : > { %9933 = vmatpush1.bf16.msra.mxu0 %v14128_v1  ;;  %v14184_v1 = vld [vmem:[%s18320_s7 + $0x874] ss:$8 sps:$4 sm:$0xff]  }
 0x6f7   : > { %9934 = vmatprep.subr.bf16.mxu0 %v14136_v30 }
 0x6f8   : > { %10259 = vmatpush1.bf16.msra.mxu1 %v14131_v15 }
 0x6f9   : > { %10260 = vmatprep.subr.bf16.mxu1 %v14139_v50  ;;  %v14179_v50 = vld [vmem:[%s18320_s7 + $0x9a0] ss:$8 sps:$4 sm:$0xff]  }
 0x6fa   : > { %9935 = vmatpush1.bf16.msra.mxu0 %v14134_v56 }
 0x6fb   : > { %9936 = vmatprep.subr.bf16.mxu0 %v14142_v18 }
 0x6fc   : > { %10261 = vmatpush1.bf16.msra.mxu1 %v14137_v17  ;;  %v14187_v17 = vld [vmem:[%s18320_s7 + $0x994] ss:$8 sps:$4 sm:$0xff]  }
 0x6fd   : > { %10262 = vmatprep.subr.bf16.mxu1 %v14145_v19 }
 0x6fe   : > { %9937 = vmatpush1.bf16.msra.mxu0 %v14140_v52  ;;  %v14182_v52 = vld [vmem:[%s18320_s7 + $0x870] ss:$8 sps:$4 sm:$0xff]  }
 0x6ff   : > { %9938 = vmatprep.subr.bf16.mxu0 %v14148_v27 }
 0x700   : > { %10263 = vmatpush1.bf16.msra.mxu1 %v14143_v39 }
 0x701   : > { %10264 = vmatprep.subr.bf16.mxu1 %v14151_v14  ;;  %v14190_v14 = vld [vmem:[%s18320_s7 + $0x864] ss:$8 sps:$4 sm:$0xff]  }
 0x702   : > { %9939 = vmatpush2.bf16.msra.mxu0 %v14146_v62 }
 0x703   : > { %9940 = vmatprep.subr.bf16.mxu0 %v14154_v13  ;;  %v14193_v13 = vld [vmem:[%s18320_s7 + $0x984] ss:$8 sps:$4 sm:$0xff]  }
 0x704   : > { %10265 = vmatpush2.bf16.msra.mxu1 %v14149_v31 }
 0x705   : > { %10266 = vmatprep.subr.bf16.mxu1 %v14157_v26  ;;  %v14188_v26 = vld [vmem:[%s18320_s7 + $0x860] ss:$8 sps:$4 sm:$0xff]  }
 0x706   : > { %9941 = vmatpush2.bf16.msra.mxu0 %v14152_v7 }
 0x707   : > { %9942 = vmatprep.subr.bf16.mxu0 %v14160_v25  ;;  %v14191_v25 = vld [vmem:[%s18320_s7 + $0x980] ss:$8 sps:$4 sm:$0xff]  }
 0x708   : > { %10267 = vmatpush2.bf16.msra.mxu1 %v14155_v20  ;;  %v14194_v20 = vld [vmem:[%s18320_s7 + $0xa10] ss:$8 sps:$4 sm:$0xff]  }
 0x709   : > { %v7997_v38 = vpop.f32.mrf.mxu0  ;;  %10268 = vmatprep.subr.bf16.mxu1 %v14163_v47  ;;  %v9734_v47 = vrot.slane %v17436_v6, 3  ;;  %v10062_v6 = vrot.slane %v17229_v63, 4 }
 0x70a   : > { %v8039_v44 = vadd.f32 %v17861_v5, %v7997_v38  ;;  %9943 = vmatpush2.bf16.msra.mxu0 %v14158_v29  ;;  %v14199_v29 = vld [vmem:[%s18320_s7 + $0xa04] ss:$8 sps:$4 sm:$0xff]   ;;  %v14200_v38 = vld [vmem:[%s18322_s9 + $0x78] sm:$0xff]  }
 0x70b   : > { %v7999_v8 = vpop.f32.mrf.mxu0  ;;  %v8326_v11 = vpop.f32.mrf.mxu1  ;;  %9944 = vmatprep.subr.bf16.mxu0 %v14166_v4  ;;  %v10060_v4 = vrot.slane %v17203_v34, 4  ;;  %v14201_v34 = vld [vmem:[%s18322_s9 + $0x38] sm:$0xff]  }
 0x70c   : > { %v8041_v55 = vadd.f32 %v17872_v57, %v7999_v8  ;;  %10269 = vmatpush2.bf16.msra.mxu1 %v14161_v53  ;;  %v14170_v57 = vld [vmem:[%s18320_s7 + $0x890] ss:$8 sps:$4 sm:$0xff]   ;;  %v14197_v53 = vld [vmem:[%s18320_s7 + $0xa00] ss:$8 sps:$4 sm:$0xff]  }
 0x70d   : > { %v8001_v5 = vpop.f32.mrf.mxu0  ;;  %v8328_v32 = vpop.f32.mrf.mxu1  ;;  %10270 = vmatprep.subr.bf16.mxu1 %v14169_v12  ;;  %v14202_v12 = vld [vmem:[%s18322_s9 + $0x70] sm:$0xff]  }
 0x70e   : > { %v8047_v16 = vcombine.low %v8039_v44, %v8041_v55  ;;  %9945 = vmatpush2.bf16.msra.mxu0 %v14164_v43 }
 0x70f   : > { %v8002_v0 = vpop.f32.mrf.mxu0  ;;  %v8330_v42 = vpop.f32.mrf.mxu1  ;;  %9946 = vmatprep.subr.bf16.mxu0 %v14172_v36 }
 0x710   : > { %v8054_v49 = vrot.slane %v8047_v16, %v18058_v61  ;;  %10271 = vmatpush2.bf16.msra.mxu1 %v14167_v41 }
 0x711   : > { %v8331_v22 = vpop.f32.mrf.mxu1  ;;  %v8367_v54 = vpop.f32.mrf.mxu0  ;;  %10272 = vmatprep.subr.bf16.mxu1 %v14175_v9 }
 0x712   : > { %v8061_v3 = vrot.slane %v8054_v49, %v18058_v61  ;;  %v8368_v46 = vadd.f32 %v8367_v54, %v8326_v11  ;;  %9947 = vmatpush2.bf16.msra.mxu0 %v14170_v57 }
 0x713   : > { %v8369_v48 = vpop.f32.mrf.mxu0  ;;  %v8693_v59 = vpop.f32.mrf.mxu1  ;;  %9948 = vmatprep.subr.bf16.mxu0 %v14178_v37 }
 0x714   : > { %v8063_v30 = vadd.f32 %v8061_v3, %v7732_v45  ;;  %v8370_v15 = vadd.f32 %v8369_v48, %v8328_v32  ;;  %10273 = vmatpush2.bf16.msra.mxu1 %v14173_v10  ;;  %v14205_v48 = vld [vmem:[%s18322_s9 + $0x28] sm:$0xff]  }
 0x715   : > { %v8371_v56 = vpop.f32.mrf.mxu0  ;;  %v8695_v18 = vpop.f32.mrf.mxu1  ;;  %10274 = vmatprep.subr.bf16.mxu1 %v14181_v24 }
 0x716   : > { %v8376_v19 = vcombine.low %v8368_v46, %v8370_v15  ;;  %9949 = vmatpush2.bf16.msra.mxu0 %v14176_v35  ;;  %v14204_v46 = vld [vmem:[%s18322_s9 + $0x68] sm:$0xff]   ;;  %v14208_v15 = vld [vmem:[%s18322_s9 + $0x58] sm:$0xff]   ;;  %v14210_v56 = vld [vmem:[%s18322_s9 + $0x50] sm:$0xff]  }
 0x717   : > { %v8372_v27 = vpop.f32.mrf.mxu0  ;;  %v8697_v39 = vpop.f32.mrf.mxu1  ;;  %9950 = vmatprep.subr.bf16.mxu0 %v14184_v1  ;;  %v14206_v1 = vld [vmem:[%s18322_s9 + $0x60] sm:$0xff]  }
 0x718   : > { %v8383_v23 = vrot.slane %v8376_v19, %v18058_v61  ;;  %10275 = vmatpush2.bf16.msra.mxu1 %v14179_v50  ;;  %v14209_v50 = vld [vmem:[%s18322_s9 + $0x18] sm:$0xff]   ;;  %v14213_v19 = vld [vmem:[%s18322_s9 + $0x8] sm:$0xff]   ;;  %v14215_v27 = vld [vmem:[%s18322_s9] sm:$0xff]  }
 0x719   : > { %v8698_v62 = vpop.f32.mrf.mxu1  ;;  %10276 = vmatprep.subr.bf16.mxu1 %v14187_v17  ;;  %v14212_v17 = vld [vmem:[%s18322_s9 + $0x48] sm:$0xff]  }
 0x71a   : > { %v8390_v31 = vrot.slane %v8383_v23, %v18058_v61  ;;  %9951 = vmatpush2.bf16.msra.mxu0 %v14182_v52  ;;  %v14214_v52 = vld [vmem:[%s18322_s9 + $0x40] sm:$0xff]  }
 0x71b   : > { %9952 = vmatprep.subr.bf16.mxu0 %v14190_v14 }
 0x71c   : > { %v8392_v7 = vadd.f32 %v8390_v31, %v8063_v30  ;;  %10277 = vmatpush2.bf16.msra.mxu1 %v14185_v2  ;;  %v14207_v30 = vld [vmem:[%s18322_s9 + $0x20] sm:$0xff]  }
 0x71d   : > { %10278 = vmatprep.subr.bf16.mxu1 %v14193_v13 }
 0x71e   : > { %9953 = vmatpush2.bf16.msra.mxu0 %v14188_v26 }
 0x71f   : > { %10301 = vmatprep.subr.bf16.mxu0 %v14196_v60 }
 0x720   : > { %10279 = vmatpush2.bf16.msra.mxu1 %v14191_v25 }
 0x721   : > { %9955 = vmatmul.mubr.bf16.vlgmr.msra.gmra.mxu0 %v9734_v47 }
 0x722   : > { %10302 = vmatpush1.bf16.msra.mxu0 %v14194_v20  ;;  %10321 = vmatprep.mubr.bf16.mxu0 %v14337_v28  ;;  %v14203_v28 = vld [vmem:[%s18322_s9 + $0x30] sm:$0xff]  }
 0x723   : > { %10281 = vmatmul.mubr.bf16.vlgmr.msra.gmra.mxu1 %v10060_v4  ;;  %10303 = vmatprep.subr.bf16.mxu0 %v14199_v29 }
 0x726   : > { %10304 = vmatpush1.bf16.msra.mxu0 %v14197_v53 }
 0x727   : > { %12616 = vmatprep.subr.bf16.mxu0 %v14200_v38 }
 0x729   : > { %12213 = vmatmul.mubr.msk.bf16.vlgmr.msra.gmra.mxu0 %vm7628_vm5, %v10062_v6 }
 0x72a   : > { %12617 = vmatpush3.bf16.msra.mxu0 %v14201_v34 }
 0x72b   : > { %12618 = vmatprep.subr.bf16.mxu0 %v14202_v12 }
 0x72e   : > { %12619 = vmatpush3.bf16.msra.mxu0 %v14203_v28 }
 0x72f   : > { %12620 = vmatprep.subr.bf16.mxu0 %v14204_v46 }
 0x732   : > { %12621 = vmatpush3.bf16.msra.mxu0 %v14205_v48 }
 0x733   : > { %12622 = vmatprep.subr.bf16.mxu0 %v14206_v1 }
 0x736   : > { %12623 = vmatpush3.bf16.msra.mxu0 %v14207_v30 }
 0x737   : > { %12624 = vmatprep.subr.bf16.mxu0 %v14208_v15 }
 0x73a   : > { %12625 = vmatpush3.bf16.msra.mxu0 %v14209_v50 }
 0x73b   : > { %12626 = vmatprep.subr.bf16.mxu0 %v14210_v56 }
 0x751   : > { %v8652_v63 = vpop.f32.mrf.mxu0 }
 0x752   : > { %v8694_v33 = vadd.f32 %v8693_v59, %v8652_v63 }
 0x753   : > { %v8654_v44 = vpop.f32.mrf.mxu0  ;;  %v8978_v43 = vpop.f32.mrf.mxu1 }
 0x754   : > { %v8696_v8 = vadd.f32 %v8695_v18, %v8654_v44  ;;  %v14211_v18 = vld [vmem:[%s18322_s9 + $0x10] sm:$0xff]  }
 0x755   : > { %v8656_v11 = vpop.f32.mrf.mxu0  ;;  %v8980_v36 = vpop.f32.mrf.mxu1  ;;  %12627 = vmatpush3.bf16.msra.mxu0 %v14211_v18 }
 0x756   : > { %v8702_v55 = vcombine.low %v8694_v33, %v8696_v8  ;;  %12628 = vmatprep.subr.bf16.mxu0 %v14212_v17  ;;  %v10394_v17 = vld [vmem:[%s18323_s10] sm:$0x1] }
 0x757   : > { %v8657_v41 = vpop.f32.mrf.mxu0  ;;  %v8982_v5 = vpop.f32.mrf.mxu1 }
 0x758   : > { %v8709_v32 = vrot.slane %v8702_v55, %v18058_v61 }
 0x759   : > { %v8983_v9 = vpop.f32.mrf.mxu1  ;;  %v9019_v51 = vpop.f32.mrf.mxu0  ;;  %12629 = vmatpush3.bf16.msra.mxu0 %v14213_v19 }
 0x75a   : > { %v8716_v16 = vrot.slane %v8709_v32, %v18058_v61  ;;  %v9020_v57 = vadd.f32 %v9019_v51, %v8978_v43  ;;  %12630 = vmatprep.subr.bf16.mxu0 %v14214_v52 }
 0x75b   : > { %v9021_v40 = vpop.f32.mrf.mxu0  ;;  %v9345_v0 = vpop.f32.mrf.mxu1 }
 0x75c   : > { %v8718_v42 = vadd.f32 %v8716_v16, %v8392_v7  ;;  %v9022_v37 = vadd.f32 %v9021_v40, %v8980_v36 }
 0x75d   : > { %v9023_v49 = vpop.f32.mrf.mxu0  ;;  %v9347_v10 = vpop.f32.mrf.mxu1  ;;  %12631 = vmatpush3.bf16.msra.mxu0 %v14215_v27 }
 0x75e   : > { %v9028_v22 = vcombine.low %v9020_v57, %v9022_v37 }
 0x75f   : > { %v9024_v54 = vpop.f32.mrf.mxu0  ;;  %v9349_v24 = vpop.f32.mrf.mxu1 }
 0x760   : > { %v9035_v45 = vrot.slane %v9028_v22, %v18058_v61 }
 0x761   : > { %v9350_v3 = vpop.f32.mrf.mxu1 }
 0x762   : > { %v9042_v35 = vrot.slane %v9035_v45, %v18058_v61 }
 0x764   : > { %v9044_v59 = vadd.f32 %v9042_v35, %v8718_v42 }
 0x799   : > { %v9304_v39 = vpop.f32.mrf.mxu0 }
 0x79a   : > { %v9346_v14 = vadd.f32 %v9345_v0, %v9304_v39 }
 0x79b   : > { %v9306_v23 = vpop.f32.mrf.mxu0  ;;  %v9630_v2 = vpop.f32.mrf.mxu1 }
 0x79c   : > { %v9348_v62 = vadd.f32 %v9347_v10, %v9306_v23 }
 0x79d   : > { %v9308_v13 = vpop.f32.mrf.mxu0  ;;  %v9632_v31 = vpop.f32.mrf.mxu1 }
 0x79e   : > { %v9354_v26 = vcombine.low %v9346_v14, %v9348_v62 }
 0x79f   : > { %v9309_v60 = vpop.f32.mrf.mxu0  ;;  %v9634_v7 = vpop.f32.mrf.mxu1 }
 0x7a0   : > { %v9361_v25 = vrot.slane %v9354_v26, %v18058_v61 }
 0x7a1   : > { %v9635_v20 = vpop.f32.mrf.mxu1  ;;  %v9671_v47 = vpop.f32.mrf.mxu0 }
 0x7a2   : > { %v9368_v29 = vrot.slane %v9361_v25, %v18058_v61  ;;  %v9672_v4 = vadd.f32 %v9671_v47, %v9630_v2 }
 0x7a3   : > { %v9673_v53 = vpop.f32.mrf.mxu0  ;;  %v9997_v6 = vpop.f32.mrf.mxu1 }
 0x7a4   : > { %v9370_v38 = vadd.f32 %v9368_v29, %v9044_v59  ;;  %v9674_v34 = vadd.f32 %v9673_v53, %v9632_v31 }
 0x7a5   : > { %v9675_v12 = vpop.f32.mrf.mxu0  ;;  %v9999_v28 = vpop.f32.mrf.mxu1 }
 0x7a6   : > { %v9680_v63 = vcombine.low %v9672_v4, %v9674_v34 }
 0x7a7   : > { %v9676_v33 = vpop.f32.mrf.mxu0  ;;  %v10001_v44 = vpop.f32.mrf.mxu1 }
 0x7a8   : > { %v9687_v43 = vrot.slane %v9680_v63, %v18058_v61 }
 0x7a9   : > { %v10002_v8 = vpop.f32.mrf.mxu1 }
 0x7aa   : > { %v9694_v11 = vrot.slane %v9687_v43, %v18058_v61 }
 0x7ac   : > { %v9696_v36 = vadd.f32 %v9694_v11, %v9370_v38 }
 0x7e1   : > { %v9956_v55 = vpop.f32.mrf.mxu0 }
 0x7e2   : > { %v9998_v32 = vadd.f32 %v9997_v6, %v9956_v55 }
 0x7e3   : > { %v9958_v41 = vpop.f32.mrf.mxu0  ;;  %v10282_v5 = vpop.f32.mrf.mxu1 }
 0x7e4   : > { %v10000_v9 = vadd.f32 %v9999_v28, %v9958_v41 }
 0x7e5   : > { %v9960_v51 = vpop.f32.mrf.mxu0  ;;  %v10284_v16 = vpop.f32.mrf.mxu1 }
 0x7e6   : > { %v10006_v57 = vcombine.low %v9998_v32, %v10000_v9 }
 0x7e7   : > { %v9961_v40 = vpop.f32.mrf.mxu0  ;;  %v10286_v0 = vpop.f32.mrf.mxu1 }
 0x7e8   : > { %v10013_v42 = vrot.slane %v10006_v57, %v18058_v61 }
 0x7e9   : > { %v10287_v37 = vpop.f32.mrf.mxu1  ;;  %v10323_v49 = vpop.f32.mrf.mxu0 }
 0x7ea   : > { %v10020_v10 = vrot.slane %v10013_v42, %v18058_v61  ;;  %v10324_v54 = vadd.f32 %v10323_v49, %v10282_v5 }
 0x7eb   : > { %v10325_v22 = vpop.f32.mrf.mxu0 }
 0x7ec   : > { %v10326_v24 = vadd.f32 %v10325_v22, %v10284_v16  ;;  %v10022_v45 = vadd.f32 %v10020_v10, %v9696_v36 }
 0x7ed   : > { %v10327_v3 = vpop.f32.mrf.mxu0 }
 0x7ee   : > { %v10332_v46 = vcombine.low %v10324_v54, %v10326_v24 }
 0x7ef   : > { %v10328_v35 = vpop.f32.mrf.mxu0 }
 0x7f0   : > { %v10339_v48 = vrot.slane %v10332_v46, %v18058_v61 }
 0x7f2   : > { %v10346_v59 = vrot.slane %v10339_v48, %v18058_v61 }
 0x7f4   : > { %v10348_v1 = vadd.f32 %v10346_v59, %v10022_v45 }
 0x7f6   : > { %v10353_v30 = vrot.slane %v10348_v1, %v16347_v58  ;;  %v10357_v15 = vrot.slane %v10348_v1, %v16355_v21 }
 0x7f8   : > { %v10360_v50 = vpack.c.bf16 %v10353_v30, %v10353_v30  ;;  %v10361_v56 = vpack.c.bf16 %v10357_v15, %v10357_v15 }
 0x7fa   : > { %10523 = vmatprep.mubr.bf16.mxu0 %v10361_v56 }
 0x7fb   : > { %10524 = vmatmul.mubr.bf16.vlgmr.msra.gmra.mxu0 %v10360_v50 }
 0x8bb   : > { %v12632_v18 = vpop.f32.mrf.mxu0 }
 0x8bd   : > { %v12633_v19 = vpop.f32.mrf.mxu0 }
 0x8be   : > { %v12634_v52 = vadd.f32 %v12633_v19, %v12632_v18 }
 0x8bf   : > { %v12635_v27 = vpop.f32.mrf.mxu0 }
 0x8c0   : > { %v10526_v61 = vadd.f32 %v12634_v52, %v10394_v17 }
 0x8c1   : > { %v12636_v39 = vpop.f32.mrf.mxu0 }
 0x8c2   : > { %10532 = vrot.lane.b32.xlu1 %v10526_v61, %s14341_s15  ;;  %v10538_v58 = vsel %vm10537_vm6, %v10526_v61, -inf }
 0x8c3   : > { %10539 = vmax.xlane.f32.xlu0 %v10538_v58 }
 0x934   : > { %v10533_v21 = vpop.permute.xlu1 %10532 }
 0x935   : > { %10536 = vst.msk [vmem:[%s455_s27] sm:$0x1] %vm10535_vm7, %v10533_v21  ;;  %s14245_s27 = scalar_lea.vmem %s18241_s20, 16 }
 0x936   : > { %p14246_p11 = scmp.ne.s32.totalorder %s18241_s20, %s14245_s27  ;;  %p14253_p1 = scmp.lt.s32.totalorder %s14251_s21, %s14245_s27 }
 0x938   : > { %p14247_p12 = pnand %p14246_p11, %p14452_p5  ;;  %p14254_p2 = por %p14253_p1, %p14252_p0 }
 0x93a   : > { %p14248_p13 = pneg %p14247_p12 }
 0x93c   : > { %p14255_p3 = pnand %p14254_p2, %p14248_p13 }
 0x94c   : > { %v10540_v14 = vpop.xlane.xlu0 %10539 }
 0x94d   : > { %v10541_v23 = vsub.f32 %v10526_v61, %v10540_v14 }
 0x94f   : > { %v10542_v2 = vmul.f32 1.442695, %v10541_v23 }
 0x951   : > { %14216 = vpow2.f32 %v10542_v2 }
 0x95e   : > { %v14217_v62 = vpop.eup %14216 }
 0x95f   : > { %v10544_v13 = vsel %vm10537_vm6, %v14217_v62, 0.0 }
 0x960   : > { %10545 = vadd.xlane.f32.xlu0 %v10544_v13 }
 0x9e9   : > { %v10546_v31 = vpop.xlane.xlu0 %10545 }
 0x9ea   : > { %14218 = vrcp.f32 %v10546_v31 }
 0x9eb   : > { %14220 = vlog2.f32 %v10546_v31 }
 0x9f7   : > { %v14219_v26 = vpop.eup %14218 }
 0x9f8   : > { %v14221_v60 = vpop.eup %14220  ;;  %v10548_v7 = vmul.f32 %v14219_v26, %v14217_v62 }
 0x9f9   : > { %v10551_v25 = vmul.f32 0.6931472, %v14221_v60 }
 0x9fa   : > { %10549 = vst.msk [vmem:[%s436_s17] sm:$0x1] %vm10537_vm6, %v10548_v7 }
 0x9fb   : > { %v10552_v20 = vsub.f32 %v10541_v23, %v10551_v25 }
 0x9fc   : > { %14258 = shalt.err (!%p14255_p3)
}
 0x9fd   : > { %s14259_s24 = scalar_lea.hbm %s18239_s19, 16  ;;  %s14263_s15 = scalar_lea.hbm %s18324_s11, 32 }
 0x9fe   : > { %p14260_p4 = scmp.ne.s32.totalorder %s18239_s19, %s14259_s24  ;;  %p14264_p9 = scmp.lt.s32.totalorder %s18239_s19, %s18324_s11 }
 0x9ff   : > { %p14265_p10 = scmp.lt.s32.totalorder %s14263_s15, %s14259_s24 }
 0xa00   : > { %p14261_p7 = pnand %p14260_p4, %p14452_p5 }
 0xa01   : > { %p14266_p11 = por %p14265_p10, %p14264_p9 }
 0xa02   : > { %p14262_p8 = pneg %p14261_p7 }
 0xa04   : > { %p14267_p12 = pnand %p14266_p11, %p14262_p8 }
 0xa06   : > { %14270 = shalt.err (!%p14267_p12)
}
 0xa07   : > { %12723 = dma.vmem_to_hbm [thread:$0]  (%p14452_p5), %s18241_s20, 16, %s18239_s19, %s10555_s25  }
 0xa08   : > { %s18342_s21 = scalar_lea.vmem [#allocation4], %s18229_s23  ;;  %s10559_s0 = scalar_lea.sflag [#allocation5], %s18229_s23 }
 0xa09   : > { %10553 = vst.msk [vmem:[%s18342_s21] sm:$0x1] %vm10537_vm6, %v10552_v20  ;;  %s14271_s27 = scalar_lea.vmem %s18249_s22, 16  ;;  %s14343_s30 = smov [#allocation4]  }
 0xa0a   : > { %p14272_p13 = scmp.ne.s32.totalorder %s18249_s22, %s14271_s27  ;;  %s14275_s24 = sshll.u32 %s14343_s30, 4  ;;  %s14276_s24 = int_to_ptr.vmem [resolvable:$false] %s14275_s24 }
 0xa0b   : > { %s14277_s17 = scalar_lea.vmem %s14276_s24, 32  ;;  %p14278_p2 = scmp.lt.s32.totalorder %s18249_s22, %s14276_s24 }
 0xa0c   : > { %p14273_p0 = pnand %p14272_p13, %p14452_p5  ;;  %p14279_p3 = scmp.lt.s32.totalorder %s14277_s17, %s14271_s27 }
 0xa0e   : > { %p14274_p1 = pneg %p14273_p0  ;;  %p14280_p4 = por %p14279_p3, %p14278_p2 }
 0xa10   : > { %p14281_p7 = pnand %p14280_p4, %p14274_p1 }
 0xa12   : > { %14284 = shalt.err (!%p14281_p7)
}
 0xa13   : > { %s14285_s20 = scalar_lea.hbm %s18247_s16, 16  ;;  %s14289_s25 = scalar_lea.hbm %s18325_s12, 32 }
 0xa14   : > { %p14286_p8 = scmp.ne.s32.totalorder %s18247_s16, %s14285_s20  ;;  %p14290_p11 = scmp.lt.s32.totalorder %s18247_s16, %s18325_s12 }
 0xa15   : > { %p14291_p12 = scmp.lt.s32.totalorder %s14289_s25, %s14285_s20 }
 0xa16   : > { %p14287_p9 = pnand %p14286_p8, %p14452_p5 }
 0xa17   : > { %p14292_p13 = por %p14291_p12, %p14290_p11 }
 0xa18   : > { %p14288_p10 = pneg %p14287_p9 }
 0xa1a   : > { %p14293_p0 = pnand %p14292_p13, %p14288_p10 }
 0xa1c   : > { %14296 = shalt.err (!%p14293_p0)
}
 0xa1d   : > { %12724 = dma.vmem_to_hbm [thread:$0]  (%p14452_p5), %s18249_s22, 16, %s18247_s16, %s10559_s0  }
 0xa1e PF: > { %s18343_s14 = sld [smem:[#allocation8_spill]]  ;;  %p12734_p1 = scmp.ge.s32.totalorder %s14335_s28, 2 }
 0xa20   : > { %p12728_p2 = pnand %p12734_p1, %p14456_p6 }
 0xa22   : > { %p12729_p3 = pneg %p12728_p2 }
 0xa24   : > { %s10602_s27 = sand.u32 1, %s18343_s14  }
 0xa25   : > { %s10603_s30 = scalar_lea.sflag [#allocation3], %s10602_s27 }
 0xa26   : > { %14314 = dma.done.wait (%p12729_p3), %s10603_s30, 16  }
 0xa27   : > { %14316 = vsyncadd (%p12729_p3), %s10603_s30, 4294967280  ;;  %s10611_s24 = scalar_lea.sflag [#allocation5], %s10602_s27 }
 0xa28   : > { %14318 = dma.done.wait (%p12729_p3), %s10611_s24, 16  }
 0xa29   : > { %14320 = vsyncadd (%p12729_p3), %s10611_s24, 4294967280  ;;  %s18345_s28 = sld [smem:[#allocation10_spill]]  ;;  %s18348_s25 = smov %s14327_s26 }
 0xa2a   : > { %s18346_s18 = sld [smem:[#allocation9_spill]] }
 0xa2b   : > { %s18347_s27 = sld [smem:[#allocation11_spill]] }
 0xa2f   : > { %p27_p5 = scmp.ge.s32.totalorder %s18345_s28, 4  }
 0xa30   : > { %s18349_s26 = smov %s18346_s18 }
 0xa31   :  { %29 = sbr.rel (!%p27_p5) target bundleno = 7 (0x7), region = 140 }
 0xa36   :  { %10621 = vsyncpa [#allocation3], 1 }
 0xa37   :  { %10623 = vsyncpa [#allocation3 + $0x1], 1 }
 0xa38   :  { %10624 = vsyncpa [#allocation5], 1 }
 0xa39   :  { %10626 = vsyncpa [#allocation5 + $0x1], 1 }

</bundles_post_ra>
